<compile_context>
chip_gen: v7x
topology: tpu7x:2x2x1
jax: 0.10.0
libtpu: 0.0.40
codegen_flags: <defaults>
</compile_context>

<pallas_src>
import jax
import jax.numpy as jnp
from jax.experimental import pallas as pl
from jax.experimental.pallas import tpu as pltpu


def _round_up(x, m):
    return ((x + m - 1) // m) * m


def _fold_bn(gamma, beta, running_mean, running_var, eps=1e-5):
    """Fold eval-mode BatchNorm1d into per-feature scale/shift."""
    scale = gamma / jnp.sqrt(running_var + eps)
    shift = beta - running_mean * scale
    return scale[None, :].astype(jnp.float32), shift[None, :].astype(jnp.float32)


# -----------------------------------------------------------------------------
# Kernel
# -----------------------------------------------------------------------------
def mixed_input_kernel(fp_ref, img_ref,
                       fw1, fb1, fs1, ft1, fw2, fb2, fs2, ft2, fw3, fb3,
                       iw1, ib1, is1, it1, iw2, ib2, is2, it2, iw3, ib3,
                       cw1f, cw1g, cb1, cs1, ct1, cw2, cb2,
                       out_ref):
    """Fused two-branch MLP + head.  Weights are bf16; activations stay f32."""
    bf16 = jnp.bfloat16

    def linear(x, w_ref, b_ref):
        # bf16 MXU inputs, f32 accumulation; bias add in f32 on the VPU.
        return jnp.dot(x.astype(bf16), w_ref[...],
                       preferred_element_type=jnp.float32) + b_ref[...]

    def relu(x):
        return jnp.maximum(x, 0.0)

    def bn(x, s_ref, t_ref):
        return x * s_ref[...] + t_ref[...]

    # ---- fingerprint branch ----  (Dropout -> identity in eval mode)
    f = fp_ref[...]
    f = bn(relu(linear(f, fw1, fb1)), fs1, ft1)
    f = bn(relu(linear(f, fw2, fb2)), fs2, ft2)
    f = relu(linear(f, fw3, fb3))                          # (TB, 128)

    # ---- image branch ----
    g = img_ref[...]
    g = bn(relu(linear(g, iw1, ib1)), is1, it1)
    g = bn(relu(linear(g, iw2, ib2)), is2, it2)
    g = relu(linear(g, iw3, ib3))                          # (TB, 128)

    # ---- head: concat replaced by a split weight (no cross-lane shuffle) ----
    h = (jnp.dot(f.astype(bf16), cw1f[...], preferred_element_type=jnp.float32)
         + jnp.dot(g.astype(bf16), cw1g[...], preferred_element_type=jnp.float32)
         + cb1[...])
    h = bn(relu(h), cs1, ct1)                              # (TB, 128)

    # Lane-dense padded final layer: column 0 carries the real scalar output.
    out_ref[...] = linear(h, cw2, cb2)                     # (TB, 128)


# -----------------------------------------------------------------------------
# Parameter preparation (pad / split / cast) — done once, outside the hot path.
# -----------------------------------------------------------------------------
def prepare_params(params):
    """Raw f32 params (PyTorch shapes, weights pre-transposed) -> kernel params."""
    (fw1, fb1, fs1, ft1, fw2, fb2, fs2, ft2, fw3, fb3,
     iw1, ib1, is1, it1, iw2, ib2, is2, it2, iw3, ib3,
     cw1, cb1, cs1, ct1, cw2, cb2) = params
    bf = jnp.bfloat16

    # Pad contraction dims of the first layers up to multiples of 128.
    kf, kg = fw1.shape[0], iw1.shape[0]
    fw1p = jnp.pad(fw1, ((0, _round_up(kf, 128) - kf), (0, 0)))
    iw1p = jnp.pad(iw1, ((0, _round_up(kg, 128) - kg), (0, 0)))

    # Split the head weight so the concat disappears.
    cw1_f, cw1_g = cw1[:128], cw1[128:]

    # Pad the (128,1) output projection to a lane-dense (128,128).
    cw2p = jnp.pad(cw2, ((0, 0), (0, 128 - cw2.shape[1])))
    cb2p = jnp.pad(cb2, ((0, 0), (0, 128 - cb2.shape[1])))

    w = lambda a: a.astype(bf)
    return (w(fw1p), fb1, fs1, ft1, w(fw2), fb2, fs2, ft2, w(fw3), fb3,
            w(iw1p), ib1, is1, it1, w(iw2), ib2, is2, it2, w(iw3), ib3,
            w(cw1_f), w(cw1_g), cb1, cs1, ct1, w(cw2p), cb2p)


# -----------------------------------------------------------------------------
# Wrapper
# -----------------------------------------------------------------------------
def mixed_input_forward(fp, img, prepped, *, max_batch_tile=128):
    B = fp.shape[0]
    kf_pad = prepped[0].shape[0]    # padded fingerprint feature dim
    kg_pad = prepped[10].shape[0]   # padded image feature dim

    # Pad input feature dims (zeros match the zero-padded weight rows).
    fp_p = jnp.pad(fp.astype(jnp.float32), ((0, 0), (0, kf_pad - fp.shape[1])))
    img_p = jnp.pad(img.astype(jnp.float32), ((0, 0), (0, kg_pad - img.shape[1])))

    # Pad batch to a sublane multiple and pick a batch tile.
    b8 = _round_up(B, 8)
    if b8 <= max_batch_tile:
        tb, b_pad = b8, b8
    else:
        tb, b_pad = max_batch_tile, _round_up(B, max_batch_tile)
    fp_p = jnp.pad(fp_p, ((0, b_pad - B), (0, 0)))
    img_p = jnp.pad(img_p, ((0, b_pad - B), (0, 0)))
    grid = (b_pad // tb,)

    # Weights: constant index_map -> DMA'd into VMEM once, reused by all tiles.
    weight_specs = [pl.BlockSpec(p.shape, lambda i: (0, 0)) for p in prepped]
    in_specs = ([pl.BlockSpec((tb, kf_pad), lambda i: (i, 0)),
                 pl.BlockSpec((tb, kg_pad), lambda i: (i, 0))]
                + weight_specs)
    out_spec = pl.BlockSpec((tb, 128), lambda i: (i, 0))

    # Advisory cost estimate for XLA scheduling (memory-bound kernel).
    flops = 2 * b_pad * (kf_pad * 512 + 512 * 256 + 256 * 128
                         + kg_pad * 1024 + 1024 * 256 + 256 * 128
                         + 2 * 128 * 128 + 128 * 128)
    bytes_accessed = sum(int(p.size) * p.dtype.itemsize for p in prepped)
    bytes_accessed += (int(fp_p.size) + int(img_p.size) + b_pad * 128) * 4

    out = pl.pallas_call(
        mixed_input_kernel,
        out_shape=jax.ShapeDtypeStruct((b_pad, 128), jnp.float32),
        grid=grid,
        in_specs=in_specs,
        out_specs=out_spec,
        compiler_params=pltpu.CompilerParams(
            dimension_semantics=("parallel",),
            vmem_limit_bytes=16 << 20),
        cost_estimate=pl.CostEstimate(flops=flops, transcendentals=0,
                                      bytes_accessed=bytes_accessed),
    )(fp_p, img_p, *prepped)

    return out[:B, :1]   # real result lives in column 0


# -----------------------------------------------------------------------------
# Parameter init (mirrors the nn.Module layer shapes, weights pre-transposed)
# -----------------------------------------------------------------------------
def init_params(key, fingerprint_size, image_feature_size):
    keys = iter(jax.random.split(key, 64))

    def linear(fan_in, fan_out):
        bound = 1.0 / jnp.sqrt(fan_in)
        w = jax.random.uniform(next(keys), (fan_in, fan_out), jnp.float32, -bound, bound)
        b = jax.random.uniform(next(keys), (1, fan_out), jnp.float32, -bound, bound)
        return w, b

    def batchnorm(n):
        gamma = 1.0 + 0.1 * jax.random.normal(next(keys), (n,), jnp.float32)
        beta = 0.1 * jax.random.normal(next(keys), (n,), jnp.float32)
        running_mean = 0.1 * jax.random.normal(next(keys), (n,), jnp.float32)
        running_var = 1.0 + 0.1 * jax.random.uniform(next(keys), (n,), jnp.float32)
        return _fold_bn(gamma, beta, running_mean, running_var)

    p = []
    # fingerprint branch
    w, b = linear(fingerprint_size, 512); s, t = batchnorm(512); p += [w, b, s, t]
    w, b = linear(512, 256);              s, t = batchnorm(256); p += [w, b, s, t]
    w, b = linear(256, 128);                                      p += [w, b]
    # image branch
    w, b = linear(image_feature_size, 1024); s, t = batchnorm(1024); p += [w, b, s, t]
    w, b = linear(1024, 256);                s, t = batchnorm(256);  p += [w, b, s, t]
    w, b = linear(256, 128);                                          p += [w, b]
    # head
    w, b = linear(256, 128); s, t = batchnorm(128); p += [w, b, s, t]
    w, b = linear(128, 1);                           p += [w, b]
    return tuple(p)


# -----------------------------------------------------------------------------
# Pure-JAX reference (same bf16 matmul inputs / f32 accumulation as the kernel)
# -----------------------------------------------------------------------------
def reference_forward(fp, img, prepped):
    (fw1, fb1, fs1, ft1, fw2, fb2, fs2, ft2, fw3, fb3,
     iw1, ib1, is1, it1, iw2, ib2, is2, it2, iw3, ib3,
     cw1f, cw1g, cb1, cs1, ct1, cw2, cb2) = prepped
    bf = jnp.bfloat16
    relu = lambda x: jnp.maximum(x, 0.0)

    def lin(x, w, b):
        return jnp.dot(x.astype(bf), w, preferred_element_type=jnp.float32) + b

    fp_p = jnp.pad(fp.astype(jnp.float32), ((0, 0), (0, fw1.shape[0] - fp.shape[1])))
    img_p = jnp.pad(img.astype(jnp.float32), ((0, 0), (0, iw1.shape[0] - img.shape[1])))

    f = relu(lin(fp_p, fw1, fb1)) * fs1 + ft1
    f = relu(lin(f, fw2, fb2)) * fs2 + ft2
    f = relu(lin(f, fw3, fb3))
    g = relu(lin(img_p, iw1, ib1)) * is1 + it1
    g = relu(lin(g, iw2, ib2)) * is2 + it2
    g = relu(lin(g, iw3, ib3))
    h = (jnp.dot(f.astype(bf), cw1f, preferred_element_type=jnp.float32)
         + jnp.dot(g.astype(bf), cw1g, preferred_element_type=jnp.float32) + cb1)
    h = relu(h) * cs1 + ct1
    out = lin(h, cw2, cb2)
    return out[:, :1]


if __name__ == "__main__":
    key = jax.random.PRNGKey(0)
    k_fp, k_img, k_params = jax.random.split(key, 3)

    batch = 4
    fingerprint_size = 167     # MACCS keys
    image_feature_size = 256

    fingerprint = jax.random.uniform(k_fp, (batch, fingerprint_size), jnp.float32)
    image = jax.random.normal(k_img, (batch, image_feature_size), jnp.float32)

    raw_params = init_params(k_params, fingerprint_size, image_feature_size)
    prepped = prepare_params(raw_params)

    out = mixed_input_forward(fingerprint, image, prepped)
    out = jax.block_until_ready(out)

    ref = reference_forward(fingerprint, image, prepped)
    assert out.shape == (batch, 1)
    assert jnp.allclose(out, ref, atol=1e-2, rtol=1e-2)

    print("KERNEL_OK")
</pallas_src>

<mosaic_0001>
module attributes {stable_mosaic.version = 11 : i64} {
  func.func @mixed_input_kernel(%arg0: i32, %arg1: memref<8x256xf32, #tpu.memory_space<vmem>>, %arg2: memref<8x256xf32, #tpu.memory_space<vmem>>, %arg3: memref<256x512xbf16, #tpu.memory_space<vmem>>, %arg4: memref<1x512xf32, #tpu.memory_space<vmem>>, %arg5: memref<1x512xf32, #tpu.memory_space<vmem>>, %arg6: memref<1x512xf32, #tpu.memory_space<vmem>>, %arg7: memref<512x256xbf16, #tpu.memory_space<vmem>>, %arg8: memref<1x256xf32, #tpu.memory_space<vmem>>, %arg9: memref<1x256xf32, #tpu.memory_space<vmem>>, %arg10: memref<1x256xf32, #tpu.memory_space<vmem>>, %arg11: memref<256x128xbf16, #tpu.memory_space<vmem>>, %arg12: memref<1x128xf32, #tpu.memory_space<vmem>>, %arg13: memref<256x1024xbf16, #tpu.memory_space<vmem>>, %arg14: memref<1x1024xf32, #tpu.memory_space<vmem>>, %arg15: memref<1x1024xf32, #tpu.memory_space<vmem>>, %arg16: memref<1x1024xf32, #tpu.memory_space<vmem>>, %arg17: memref<1024x256xbf16, #tpu.memory_space<vmem>>, %arg18: memref<1x256xf32, #tpu.memory_space<vmem>>, %arg19: memref<1x256xf32, #tpu.memory_space<vmem>>, %arg20: memref<1x256xf32, #tpu.memory_space<vmem>>, %arg21: memref<256x128xbf16, #tpu.memory_space<vmem>>, %arg22: memref<1x128xf32, #tpu.memory_space<vmem>>, %arg23: memref<128x128xbf16, #tpu.memory_space<vmem>>, %arg24: memref<128x128xbf16, #tpu.memory_space<vmem>>, %arg25: memref<1x128xf32, #tpu.memory_space<vmem>>, %arg26: memref<1x128xf32, #tpu.memory_space<vmem>>, %arg27: memref<1x128xf32, #tpu.memory_space<vmem>>, %arg28: memref<128x128xbf16, #tpu.memory_space<vmem>>, %arg29: memref<1x128xf32, #tpu.memory_space<vmem>>, %arg30: memref<8x128xf32, #tpu.memory_space<vmem>>) attributes {dimension_semantics = [#tpu.dimension_semantics<parallel>], iteration_bounds = array<i64: 1>, scalar_prefetch = 0 : i64, scratch_operands = 0 : i64, tpu.core_type = #tpu.core_type<tc>, window_params = [{transform_indices = @transform_0, window_bounds = array<i64: 8, 256>}, {transform_indices = @transform_1, window_bounds = array<i64: 8, 256>}, {pipeline_mode = #tpu.pipeline_mode<synchronous>, transform_indices = @transform_2, window_bounds = array<i64: 256, 512>}, {pipeline_mode = #tpu.pipeline_mode<synchronous>, transform_indices = @transform_3, window_bounds = array<i64: 1, 512>}, {pipeline_mode = #tpu.pipeline_mode<synchronous>, transform_indices = @transform_4, window_bounds = array<i64: 1, 512>}, {pipeline_mode = #tpu.pipeline_mode<synchronous>, transform_indices = @transform_5, window_bounds = array<i64: 1, 512>}, {pipeline_mode = #tpu.pipeline_mode<synchronous>, transform_indices = @transform_6, window_bounds = array<i64: 512, 256>}, {pipeline_mode = #tpu.pipeline_mode<synchronous>, transform_indices = @transform_7, window_bounds = array<i64: 1, 256>}, {pipeline_mode = #tpu.pipeline_mode<synchronous>, transform_indices = @transform_8, window_bounds = array<i64: 1, 256>}, {pipeline_mode = #tpu.pipeline_mode<synchronous>, transform_indices = @transform_9, window_bounds = array<i64: 1, 256>}, {pipeline_mode = #tpu.pipeline_mode<synchronous>, transform_indices = @transform_10, window_bounds = array<i64: 256, 128>}, {pipeline_mode = #tpu.pipeline_mode<synchronous>, transform_indices = @transform_11, window_bounds = array<i64: 1, 128>}, {pipeline_mode = #tpu.pipeline_mode<synchronous>, transform_indices = @transform_12, window_bounds = array<i64: 256, 1024>}, {pipeline_mode = #tpu.pipeline_mode<synchronous>, transform_indices = @transform_13, window_bounds = array<i64: 1, 1024>}, {pipeline_mode = #tpu.pipeline_mode<synchronous>, transform_indices = @transform_14, window_bounds = array<i64: 1, 1024>}, {pipeline_mode = #tpu.pipeline_mode<synchronous>, transform_indices = @transform_15, window_bounds = array<i64: 1, 1024>}, {pipeline_mode = #tpu.pipeline_mode<synchronous>, transform_indices = @transform_16, window_bounds = array<i64: 1024, 256>}, {pipeline_mode = #tpu.pipeline_mode<synchronous>, transform_indices = @transform_17, window_bounds = array<i64: 1, 256>}, {pipeline_mode = #tpu.pipeline_mode<synchronous>, transform_indices = @transform_18, window_bounds = array<i64: 1, 256>}, {pipeline_mode = #tpu.pipeline_mode<synchronous>, transform_indices = @transform_19, window_bounds = array<i64: 1, 256>}, {pipeline_mode = #tpu.pipeline_mode<synchronous>, transform_indices = @transform_20, window_bounds = array<i64: 256, 128>}, {pipeline_mode = #tpu.pipeline_mode<synchronous>, transform_indices = @transform_21, window_bounds = array<i64: 1, 128>}, {pipeline_mode = #tpu.pipeline_mode<synchronous>, transform_indices = @transform_22, window_bounds = array<i64: 128, 128>}, {pipeline_mode = #tpu.pipeline_mode<synchronous>, transform_indices = @transform_23, window_bounds = array<i64: 128, 128>}, {pipeline_mode = #tpu.pipeline_mode<synchronous>, transform_indices = @transform_24, window_bounds = array<i64: 1, 128>}, {pipeline_mode = #tpu.pipeline_mode<synchronous>, transform_indices = @transform_25, window_bounds = array<i64: 1, 128>}, {pipeline_mode = #tpu.pipeline_mode<synchronous>, transform_indices = @transform_26, window_bounds = array<i64: 1, 128>}, {pipeline_mode = #tpu.pipeline_mode<synchronous>, transform_indices = @transform_27, window_bounds = array<i64: 128, 128>}, {pipeline_mode = #tpu.pipeline_mode<synchronous>, transform_indices = @transform_28, window_bounds = array<i64: 1, 128>}, {transform_indices = @transform_29, window_bounds = array<i64: 8, 128>}]} {
    %c0 = arith.constant 0 : index
    %c0_0 = arith.constant 0 : index
    %0 = vector.load %arg1[%c0, %c0_0] : memref<8x256xf32, #tpu.memory_space<vmem>>, vector<8x256xf32>
    %1 = arith.truncf %0 : vector<8x256xf32> to vector<8x256xbf16>
    %c0_1 = arith.constant 0 : index
    %c0_2 = arith.constant 0 : index
    %2 = vector.load %arg3[%c0_1, %c0_2] : memref<256x512xbf16, #tpu.memory_space<vmem>>, vector<256x512xbf16>
    %cst = arith.constant dense<0.000000e+00> : vector<8x512xf32>
    %3 = tpu.matmul %1, %2, %cst {dimension_numbers = #tpu.dot_dimension_numbers<[1], [0], [0], [1], [0, 0, 1, 1], [], []>} : vector<8x256xbf16>, vector<256x512xbf16>, vector<8x512xf32> -> vector<8x512xf32>
    %c0_3 = arith.constant 0 : index
    %c0_4 = arith.constant 0 : index
    %4 = vector.load %arg4[%c0_3, %c0_4] : memref<1x512xf32, #tpu.memory_space<vmem>>, vector<1x512xf32>
    %5 = vector.broadcast %4 : vector<1x512xf32> to vector<8x512xf32>
    %6 = arith.addf %3, %5 : vector<8x512xf32>
    %cst_5 = arith.constant 0.000000e+00 : f32
    %7 = vector.broadcast %cst_5 : f32 to vector<8x512xf32>
    %8 = arith.maximumf %6, %7 : vector<8x512xf32>
    %c0_6 = arith.constant 0 : index
    %c0_7 = arith.constant 0 : index
    %9 = vector.load %arg5[%c0_6, %c0_7] : memref<1x512xf32, #tpu.memory_space<vmem>>, vector<1x512xf32>
    %10 = vector.broadcast %9 : vector<1x512xf32> to vector<8x512xf32>
    %11 = arith.mulf %8, %10 : vector<8x512xf32>
    %c0_8 = arith.constant 0 : index
    %c0_9 = arith.constant 0 : index
    %12 = vector.load %arg6[%c0_8, %c0_9] : memref<1x512xf32, #tpu.memory_space<vmem>>, vector<1x512xf32>
    %13 = vector.broadcast %12 : vector<1x512xf32> to vector<8x512xf32>
    %14 = arith.addf %11, %13 : vector<8x512xf32>
    %15 = arith.truncf %14 : vector<8x512xf32> to vector<8x512xbf16>
    %c0_10 = arith.constant 0 : index
    %c0_11 = arith.constant 0 : index
    %16 = vector.load %arg7[%c0_10, %c0_11] : memref<512x256xbf16, #tpu.memory_space<vmem>>, vector<512x256xbf16>
    %cst_12 = arith.constant dense<0.000000e+00> : vector<8x256xf32>
    %17 = tpu.matmul %15, %16, %cst_12 {dimension_numbers = #tpu.dot_dimension_numbers<[1], [0], [0], [1], [0, 0, 1, 1], [], []>} : vector<8x512xbf16>, vector<512x256xbf16>, vector<8x256xf32> -> vector<8x256xf32>
    %c0_13 = arith.constant 0 : index
    %c0_14 = arith.constant 0 : index
    %18 = vector.load %arg8[%c0_13, %c0_14] : memref<1x256xf32, #tpu.memory_space<vmem>>, vector<1x256xf32>
    %19 = vector.broadcast %18 : vector<1x256xf32> to vector<8x256xf32>
    %20 = arith.addf %17, %19 : vector<8x256xf32>
    %cst_15 = arith.constant 0.000000e+00 : f32
    %21 = vector.broadcast %cst_15 : f32 to vector<8x256xf32>
    %22 = arith.maximumf %20, %21 : vector<8x256xf32>
    %c0_16 = arith.constant 0 : index
    %c0_17 = arith.constant 0 : index
    %23 = vector.load %arg9[%c0_16, %c0_17] : memref<1x256xf32, #tpu.memory_space<vmem>>, vector<1x256xf32>
    %24 = vector.broadcast %23 : vector<1x256xf32> to vector<8x256xf32>
    %25 = arith.mulf %22, %24 : vector<8x256xf32>
    %c0_18 = arith.constant 0 : index
    %c0_19 = arith.constant 0 : index
    %26 = vector.load %arg10[%c0_18, %c0_19] : memref<1x256xf32, #tpu.memory_space<vmem>>, vector<1x256xf32>
    %27 = vector.broadcast %26 : vector<1x256xf32> to vector<8x256xf32>
    %28 = arith.addf %25, %27 : vector<8x256xf32>
    %29 = arith.truncf %28 : vector<8x256xf32> to vector<8x256xbf16>
    %c0_20 = arith.constant 0 : index
    %c0_21 = arith.constant 0 : index
    %30 = vector.load %arg11[%c0_20, %c0_21] : memref<256x128xbf16, #tpu.memory_space<vmem>>, vector<256x128xbf16>
    %cst_22 = arith.constant dense<0.000000e+00> : vector<8x128xf32>
    %31 = tpu.matmul %29, %30, %cst_22 {dimension_numbers = #tpu.dot_dimension_numbers<[1], [0], [0], [1], [0, 0, 1, 1], [], []>} : vector<8x256xbf16>, vector<256x128xbf16>, vector<8x128xf32> -> vector<8x128xf32>
    %c0_23 = arith.constant 0 : index
    %c0_24 = arith.constant 0 : index
    %32 = vector.load %arg12[%c0_23, %c0_24] : memref<1x128xf32, #tpu.memory_space<vmem>>, vector<1x128xf32>
    %33 = vector.broadcast %32 : vector<1x128xf32> to vector<8x128xf32>
    %34 = arith.addf %31, %33 : vector<8x128xf32>
    %cst_25 = arith.constant 0.000000e+00 : f32
    %35 = vector.broadcast %cst_25 : f32 to vector<8x128xf32>
    %36 = arith.maximumf %34, %35 : vector<8x128xf32>
    %c0_26 = arith.constant 0 : index
    %c0_27 = arith.constant 0 : index
    %37 = vector.load %arg2[%c0_26, %c0_27] : memref<8x256xf32, #tpu.memory_space<vmem>>, vector<8x256xf32>
    %38 = arith.truncf %37 : vector<8x256xf32> to vector<8x256xbf16>
    %c0_28 = arith.constant 0 : index
    %c0_29 = arith.constant 0 : index
    %39 = vector.load %arg13[%c0_28, %c0_29] : memref<256x1024xbf16, #tpu.memory_space<vmem>>, vector<256x1024xbf16>
    %cst_30 = arith.constant dense<0.000000e+00> : vector<8x1024xf32>
    %40 = tpu.matmul %38, %39, %cst_30 {dimension_numbers = #tpu.dot_dimension_numbers<[1], [0], [0], [1], [0, 0, 1, 1], [], []>} : vector<8x256xbf16>, vector<256x1024xbf16>, vector<8x1024xf32> -> vector<8x1024xf32>
    %c0_31 = arith.constant 0 : index
    %c0_32 = arith.constant 0 : index
    %41 = vector.load %arg14[%c0_31, %c0_32] : memref<1x1024xf32, #tpu.memory_space<vmem>>, vector<1x1024xf32>
    %42 = vector.broadcast %41 : vector<1x1024xf32> to vector<8x1024xf32>
    %43 = arith.addf %40, %42 : vector<8x1024xf32>
    %cst_33 = arith.constant 0.000000e+00 : f32
    %44 = vector.broadcast %cst_33 : f32 to vector<8x1024xf32>
    %45 = arith.maximumf %43, %44 : vector<8x1024xf32>
    %c0_34 = arith.constant 0 : index
    %c0_35 = arith.constant 0 : index
    %46 = vector.load %arg15[%c0_34, %c0_35] : memref<1x1024xf32, #tpu.memory_space<vmem>>, vector<1x1024xf32>
    %47 = vector.broadcast %46 : vector<1x1024xf32> to vector<8x1024xf32>
    %48 = arith.mulf %45, %47 : vector<8x1024xf32>
    %c0_36 = arith.constant 0 : index
    %c0_37 = arith.constant 0 : index
    %49 = vector.load %arg16[%c0_36, %c0_37] : memref<1x1024xf32, #tpu.memory_space<vmem>>, vector<1x1024xf32>
    %50 = vector.broadcast %49 : vector<1x1024xf32> to vector<8x1024xf32>
    %51 = arith.addf %48, %50 : vector<8x1024xf32>
    %52 = arith.truncf %51 : vector<8x1024xf32> to vector<8x1024xbf16>
    %c0_38 = arith.constant 0 : index
    %c0_39 = arith.constant 0 : index
    %53 = vector.load %arg17[%c0_38, %c0_39] : memref<1024x256xbf16, #tpu.memory_space<vmem>>, vector<1024x256xbf16>
    %cst_40 = arith.constant dense<0.000000e+00> : vector<8x256xf32>
    %54 = tpu.matmul %52, %53, %cst_40 {dimension_numbers = #tpu.dot_dimension_numbers<[1], [0], [0], [1], [0, 0, 1, 1], [], []>} : vector<8x1024xbf16>, vector<1024x256xbf16>, vector<8x256xf32> -> vector<8x256xf32>
    %c0_41 = arith.constant 0 : index
    %c0_42 = arith.constant 0 : index
    %55 = vector.load %arg18[%c0_41, %c0_42] : memref<1x256xf32, #tpu.memory_space<vmem>>, vector<1x256xf32>
    %56 = vector.broadcast %55 : vector<1x256xf32> to vector<8x256xf32>
    %57 = arith.addf %54, %56 : vector<8x256xf32>
    %cst_43 = arith.constant 0.000000e+00 : f32
    %58 = vector.broadcast %cst_43 : f32 to vector<8x256xf32>
    %59 = arith.maximumf %57, %58 : vector<8x256xf32>
    %c0_44 = arith.constant 0 : index
    %c0_45 = arith.constant 0 : index
    %60 = vector.load %arg19[%c0_44, %c0_45] : memref<1x256xf32, #tpu.memory_space<vmem>>, vector<1x256xf32>
    %61 = vector.broadcast %60 : vector<1x256xf32> to vector<8x256xf32>
    %62 = arith.mulf %59, %61 : vector<8x256xf32>
    %c0_46 = arith.constant 0 : index
    %c0_47 = arith.constant 0 : index
    %63 = vector.load %arg20[%c0_46, %c0_47] : memref<1x256xf32, #tpu.memory_space<vmem>>, vector<1x256xf32>
    %64 = vector.broadcast %63 : vector<1x256xf32> to vector<8x256xf32>
    %65 = arith.addf %62, %64 : vector<8x256xf32>
    %66 = arith.truncf %65 : vector<8x256xf32> to vector<8x256xbf16>
    %c0_48 = arith.constant 0 : index
    %c0_49 = arith.constant 0 : index
    %67 = vector.load %arg21[%c0_48, %c0_49] : memref<256x128xbf16, #tpu.memory_space<vmem>>, vector<256x128xbf16>
    %cst_50 = arith.constant dense<0.000000e+00> : vector<8x128xf32>
    %68 = tpu.matmul %66, %67, %cst_50 {dimension_numbers = #tpu.dot_dimension_numbers<[1], [0], [0], [1], [0, 0, 1, 1], [], []>} : vector<8x256xbf16>, vector<256x128xbf16>, vector<8x128xf32> -> vector<8x128xf32>
    %c0_51 = arith.constant 0 : index
    %c0_52 = arith.constant 0 : index
    %69 = vector.load %arg22[%c0_51, %c0_52] : memref<1x128xf32, #tpu.memory_space<vmem>>, vector<1x128xf32>
    %70 = vector.broadcast %69 : vector<1x128xf32> to vector<8x128xf32>
    %71 = arith.addf %68, %70 : vector<8x128xf32>
    %cst_53 = arith.constant 0.000000e+00 : f32
    %72 = vector.broadcast %cst_53 : f32 to vector<8x128xf32>
    %73 = arith.maximumf %71, %72 : vector<8x128xf32>
    %74 = arith.truncf %36 : vector<8x128xf32> to vector<8x128xbf16>
    %c0_54 = arith.constant 0 : index
    %c0_55 = arith.constant 0 : index
    %75 = vector.load %arg23[%c0_54, %c0_55] : memref<128x128xbf16, #tpu.memory_space<vmem>>, vector<128x128xbf16>
    %cst_56 = arith.constant dense<0.000000e+00> : vector<8x128xf32>
    %76 = tpu.matmul %74, %75, %cst_56 {dimension_numbers = #tpu.dot_dimension_numbers<[1], [0], [0], [1], [0, 0, 1, 1], [], []>} : vector<8x128xbf16>, vector<128x128xbf16>, vector<8x128xf32> -> vector<8x128xf32>
    %77 = arith.truncf %73 : vector<8x128xf32> to vector<8x128xbf16>
    %c0_57 = arith.constant 0 : index
    %c0_58 = arith.constant 0 : index
    %78 = vector.load %arg24[%c0_57, %c0_58] : memref<128x128xbf16, #tpu.memory_space<vmem>>, vector<128x128xbf16>
    %cst_59 = arith.constant dense<0.000000e+00> : vector<8x128xf32>
    %79 = tpu.matmul %77, %78, %cst_59 {dimension_numbers = #tpu.dot_dimension_numbers<[1], [0], [0], [1], [0, 0, 1, 1], [], []>} : vector<8x128xbf16>, vector<128x128xbf16>, vector<8x128xf32> -> vector<8x128xf32>
    %80 = arith.addf %76, %79 : vector<8x128xf32>
    %c0_60 = arith.constant 0 : index
    %c0_61 = arith.constant 0 : index
    %81 = vector.load %arg25[%c0_60, %c0_61] : memref<1x128xf32, #tpu.memory_space<vmem>>, vector<1x128xf32>
    %82 = vector.broadcast %81 : vector<1x128xf32> to vector<8x128xf32>
    %83 = arith.addf %80, %82 : vector<8x128xf32>
    %cst_62 = arith.constant 0.000000e+00 : f32
    %84 = vector.broadcast %cst_62 : f32 to vector<8x128xf32>
    %85 = arith.maximumf %83, %84 : vector<8x128xf32>
    %c0_63 = arith.constant 0 : index
    %c0_64 = arith.constant 0 : index
    %86 = vector.load %arg26[%c0_63, %c0_64] : memref<1x128xf32, #tpu.memory_space<vmem>>, vector<1x128xf32>
    %87 = vector.broadcast %86 : vector<1x128xf32> to vector<8x128xf32>
    %88 = arith.mulf %85, %87 : vector<8x128xf32>
    %c0_65 = arith.constant 0 : index
    %c0_66 = arith.constant 0 : index
    %89 = vector.load %arg27[%c0_65, %c0_66] : memref<1x128xf32, #tpu.memory_space<vmem>>, vector<1x128xf32>
    %90 = vector.broadcast %89 : vector<1x128xf32> to vector<8x128xf32>
    %91 = arith.addf %88, %90 : vector<8x128xf32>
    %92 = arith.truncf %91 : vector<8x128xf32> to vector<8x128xbf16>
    %c0_67 = arith.constant 0 : index
    %c0_68 = arith.constant 0 : index
    %93 = vector.load %arg28[%c0_67, %c0_68] : memref<128x128xbf16, #tpu.memory_space<vmem>>, vector<128x128xbf16>
    %cst_69 = arith.constant dense<0.000000e+00> : vector<8x128xf32>
    %94 = tpu.matmul %92, %93, %cst_69 {dimension_numbers = #tpu.dot_dimension_numbers<[1], [0], [0], [1], [0, 0, 1, 1], [], []>} : vector<8x128xbf16>, vector<128x128xbf16>, vector<8x128xf32> -> vector<8x128xf32>
    %c0_70 = arith.constant 0 : index
    %c0_71 = arith.constant 0 : index
    %95 = vector.load %arg29[%c0_70, %c0_71] : memref<1x128xf32, #tpu.memory_space<vmem>>, vector<1x128xf32>
    %96 = vector.broadcast %95 : vector<1x128xf32> to vector<8x128xf32>
    %97 = arith.addf %94, %96 : vector<8x128xf32>
    %c0_72 = arith.constant 0 : index
    %c0_73 = arith.constant 0 : index
    %98 = vector.load %arg30[%c0_72, %c0_73] : memref<8x128xf32, #tpu.memory_space<vmem>>, vector<8x128xf32>
    tpu.vector_store %arg30[%c0_72, %c0_73], %97 {strides = array<i32>} : memref<8x128xf32, #tpu.memory_space<vmem>>, vector<8x128xf32>,
    return
  }
  func.func @transform_0(%arg0: i32) -> (i32, i32) {
    %c0_i32 = arith.constant 0 : i32
    %c0_i32_0 = arith.constant 0 : i32
    return %arg0, %c0_i32 : i32, i32
  }
  func.func @transform_1(%arg0: i32) -> (i32, i32) {
    %c0_i32 = arith.constant 0 : i32
    %c0_i32_0 = arith.constant 0 : i32
    return %arg0, %c0_i32 : i32, i32
  }
  func.func @transform_2(%arg0: i32) -> (i32, i32) {
    %c0_i32 = arith.constant 0 : i32
    %c0_i32_0 = arith.constant 0 : i32
    %c0_i32_1 = arith.constant 0 : i32
    return %c0_i32, %c0_i32_0 : i32, i32
  }
  func.func @transform_3(%arg0: i32) -> (i32, i32) {
    %c0_i32 = arith.constant 0 : i32
    %c0_i32_0 = arith.constant 0 : i32
    %c0_i32_1 = arith.constant 0 : i32
    return %c0_i32, %c0_i32_0 : i32, i32
  }
  func.func @transform_4(%arg0: i32) -> (i32, i32) {
    %c0_i32 = arith.constant 0 : i32
    %c0_i32_0 = arith.constant 0 : i32
    %c0_i32_1 = arith.constant 0 : i32
    return %c0_i32, %c0_i32_0 : i32, i32
  }
  func.func @transform_5(%arg0: i32) -> (i32, i32) {
    %c0_i32 = arith.constant 0 : i32
    %c0_i32_0 = arith.constant 0 : i32
    %c0_i32_1 = arith.constant 0 : i32
    return %c0_i32, %c0_i32_0 : i32, i32
  }
  func.func @transform_6(%arg0: i32) -> (i32, i32) {
    %c0_i32 = arith.constant 0 : i32
    %c0_i32_0 = arith.constant 0 : i32
    %c0_i32_1 = arith.constant 0 : i32
    return %c0_i32, %c0_i32_0 : i32, i32
  }
  func.func @transform_7(%arg0: i32) -> (i32, i32) {
    %c0_i32 = arith.constant 0 : i32
    %c0_i32_0 = arith.constant 0 : i32
    %c0_i32_1 = arith.constant 0 : i32
    return %c0_i32, %c0_i32_0 : i32, i32
  }
  func.func @transform_8(%arg0: i32) -> (i32, i32) {
    %c0_i32 = arith.constant 0 : i32
    %c0_i32_0 = arith.constant 0 : i32
    %c0_i32_1 = arith.constant 0 : i32
    return %c0_i32, %c0_i32_0 : i32, i32
  }
  func.func @transform_9(%arg0: i32) -> (i32, i32) {
    %c0_i32 = arith.constant 0 : i32
    %c0_i32_0 = arith.constant 0 : i32
    %c0_i32_1 = arith.constant 0 : i32
    return %c0_i32, %c0_i32_0 : i32, i32
  }
  func.func @transform_10(%arg0: i32) -> (i32, i32) {
    %c0_i32 = arith.constant 0 : i32
    %c0_i32_0 = arith.constant 0 : i32
    %c0_i32_1 = arith.constant 0 : i32
    return %c0_i32, %c0_i32_0 : i32, i32
  }
  func.func @transform_11(%arg0: i32) -> (i32, i32) {
    %c0_i32 = arith.constant 0 : i32
    %c0_i32_0 = arith.constant 0 : i32
    %c0_i32_1 = arith.constant 0 : i32
    return %c0_i32, %c0_i32_0 : i32, i32
  }
  func.func @transform_12(%arg0: i32) -> (i32, i32) {
    %c0_i32 = arith.constant 0 : i32
    %c0_i32_0 = arith.constant 0 : i32
    %c0_i32_1 = arith.constant 0 : i32
    return %c0_i32, %c0_i32_0 : i32, i32
  }
  func.func @transform_13(%arg0: i32) -> (i32, i32) {
    %c0_i32 = arith.constant 0 : i32
    %c0_i32_0 = arith.constant 0 : i32
    %c0_i32_1 = arith.constant 0 : i32
    return %c0_i32, %c0_i32_0 : i32, i32
  }
  func.func @transform_14(%arg0: i32) -> (i32, i32) {
    %c0_i32 = arith.constant 0 : i32
    %c0_i32_0 = arith.constant 0 : i32
    %c0_i32_1 = arith.constant 0 : i32
    return %c0_i32, %c0_i32_0 : i32, i32
  }
  func.func @transform_15(%arg0: i32) -> (i32, i32) {
    %c0_i32 = arith.constant 0 : i32
    %c0_i32_0 = arith.constant 0 : i32
    %c0_i32_1 = arith.constant 0 : i32
    return %c0_i32, %c0_i32_0 : i32, i32
  }
  func.func @transform_16(%arg0: i32) -> (i32, i32) {
    %c0_i32 = arith.constant 0 : i32
    %c0_i32_0 = arith.constant 0 : i32
    %c0_i32_1 = arith.constant 0 : i32
    return %c0_i32, %c0_i32_0 : i32, i32
  }
  func.func @transform_17(%arg0: i32) -> (i32, i32) {
    %c0_i32 = arith.constant 0 : i32
    %c0_i32_0 = arith.constant 0 : i32
    %c0_i32_1 = arith.constant 0 : i32
    return %c0_i32, %c0_i32_0 : i32, i32
  }
  func.func @transform_18(%arg0: i32) -> (i32, i32) {
    %c0_i32 = arith.constant 0 : i32
    %c0_i32_0 = arith.constant 0 : i32
    %c0_i32_1 = arith.constant 0 : i32
    return %c0_i32, %c0_i32_0 : i32, i32
  }
  func.func @transform_19(%arg0: i32) -> (i32, i32) {
    %c0_i32 = arith.constant 0 : i32
    %c0_i32_0 = arith.constant 0 : i32
    %c0_i32_1 = arith.constant 0 : i32
    return %c0_i32, %c0_i32_0 : i32, i32
  }
  func.func @transform_20(%arg0: i32) -> (i32, i32) {
    %c0_i32 = arith.constant 0 : i32
    %c0_i32_0 = arith.constant 0 : i32
    %c0_i32_1 = arith.constant 0 : i32
    return %c0_i32, %c0_i32_0 : i32, i32
  }
  func.func @transform_21(%arg0: i32) -> (i32, i32) {
    %c0_i32 = arith.constant 0 : i32
    %c0_i32_0 = arith.constant 0 : i32
    %c0_i32_1 = arith.constant 0 : i32
    return %c0_i32, %c0_i32_0 : i32, i32
  }
  func.func @transform_22(%arg0: i32) -> (i32, i32) {
    %c0_i32 = arith.constant 0 : i32
    %c0_i32_0 = arith.constant 0 : i32
    %c0_i32_1 = arith.constant 0 : i32
    return %c0_i32, %c0_i32_0 : i32, i32
  }
  func.func @transform_23(%arg0: i32) -> (i32, i32) {
    %c0_i32 = arith.constant 0 : i32
    %c0_i32_0 = arith.constant 0 : i32
    %c0_i32_1 = arith.constant 0 : i32
    return %c0_i32, %c0_i32_0 : i32, i32
  }
  func.func @transform_24(%arg0: i32) -> (i32, i32) {
    %c0_i32 = arith.constant 0 : i32
    %c0_i32_0 = arith.constant 0 : i32
    %c0_i32_1 = arith.constant 0 : i32
    return %c0_i32, %c0_i32_0 : i32, i32
  }
  func.func @transform_25(%arg0: i32) -> (i32, i32) {
    %c0_i32 = arith.constant 0 : i32
    %c0_i32_0 = arith.constant 0 : i32
    %c0_i32_1 = arith.constant 0 : i32
    return %c0_i32, %c0_i32_0 : i32, i32
  }
  func.func @transform_26(%arg0: i32) -> (i32, i32) {
    %c0_i32 = arith.constant 0 : i32
    %c0_i32_0 = arith.constant 0 : i32
    %c0_i32_1 = arith.constant 0 : i32
    return %c0_i32, %c0_i32_0 : i32, i32
  }
  func.func @transform_27(%arg0: i32) -> (i32, i32) {
    %c0_i32 = arith.constant 0 : i32
    %c0_i32_0 = arith.constant 0 : i32
    %c0_i32_1 = arith.constant 0 : i32
    return %c0_i32, %c0_i32_0 : i32, i32
  }
  func.func @transform_28(%arg0: i32) -> (i32, i32) {
    %c0_i32 = arith.constant 0 : i32
    %c0_i32_0 = arith.constant 0 : i32
    %c0_i32_1 = arith.constant 0 : i32
    return %c0_i32, %c0_i32_0 : i32, i32
  }
  func.func @transform_29(%arg0: i32) -> (i32, i32) {
    %c0_i32 = arith.constant 0 : i32
    %c0_i32_0 = arith.constant 0 : i32
    return %arg0, %c0_i32 : i32, i32
  }
}

</mosaic_0001>

<bundles_post_ra>
// kernel: tpu_custom_call.1
= control target key start
LH: loop header
LB: loop body
LE: loop exit
PB: predicated region body
PF: predicated region fallthrough
CT: control target
= control target key end

     0   :  { %s5840_s6 = smov 1   ;;  %s5841_s10 = smov 2   ;;  %s6337_s0 = inlined_call_operand.smem [shape: u32[30], index: -1, kind: input, shape index: {}] }
   0x1   :  { %s5908_s5 = sld [smem:[%s6337_s0]]   ;;  %s5842_s14 = smov 3  }
   0x2   :  { %s5913_s9 = sld [smem:[%s6337_s0 + %s5840_s6]]   ;;  %s5843_s18 = smov 4  }
   0x3   :  { %s5918_s13 = sld [smem:[%s6337_s0 + %s5841_s10]]   ;;  %s5844_s22 = smov 5  }
   0x4   :  { %s5923_s17 = sld [smem:[%s6337_s0 + %s5842_s14]]   ;;  %s5845_s26 = smov 6  }
   0x5   :  { %s5928_s21 = sld [smem:[%s6337_s0 + %s5843_s18]]   ;;  %s5846_s30 = smov 7  }
   0x6   :  { %s5933_s25 = sld [smem:[%s6337_s0 + %s5844_s22]]   ;;  %s5847_s4 = smov 8  }
   0x7   :  { %s5938_s29 = sld [smem:[%s6337_s0 + %s5845_s26]]   ;;  %s5848_s10 = smov 9  }
   0x8   :  { %s5943_s3 = sld [smem:[%s6337_s0 + %s5846_s30]]   ;;  %s5849_s15 = smov 10  }
   0x9   :  { %s5948_s8 = sld [smem:[%s6337_s0 + %s5847_s4]]   ;;  %s5850_s20 = smov 11  }
   0xa   :  { %s5953_s14 = sld [smem:[%s6337_s0 + %s5848_s10]]   ;;  %s5851_s26 = smov 12  }
   0xb   :  { %s5958_s19 = sld [smem:[%s6337_s0 + %s5849_s15]]   ;;  %s5852_s1 = smov 13  }
   0xc   :  { %s5963_s24 = sld [smem:[%s6337_s0 + %s5850_s20]]   ;;  %s5853_s7 = smov 14  }
   0xd   :  { %s5968_s30 = sld [smem:[%s6337_s0 + %s5851_s26]]   ;;  %s5854_s15 = smov 15  }
   0xe   :  { %6344 = sst [smem:[#allocation47_spill]] %s5943_s3  ;;  %s5855_s22 = smov 16  }
   0xf   :  { %s5973_s6 = sld [smem:[%s6337_s0 + %s5852_s1]]   ;;  %s5856_s28 = smov 17  }
  0x10   :  { %s5978_s12 = sld [smem:[%s6337_s0 + %s5853_s7]]   ;;  %s5857_s7 = smov 18  }
  0x11   :  { %s5983_s20 = sld [smem:[%s6337_s0 + %s5854_s15]]   ;;  %s5858_s15 = smov 19  }
  0x12   :  { %6345 = sst [smem:[#allocation48_spill]] %s5963_s24 }
  0x13   :  { %6346 = sst [smem:[#allocation49_spill]] %s5968_s30 }
  0x14   :  { %s5988_s27 = sld [smem:[%s6337_s0 + %s5855_s22]]   ;;  %s5859_s22 = smov 20  }
  0x15   :  { %6347 = sst [smem:[#allocation50_spill]] %s5973_s6 }
  0x16   :  { %6348 = sst [smem:[#allocation51_spill]] %s5978_s12 }
  0x17   :  { %s5993_s4 = sld [smem:[%s6337_s0 + %s5856_s28]]   ;;  %s5860_s28 = smov 21  }
  0x18   :  { %s5998_s24 = sld [smem:[%s6337_s0 + %s5857_s7]]   ;;  %s5861_s7 = smov 22  }
  0x19   :  { %s6003_s12 = sld [smem:[%s6337_s0 + %s5858_s15]]   ;;  %s5862_s15 = smov 23  }
  0x1a   :  { %6349 = sst [smem:[#allocation52_spill]] %s5988_s27 }
  0x1b   :  { %s6008_s6 = sld [smem:[%s6337_s0 + %s5859_s22]]   ;;  %s5863_s22 = smov 24  }
  0x1c   :  { %s6013_s3 = sld [smem:[%s6337_s0 + %s5860_s28]]   ;;  %s5864_s28 = smov 25  }
  0x1d   :  { %s6023_s27 = sld [smem:[%s6337_s0 + %s5862_s15]]   ;;  %s5866_s15 = smov 27  }
  0x1e   :  { %6350 = sst [smem:[#allocation53_spill]] %s5998_s24 }
  0x1f   :  { %s6018_s24 = sld [smem:[%s6337_s0 + %s5861_s7]]   ;;  %s5865_s7 = smov 26  }
  0x20   :  { %s6033_s30 = sld [smem:[%s6337_s0 + %s5864_s28]]   ;;  %s5868_s28 = smov 29  }
  0x21   :  { %6351 = sst [smem:[#allocation54_spill]] %s6008_s6 }
  0x22   :  { %s6028_s6 = sld [smem:[%s6337_s0 + %s5863_s22]]   ;;  %s5867_s22 = smov 28  }
  0x23   :  { %6353 = sst [smem:[#allocation56_spill]] %s6023_s27 }
  0x24   :  { %s6043_s27 = sld [smem:[%s6337_s0 + %s5866_s15]]  }
  0x25   :  { %6352 = sst [smem:[#allocation55_spill]] %s6018_s24 }
  0x26   :  { %6355 = sst [smem:[#allocation58_spill]] %s6033_s30 }
  0x27   :  { %s6038_s24 = sld [smem:[%s6337_s0 + %s5865_s7]]  }
  0x28   :  { %6354 = sst [smem:[#allocation57_spill]] %s6028_s6 }
  0x29   :  { %s6048_s6 = sld [smem:[%s6337_s0 + %s5867_s22]]  }
  0x2a   :  { %s6053_s30 = sld [smem:[%s6337_s0 + %s5868_s28]]  }
  0x2b   :  { %64 = vsyncpa [#allocation3], 0 }
  0x2c   :  { %65 = vsyncpa [#allocation6], 0 }
  0x2d   :  { %66 = vsyncpa [#allocation9], 0 }
  0x2e   :  { %67 = vsyncpa [#allocation12], 0 }
  0x2f   :  { %68 = vsyncpa [#allocation15], 0 }
  0x30   :  { %69 = vsyncpa [#allocation18], 0 }
  0x31   :  { %70 = vsyncpa [#allocation21], 0 }
  0x32   :  { %71 = vsyncpa [#allocation24], 0 }
  0x33   :  { %72 = vsyncpa [#allocation27], 0 }
  0x34   :  { %73 = vsyncpa [#allocation30], 0 }
  0x35   :  { %74 = vsyncpa [#allocation33], 0 }
  0x36   :  { %75 = vsyncpa [#allocation4], 0  ;;  %s5869_s7 = smov [#allocation5]   ;;  %s5870_s11 = smov [#allocation8]  }
  0x37   :  { %s92_s10 = sshll.u32 %s5869_s7, 4  ;;  %s114_s0 = sshll.u32 %s5870_s11, 4  ;;  %s93_s10 = int_to_ptr.vmem [resolvable:$true] %s92_s10  ;;  %s115_s0 = int_to_ptr.vmem [resolvable:$true] %s114_s0 }
  0x38   :  { %s5354_s15 = scalar_lea.hbm %s5913_s9, 256 }
  0x39   :  { %p5355_p0 = scmp.ne.s32.totalorder %s5913_s9, %s5354_s15  ;;  %p5358_p1 = scmp.lt.u32.totalorder %s5354_s15, %s5913_s9 }
  0x3b   :  { %p5360_p2 = pnand %p5358_p1, %p5355_p0 }
  0x3d   :  { %5363 = shalt.err (!%p5360_p2)
}
  0x3e   :  { %s5364_s16 = scalar_lea.vmem %s93_s10, 256  ;;  %p5369_p4 = scmp.lt.s32.totalorder %s93_s10, %s93_s10 }
  0x3f   :  { %p5365_p3 = scmp.ne.s32.totalorder %s93_s10, %s5364_s16  ;;  %p5370_p5 = scmp.lt.s32.totalorder %s5364_s16, %s5364_s16 }
  0x41   :  { %p5371_p6 = por %p5370_p5, %p5369_p4 }
  0x43   :  { %p5372_p7 = pnand %p5371_p6, %p5365_p3 }
  0x45   :  { %5375 = shalt.err (!%p5372_p7)
}
  0x46   :  { %95 = dma.hbm_to_vmem [thread:$0]  %s5913_s9, 256, %s93_s10, [#allocation6]  }
  0x47   :  { %s5376_s18 = scalar_lea.hbm %s5923_s17, 64 }
  0x48   :  { %p5377_p8 = scmp.ne.s32.totalorder %s5923_s17, %s5376_s18  ;;  %p5380_p9 = scmp.lt.u32.totalorder %s5376_s18, %s5923_s17 }
  0x4a   :  { %p5382_p10 = pnand %p5380_p9, %p5377_p8 }
  0x4c   :  { %5385 = shalt.err (!%p5382_p10)
}
  0x4d   :  { %s5386_s22 = scalar_lea.vmem %s115_s0, 64  ;;  %p5391_p12 = scmp.lt.s32.totalorder %s115_s0, %s115_s0 }
  0x4e   :  { %p5387_p11 = scmp.ne.s32.totalorder %s115_s0, %s5386_s22  ;;  %p5392_p13 = scmp.lt.s32.totalorder %s5386_s22, %s5386_s22 }
  0x50   :  { %p5393_p0 = por %p5392_p13, %p5391_p12 }
  0x52   :  { %p5394_p1 = pnand %p5393_p0, %p5387_p11 }
  0x54   :  { %5397 = shalt.err (!%p5394_p1)
}
  0x55   :  { %117 = dma.hbm_to_vmem [thread:$0]  %s5923_s17, 64, %s115_s0, [#allocation9]  }
  0x56   :  { %s5871_s23 = smov [#allocation11]   ;;  %s5872_s9 = smov [#allocation14]  }
  0x57   :  { %s134_s26 = sshll.u32 %s5871_s23, 4  ;;  %s158_s28 = sshll.u32 %s5872_s9, 4  ;;  %s135_s26 = int_to_ptr.vmem [resolvable:$true] %s134_s26  ;;  %s159_s28 = int_to_ptr.vmem [resolvable:$true] %s158_s28 }
  0x58   :  { %s5398_s1 = scalar_lea.hbm %s5933_s25, 64 }
  0x59   :  { %p5399_p2 = scmp.ne.s32.totalorder %s5933_s25, %s5398_s1  ;;  %p5402_p3 = scmp.lt.u32.totalorder %s5398_s1, %s5933_s25 }
  0x5b   :  { %p5404_p4 = pnand %p5402_p3, %p5399_p2 }
  0x5d   :  { %5407 = shalt.err (!%p5404_p4)
}
  0x5e   :  { %s5408_s2 = scalar_lea.vmem %s135_s26, 64  ;;  %p5413_p6 = scmp.lt.s32.totalorder %s135_s26, %s135_s26 }
  0x5f   :  { %p5409_p5 = scmp.ne.s32.totalorder %s135_s26, %s5408_s2  ;;  %p5414_p7 = scmp.lt.s32.totalorder %s5408_s2, %s5408_s2 }
  0x61   :  { %p5415_p8 = por %p5414_p7, %p5413_p6 }
  0x63   :  { %p5416_p9 = pnand %p5415_p8, %p5409_p5 }
  0x65   :  { %5419 = shalt.err (!%p5416_p9)
}
  0x66   :  { %137 = dma.hbm_to_vmem [thread:$0]  %s5933_s25, 64, %s135_s26, [#allocation12]  }
  0x67   :  { %s5420_s17 = scalar_lea.hbm %s5948_s8, 32 }
  0x68   :  { %p5421_p10 = scmp.ne.s32.totalorder %s5948_s8, %s5420_s17  ;;  %p5424_p11 = scmp.lt.u32.totalorder %s5420_s17, %s5948_s8 }
  0x6a   :  { %p5426_p12 = pnand %p5424_p11, %p5421_p10 }
  0x6c   :  { %5429 = shalt.err (!%p5426_p12)
}
  0x6d   :  { %s5430_s7 = scalar_lea.vmem %s159_s28, 32  ;;  %p5435_p0 = scmp.lt.s32.totalorder %s159_s28, %s159_s28 }
  0x6e   :  { %p5431_p13 = scmp.ne.s32.totalorder %s159_s28, %s5430_s7  ;;  %p5436_p1 = scmp.lt.s32.totalorder %s5430_s7, %s5430_s7 }
  0x70   :  { %p5437_p2 = por %p5436_p1, %p5435_p0 }
  0x72   :  { %p5438_p3 = pnand %p5437_p2, %p5431_p13 }
  0x74   :  { %5441 = shalt.err (!%p5438_p3)
}
  0x75   :  { %161 = dma.hbm_to_vmem [thread:$0]  %s5948_s8, 32, %s159_s28, [#allocation15]  }
  0x76   :  { %s5873_s10 = smov [#allocation17]   ;;  %s5442_s25 = scalar_lea.hbm %s5958_s19, 2048 }
  0x77   :  { %s177_s11 = sshll.u32 %s5873_s10, 4  ;;  %p5443_p4 = scmp.ne.s32.totalorder %s5958_s19, %s5442_s25  ;;  %s178_s11 = int_to_ptr.vmem [resolvable:$true] %s177_s11 }
  0x78   :  { %p5446_p5 = scmp.lt.u32.totalorder %s5442_s25, %s5958_s19 }
  0x7a   :  { %p5448_p6 = pnand %p5446_p5, %p5443_p4 }
  0x7c   :  { %5451 = shalt.err (!%p5448_p6)
}
  0x7d   :  { %s5452_s0 = scalar_lea.vmem %s178_s11, 2048  ;;  %p5457_p8 = scmp.lt.s32.totalorder %s178_s11, %s178_s11 }
  0x7e   :  { %p5453_p7 = scmp.ne.s32.totalorder %s178_s11, %s5452_s0  ;;  %p5458_p9 = scmp.lt.s32.totalorder %s5452_s0, %s5452_s0 }
  0x80   :  { %p5459_p10 = por %p5458_p9, %p5457_p8 }
  0x82   :  { %p5460_p11 = pnand %p5459_p10, %p5453_p7 }
  0x84   :  { %5463 = shalt.err (!%p5460_p11)
}
  0x85   :  { %s5874_s15 = smov 64   ;;  %s5875_s8 = smov 4  }
  0x86   :  { %183 = dma.hbm_to_vmem [thread:$0]  %s5958_s19, 2048, %s178_s11, [#allocation18], %s5874_s15, %s5874_s15, %s5875_s8  }
  0x87   :  { %s5876_s16 = smov [#allocation20]   ;;  %s5877_s22 = smov [#allocation23]  }
  0x88   :  { %s208_s18 = sshll.u32 %s5876_s16, 4  ;;  %s230_s23 = sshll.u32 %s5877_s22, 4  ;;  %s209_s18 = int_to_ptr.vmem [resolvable:$true] %s208_s18  ;;  %s231_s23 = int_to_ptr.vmem [resolvable:$true] %s230_s23 }
  0x89   :  { %s5464_s26 = scalar_lea.hbm %s5983_s20, 128 }
  0x8a   :  { %p5465_p12 = scmp.ne.s32.totalorder %s5983_s20, %s5464_s26  ;;  %p5468_p13 = scmp.lt.u32.totalorder %s5464_s26, %s5983_s20 }
  0x8c   :  { %p5470_p0 = pnand %p5468_p13, %p5465_p12 }
  0x8e   :  { %5473 = shalt.err (!%p5470_p0)
}
  0x8f   :  { %s5474_s9 = scalar_lea.vmem %s209_s18, 128  ;;  %p5479_p2 = scmp.lt.s32.totalorder %s209_s18, %s209_s18 }
  0x90   :  { %p5475_p1 = scmp.ne.s32.totalorder %s209_s18, %s5474_s9  ;;  %p5480_p3 = scmp.lt.s32.totalorder %s5474_s9, %s5474_s9 }
  0x92   :  { %p5481_p4 = por %p5480_p3, %p5479_p2 }
  0x94   :  { %p5482_p5 = pnand %p5481_p4, %p5475_p1 }
  0x96   :  { %5485 = shalt.err (!%p5482_p5)
}
  0x97   :  { %211 = dma.hbm_to_vmem [thread:$0]  %s5983_s20, 128, %s209_s18, [#allocation21]  }
  0x98   :  { %s5486_s19 = scalar_lea.hbm %s5993_s4, 32 }
  0x99   :  { %p5487_p6 = scmp.ne.s32.totalorder %s5993_s4, %s5486_s19  ;;  %p5490_p7 = scmp.lt.u32.totalorder %s5486_s19, %s5993_s4 }
  0x9b   :  { %p5492_p8 = pnand %p5490_p7, %p5487_p6 }
  0x9d   :  { %5495 = shalt.err (!%p5492_p8)
}
  0x9e   :  { %s5496_s28 = scalar_lea.vmem %s231_s23, 32  ;;  %p5501_p10 = scmp.lt.s32.totalorder %s231_s23, %s231_s23 }
  0x9f   :  { %p5497_p9 = scmp.ne.s32.totalorder %s231_s23, %s5496_s28  ;;  %p5502_p11 = scmp.lt.s32.totalorder %s5496_s28, %s5496_s28 }
  0xa1   :  { %p5503_p12 = por %p5502_p11, %p5501_p10 }
  0xa3   :  { %p5504_p13 = pnand %p5503_p12, %p5497_p9 }
  0xa5   :  { %5507 = shalt.err (!%p5504_p13)
}
  0xa6   :  { %233 = dma.hbm_to_vmem [thread:$0]  %s5993_s4, 32, %s231_s23, [#allocation24]  }
  0xa7   :  { %s5878_s1 = smov [#allocation26]   ;;  %s5879_s2 = smov [#allocation29]  }
  0xa8   :  { %s250_s20 = sshll.u32 %s5878_s1, 4  ;;  %s272_s17 = sshll.u32 %s5879_s2, 4  ;;  %s251_s20 = int_to_ptr.vmem [resolvable:$true] %s250_s20  ;;  %s273_s17 = int_to_ptr.vmem [resolvable:$true] %s272_s17 }
  0xa9   :  { %s5508_s7 = scalar_lea.hbm %s6003_s12, 32 }
  0xaa   :  { %p5509_p0 = scmp.ne.s32.totalorder %s6003_s12, %s5508_s7  ;;  %p5512_p1 = scmp.lt.u32.totalorder %s5508_s7, %s6003_s12 }
  0xac   :  { %p5514_p2 = pnand %p5512_p1, %p5509_p0 }
  0xae   :  { %5517 = shalt.err (!%p5514_p2)
}
  0xaf   :  { %s5518_s10 = scalar_lea.vmem %s251_s20, 32  ;;  %p5523_p4 = scmp.lt.s32.totalorder %s251_s20, %s251_s20 }
  0xb0   :  { %p5519_p3 = scmp.ne.s32.totalorder %s251_s20, %s5518_s10  ;;  %p5524_p5 = scmp.lt.s32.totalorder %s5518_s10, %s5518_s10 }
  0xb2   :  { %p5525_p6 = por %p5524_p5, %p5523_p4 }
  0xb4   :  { %p5526_p7 = pnand %p5525_p6, %p5519_p3 }
  0xb6   :  { %5529 = shalt.err (!%p5526_p7)
}
  0xb7   :  { %253 = dma.hbm_to_vmem [thread:$0]  %s6003_s12, 32, %s251_s20, [#allocation27]  }
  0xb8   :  { %s5530_s4 = scalar_lea.hbm %s6013_s3, 16 }
  0xb9   :  { %p5531_p8 = scmp.ne.s32.totalorder %s6013_s3, %s5530_s4  ;;  %p5534_p9 = scmp.lt.u32.totalorder %s5530_s4, %s6013_s3 }
  0xbb   :  { %p5536_p10 = pnand %p5534_p9, %p5531_p8 }
  0xbd   :  { %5539 = shalt.err (!%p5536_p10)
}
  0xbe   :  { %s5540_s11 = scalar_lea.vmem %s273_s17, 16  ;;  %s5544_s25 = scalar_lea.vmem %s273_s17, 32 }
  0xbf   :  { %p5541_p11 = scmp.ne.s32.totalorder %s273_s17, %s5540_s11  ;;  %p5545_p12 = scmp.lt.s32.totalorder %s273_s17, %s273_s17 }
  0xc0   :  { %p5546_p13 = scmp.lt.s32.totalorder %s5544_s25, %s5540_s11 }
  0xc2   :  { %p5547_p0 = por %p5546_p13, %p5545_p12 }
  0xc4   :  { %p5548_p1 = pnand %p5547_p0, %p5541_p11 }
  0xc6   :  { %5551 = shalt.err (!%p5548_p1)
}
  0xc7   :  { %275 = dma.hbm_to_vmem [thread:$0]  %s6013_s3, 16, %s273_s17, [#allocation30]  }
  0xc8   :  { %s5880_s12 = smov [#allocation2]   ;;  %s5881_s16 = smov [#allocation7]  }
  0xc9   :  { %s82_s0 = sshll.u32 %s5880_s12, 4  ;;  %s101_s18 = sshll.u32 %s5881_s16, 4  ;;  %s83_s0 = int_to_ptr.vmem [resolvable:$true] %s82_s0  ;;  %s102_s18 = int_to_ptr.vmem [resolvable:$true] %s101_s18 }
  0xca   :  { %s5552_s22 = scalar_lea.hbm %s5908_s5, 256 }
  0xcb   :  { %p5553_p2 = scmp.ne.s32.totalorder %s5908_s5, %s5552_s22  ;;  %p5556_p3 = scmp.lt.u32.totalorder %s5552_s22, %s5908_s5 }
  0xcd   :  { %p5558_p4 = pnand %p5556_p3, %p5553_p2 }
  0xcf   :  { %5561 = shalt.err (!%p5558_p4)
}
  0xd0   :  { %s5562_s23 = scalar_lea.vmem %s83_s0, 256  ;;  %p5567_p6 = scmp.lt.s32.totalorder %s83_s0, %s83_s0 }
  0xd1   :  { %p5563_p5 = scmp.ne.s32.totalorder %s83_s0, %s5562_s23  ;;  %p5568_p7 = scmp.lt.s32.totalorder %s5562_s23, %s5562_s23 }
  0xd3   :  { %p5569_p8 = por %p5568_p7, %p5567_p6 }
  0xd5   :  { %p5570_p9 = pnand %p5569_p8, %p5563_p5 }
  0xd7   :  { %5573 = shalt.err (!%p5570_p9)
}
  0xd8   :  { %85 = dma.hbm_to_vmem [thread:$0]  %s5908_s5, 256, %s83_s0, [#allocation3]  }
  0xd9   :  { %s5574_s3 = scalar_lea.hbm %s5918_s13, 8192 }
  0xda   :  { %p5575_p10 = scmp.ne.s32.totalorder %s5918_s13, %s5574_s3  ;;  %p5578_p11 = scmp.lt.u32.totalorder %s5574_s3, %s5918_s13 }
  0xdc   :  { %p5580_p12 = pnand %p5578_p11, %p5575_p10 }
  0xde   :  { %5583 = shalt.err (!%p5580_p12)
}
  0xdf   :  { %s5584_s26 = scalar_lea.vmem %s102_s18, 8192  ;;  %p5589_p0 = scmp.lt.s32.totalorder %s102_s18, %s102_s18 }
  0xe0   :  { %p5585_p13 = scmp.ne.s32.totalorder %s102_s18, %s5584_s26  ;;  %p5590_p1 = scmp.lt.s32.totalorder %s5584_s26, %s5584_s26 }
  0xe2   :  { %p5591_p2 = por %p5590_p1, %p5589_p0 }
  0xe4   :  { %p5592_p3 = pnand %p5591_p2, %p5585_p13 }
  0xe6   :  { %5595 = shalt.err (!%p5592_p3)
}
  0xe7   :  { %s5882_s9 = smov 256   ;;  %s5883_s19 = smov 16  }
  0xe8   :  { %107 = dma.hbm_to_vmem [thread:$0]  %s5918_s13, 8192, %s102_s18, [#allocation6], %s5882_s9, %s5882_s9, %s5883_s19  }
  0xe9   :  { %s5884_s5 = smov [#allocation10]   ;;  %s5885_s1 = smov [#allocation13]  }
  0xea   :  { %s124_s28 = sshll.u32 %s5884_s5, 4  ;;  %s143_s20 = sshll.u32 %s5885_s1, 4  ;;  %s125_s28 = int_to_ptr.vmem [resolvable:$true] %s124_s28  ;;  %s144_s20 = int_to_ptr.vmem [resolvable:$true] %s143_s20 }
  0xeb   :  { %s5596_s2 = scalar_lea.hbm %s5928_s21, 64 }
  0xec   :  { %p5597_p4 = scmp.ne.s32.totalorder %s5928_s21, %s5596_s2  ;;  %p5600_p5 = scmp.lt.u32.totalorder %s5596_s2, %s5928_s21 }
  0xee   :  { %p5602_p6 = pnand %p5600_p5, %p5597_p4 }
  0xf0   :  { %5605 = shalt.err (!%p5602_p6)
}
  0xf1   :  { %s5606_s17 = scalar_lea.vmem %s125_s28, 64  ;;  %p5611_p8 = scmp.lt.s32.totalorder %s125_s28, %s125_s28 }
  0xf2   :  { %p5607_p7 = scmp.ne.s32.totalorder %s125_s28, %s5606_s17  ;;  %p5612_p9 = scmp.lt.s32.totalorder %s5606_s17, %s5606_s17 }
  0xf4   :  { %p5613_p10 = por %p5612_p9, %p5611_p8 }
  0xf6   :  { %p5614_p11 = pnand %p5613_p10, %p5607_p7 }
  0xf8   :  { %5617 = shalt.err (!%p5614_p11)
}
  0xf9   :  { %127 = dma.hbm_to_vmem [thread:$0]  %s5928_s21, 64, %s125_s28, [#allocation9]  }
  0xfa   :  { %s5618_s13 = scalar_lea.hbm %s5938_s29, 8192 }
  0xfb   :  { %p5619_p12 = scmp.ne.s32.totalorder %s5938_s29, %s5618_s13  ;;  %p5622_p13 = scmp.lt.u32.totalorder %s5618_s13, %s5938_s29 }
  0xfd   :  { %p5624_p0 = pnand %p5622_p13, %p5619_p12 }
  0xff   :  { %5627 = shalt.err (!%p5624_p0)
}
 0x100   :  { %s5628_s7 = scalar_lea.vmem %s144_s20, 8192  ;;  %p5633_p2 = scmp.lt.s32.totalorder %s144_s20, %s144_s20 }
 0x101   :  { %p5629_p1 = scmp.ne.s32.totalorder %s144_s20, %s5628_s7  ;;  %p5634_p3 = scmp.lt.s32.totalorder %s5628_s7, %s5628_s7 }
 0x103   :  { %p5635_p4 = por %p5634_p3, %p5633_p2 }
 0x105   :  { %p5636_p5 = pnand %p5635_p4, %p5629_p1 }
 0x107   :  { %5639 = shalt.err (!%p5636_p5)
}
 0x108   :  { %s5886_s10 = smov 128   ;;  %s5887_s4 = smov 8  }
 0x109   :  { %149 = dma.hbm_to_vmem [thread:$0]  %s5938_s29, 8192, %s144_s20, [#allocation12], %s5886_s10, %s5886_s10, %s5887_s4  }
 0x10a   :  { %s5888_s21 = smov [#allocation16]   ;;  %s5889_s25 = smov [#allocation19]  }
 0x10b   :  { %s168_s11 = sshll.u32 %s5888_s21, 4  ;;  %s191_s12 = sshll.u32 %s5889_s25, 4  ;;  %s169_s11 = int_to_ptr.vmem [resolvable:$true] %s168_s11  ;;  %s192_s12 = int_to_ptr.vmem [resolvable:$true] %s191_s12 }
 0x10c   :  { %s5640_s0 = scalar_lea.hbm %s5953_s14, 32 }
 0x10d   :  { %p5641_p6 = scmp.ne.s32.totalorder %s5953_s14, %s5640_s0  ;;  %p5644_p7 = scmp.lt.u32.totalorder %s5640_s0, %s5953_s14 }
 0x10f   :  { %p5646_p8 = pnand %p5644_p7, %p5641_p6 }
 0x111   :  { %5649 = shalt.err (!%p5646_p8)
}
 0x112   :  { %s5650_s16 = scalar_lea.vmem %s169_s11, 32  ;;  %p5655_p10 = scmp.lt.s32.totalorder %s169_s11, %s169_s11 }
 0x113   :  { %p5651_p9 = scmp.ne.s32.totalorder %s169_s11, %s5650_s16  ;;  %p5656_p11 = scmp.lt.s32.totalorder %s5650_s16, %s5650_s16 }
 0x115   :  { %p5657_p12 = por %p5656_p11, %p5655_p10 }
 0x117   :  { %p5658_p13 = pnand %p5657_p12, %p5651_p9 }
 0x119   :  { %5661 = shalt.err (!%p5658_p13)
}
 0x11a   :  { %s6356_s18 = sld [smem:[#allocation49_spill]] }
 0x11b   :  { %171 = dma.hbm_to_vmem [thread:$0]  %s5953_s14, 32, %s169_s11, [#allocation15]  }
 0x120   :  { %s5662_s29 = scalar_lea.hbm %s6356_s18, 16384 }
 0x121   :  { %p5663_p0 = scmp.ne.s32.totalorder %s6356_s18, %s5662_s29  ;;  %p5666_p1 = scmp.lt.u32.totalorder %s5662_s29, %s6356_s18 }
 0x123   :  { %p5668_p2 = pnand %p5666_p1, %p5663_p0 }
 0x125   :  { %5671 = shalt.err (!%p5668_p2)
}
 0x126   :  { %s5672_s22 = scalar_lea.vmem %s192_s12, 16384  ;;  %p5677_p4 = scmp.lt.s32.totalorder %s192_s12, %s192_s12 }
 0x127   :  { %p5673_p3 = scmp.ne.s32.totalorder %s192_s12, %s5672_s22  ;;  %p5678_p5 = scmp.lt.s32.totalorder %s5672_s22, %s5672_s22 }
 0x129   :  { %p5679_p6 = por %p5678_p5, %p5677_p4 }
 0x12b   :  { %p5680_p7 = pnand %p5679_p6, %p5673_p3 }
 0x12d   :  { %5683 = shalt.err (!%p5680_p7)
}
 0x12e   :  { %s5890_s23 = smov 512   ;;  %s6357_s3 = sld [smem:[#allocation52_spill]] }
 0x12f   :  { %s5891_s26 = smov 32   ;;  %s5892_s14 = smov [#allocation22]  }
 0x130   :  { %197 = dma.hbm_to_vmem [thread:$0]  %s6356_s18, 16384, %s192_s12, [#allocation18], %s5890_s23, %s5890_s23, %s5891_s26  }
 0x131   :  { %s217_s9 = sshll.u32 %s5892_s14, 4  ;;  %s5893_s19 = smov [#allocation25]   ;;  %s218_s9 = int_to_ptr.vmem [resolvable:$true] %s217_s9 }
 0x132   :  { %s240_s5 = sshll.u32 %s5893_s19, 4  ;;  %s241_s5 = int_to_ptr.vmem [resolvable:$true] %s240_s5 }
 0x134   :  { %s5684_s28 = scalar_lea.hbm %s6357_s3, 16384 }
 0x135   :  { %p5685_p8 = scmp.ne.s32.totalorder %s6357_s3, %s5684_s28  ;;  %p5688_p9 = scmp.lt.u32.totalorder %s5684_s28, %s6357_s3 }
 0x137   :  { %p5690_p10 = pnand %p5688_p9, %p5685_p8 }
 0x139   :  { %5693 = shalt.err (!%p5690_p10)
}
 0x13a   :  { %s5694_s1 = scalar_lea.vmem %s218_s9, 16384  ;;  %p5699_p12 = scmp.lt.s32.totalorder %s218_s9, %s218_s9 }
 0x13b   :  { %p5695_p11 = scmp.ne.s32.totalorder %s218_s9, %s5694_s1  ;;  %p5700_p13 = scmp.lt.s32.totalorder %s5694_s1, %s5694_s1 }
 0x13d   :  { %p5701_p0 = por %p5700_p13, %p5699_p12 }
 0x13f   :  { %p5702_p1 = pnand %p5701_p0, %p5695_p11 }
 0x141   :  { %5705 = shalt.err (!%p5702_p1)
}
 0x142   :  { %s6358_s20 = sld [smem:[#allocation53_spill]] }
 0x143   :  { %223 = dma.hbm_to_vmem [thread:$0]  %s6357_s3, 16384, %s218_s9, [#allocation21], %s5886_s10, %s5886_s10, %s5887_s4  }
 0x148   :  { %s5706_s2 = scalar_lea.hbm %s6358_s20, 32 }
 0x149   :  { %p5707_p2 = scmp.ne.s32.totalorder %s6358_s20, %s5706_s2  ;;  %p5710_p3 = scmp.lt.u32.totalorder %s5706_s2, %s6358_s20 }
 0x14b   :  { %p5712_p4 = pnand %p5710_p3, %p5707_p2 }
 0x14d   :  { %5715 = shalt.err (!%p5712_p4)
}
 0x14e   :  { %s5716_s17 = scalar_lea.vmem %s241_s5, 32  ;;  %p5721_p6 = scmp.lt.s32.totalorder %s241_s5, %s241_s5 }
 0x14f   :  { %p5717_p5 = scmp.ne.s32.totalorder %s241_s5, %s5716_s17  ;;  %p5722_p7 = scmp.lt.s32.totalorder %s5716_s17, %s5716_s17 }
 0x151   :  { %p5723_p8 = por %p5722_p7, %p5721_p6 }
 0x153   :  { %p5724_p9 = pnand %p5723_p8, %p5717_p5 }
 0x155   :  { %5727 = shalt.err (!%p5724_p9)
}
 0x156   :  { %s6359_s13 = sld [smem:[#allocation54_spill]]  ;;  %s5894_s7 = smov [#allocation28]  }
 0x157   :  { %243 = dma.hbm_to_vmem [thread:$0]  %s6358_s20, 32, %s241_s5, [#allocation24]  }
 0x158   :  { %s259_s10 = sshll.u32 %s5894_s7, 4  ;;  %s5895_s4 = smov [#allocation31]   ;;  %s260_s10 = int_to_ptr.vmem [resolvable:$true] %s259_s10 }
 0x159   :  { %s283_s21 = sshll.u32 %s5895_s4, 4  ;;  %s284_s21 = int_to_ptr.vmem [resolvable:$true] %s283_s21 }
 0x15c   :  { %s5728_s11 = scalar_lea.hbm %s6359_s13, 2048 }
 0x15d   :  { %p5729_p10 = scmp.ne.s32.totalorder %s6359_s13, %s5728_s11  ;;  %p5732_p11 = scmp.lt.u32.totalorder %s5728_s11, %s6359_s13 }
 0x15f   :  { %p5734_p12 = pnand %p5732_p11, %p5729_p10 }
 0x161   :  { %5737 = shalt.err (!%p5734_p12)
}
 0x162   :  { %s5738_s25 = scalar_lea.vmem %s260_s10, 2048  ;;  %p5743_p0 = scmp.lt.s32.totalorder %s260_s10, %s260_s10 }
 0x163   :  { %p5739_p13 = scmp.ne.s32.totalorder %s260_s10, %s5738_s25  ;;  %p5744_p1 = scmp.lt.s32.totalorder %s5738_s25, %s5738_s25 }
 0x165   :  { %p5745_p2 = por %p5744_p1, %p5743_p0 }
 0x167   :  { %p5746_p3 = pnand %p5745_p2, %p5739_p13 }
 0x169   :  { %5749 = shalt.err (!%p5746_p3)
}
 0x16a   :  { %s6360_s12 = sld [smem:[#allocation56_spill]] }
 0x16b   :  { %265 = dma.hbm_to_vmem [thread:$0]  %s6359_s13, 2048, %s260_s10, [#allocation27], %s5874_s15, %s5874_s15, %s5875_s8  }
 0x170   :  { %s5750_s0 = scalar_lea.hbm %s6360_s12, 1024 }
 0x171   :  { %p5751_p4 = scmp.ne.s32.totalorder %s6360_s12, %s5750_s0  ;;  %p5754_p5 = scmp.lt.u32.totalorder %s5750_s0, %s6360_s12 }
 0x173   :  { %p5756_p6 = pnand %p5754_p5, %p5751_p4 }
 0x175   :  { %5759 = shalt.err (!%p5756_p6)
}
 0x176   :  { %s5760_s16 = scalar_lea.vmem %s284_s21, 1024  ;;  %p5765_p8 = scmp.lt.s32.totalorder %s284_s21, %s284_s21 }
 0x177   :  { %p5761_p7 = scmp.ne.s32.totalorder %s284_s21, %s5760_s16  ;;  %p5766_p9 = scmp.lt.s32.totalorder %s5760_s16, %s5760_s16 }
 0x179   :  { %p5767_p10 = por %p5766_p9, %p5765_p8 }
 0x17b   :  { %p5768_p11 = pnand %p5767_p10, %p5761_p7 }
 0x17d   :  { %5771 = shalt.err (!%p5768_p11)
}
 0x17e   :  { %289 = dma.hbm_to_vmem [thread:$0]  %s6360_s12, 1024, %s284_s21, [#allocation30], %s5874_s15, %s5874_s15, %s5875_s8  }
 0x17f   :  { %s5896_s18 = smov [#allocation32]   ;;  %s5772_s22 = scalar_lea.hbm %s6043_s27, 1024 }
 0x180   :  { %s301_s29 = sshll.u32 %s5896_s18, 4  ;;  %p5773_p12 = scmp.ne.s32.totalorder %s6043_s27, %s5772_s22  ;;  %s302_s29 = int_to_ptr.vmem [resolvable:$true] %s301_s29 }
 0x181   :  { %p5776_p13 = scmp.lt.u32.totalorder %s5772_s22, %s6043_s27 }
 0x183   :  { %p5778_p0 = pnand %p5776_p13, %p5773_p12 }
 0x185   :  { %5781 = shalt.err (!%p5778_p0)
}
 0x186   :  { %s5782_s23 = scalar_lea.vmem %s302_s29, 1024  ;;  %p5787_p2 = scmp.lt.s32.totalorder %s302_s29, %s302_s29 }
 0x187   :  { %p5783_p1 = scmp.ne.s32.totalorder %s302_s29, %s5782_s23  ;;  %p5788_p3 = scmp.lt.s32.totalorder %s5782_s23, %s5782_s23 }
 0x189   :  { %p5789_p4 = por %p5788_p3, %p5787_p2 }
 0x18b   :  { %p5790_p5 = pnand %p5789_p4, %p5783_p1 }
 0x18d   :  { %5793 = shalt.err (!%p5790_p5)
}
 0x18e   :  { %307 = dma.hbm_to_vmem [thread:$0]  %s6043_s27, 1024, %s302_s29, [#allocation33], %s5874_s15, %s5874_s15, %s5875_s8  }
 0x18f   :  { %5816 = dma.done.wait [#allocation3], 256  }
 0x190   :  { %5817 = vsyncadd [#allocation3], 4294967040 }
 0x191   :  { %5818 = dma.done.wait [#allocation6], 8448  }
 0x192   :  { %5819 = vsyncadd [#allocation6], 4294958848 }
 0x193   :  { %5820 = dma.done.wait [#allocation9], 128  }
 0x194   :  { %5821 = vsyncadd [#allocation9], 4294967168 }
 0x195   :  { %5822 = dma.done.wait [#allocation12], 8256  }
 0x196   :  { %5823 = vsyncadd [#allocation12], 4294959040 }
 0x197   :  { %5824 = dma.done.wait [#allocation15], 64  }
 0x198   :  { %5825 = vsyncadd [#allocation15], 4294967232 }
 0x199   :  { %5826 = dma.done.wait [#allocation18], 18432  }
 0x19a   :  { %5827 = vsyncadd [#allocation18], 4294948864 }
 0x19b   :  { %5828 = dma.done.wait [#allocation21], 16512  }
 0x19c   :  { %5829 = vsyncadd [#allocation21], 4294950784 }
 0x19d   :  { %5830 = dma.done.wait [#allocation24], 64  }
 0x19e   :  { %5831 = vsyncadd [#allocation24], 4294967232 }
 0x19f   :  { %5832 = dma.done.wait [#allocation27], 2080  }
 0x1a0   :  { %5833 = vsyncadd [#allocation27], 4294965216 }
 0x1a1   :  { %5834 = dma.done.wait [#allocation30], 1040  }
 0x1a2   :  { %5835 = vsyncadd [#allocation30], 4294966256 }
 0x1a3   :  { %5836 = dma.done.wait [#allocation33], 1024  }
 0x1a4   :  { %5837 = vsyncadd [#allocation33], 4294966272  ;;  %v4914_v0 = vld [vmem:[#allocation7 + $0x4] ss:$16 sps:$4 sm:$0xff]   ;;  %v4916_v1 = vld [vmem:[#allocation7] ss:$16 sps:$4 sm:$0xff]  }
 0x1a5   :  { %781 = vmatprep.subr.bf16.mxu1 %v4914_v0  ;;  %v4917_v2 = vld [vmem:[#allocation7 + $0x24] ss:$16 sps:$4 sm:$0xff]   ;;  %v4919_v3 = vld [vmem:[#allocation7 + $0x20] ss:$16 sps:$4 sm:$0xff]   ;;  %v372_v13 = vld [vmem:[#allocation2 + $0x8] sm:$0xff]  ;;  %s6361_s27 = sld [smem:[#allocation47_spill]] }
 0x1a6   :  { %782 = vmatpush1.bf16.msra.mxu1 %v4916_v1  ;;  %v4920_v4 = vld [vmem:[#allocation7 + $0x44] ss:$16 sps:$4 sm:$0xff]   ;;  %v4922_v5 = vld [vmem:[#allocation7 + $0x40] ss:$16 sps:$4 sm:$0xff]   ;;  %v6153_v14 = vpack.c.bf16 %v372_v13, %v372_v13  ;;  %v4964_v45 = vld [vmem:[#allocation7 + $0xc] ss:$16 sps:$4 sm:$0xff]  }
 0x1a7   :  { %783 = vmatprep.subr.bf16.mxu1 %v4917_v2  ;;  %v4923_v6 = vld [vmem:[#allocation7 + $0x64] ss:$16 sps:$4 sm:$0xff]   ;;  %v4925_v7 = vld [vmem:[#allocation7 + $0x60] ss:$16 sps:$4 sm:$0xff]   ;;  %v4962_v47 = vld [vmem:[#allocation7 + $0x8] ss:$16 sps:$4 sm:$0xff]  }
 0x1a8   :  { %v4926_v8 = vld [vmem:[#allocation7 + $0x84] ss:$16 sps:$4 sm:$0xff]   ;;  %v4928_v9 = vld [vmem:[#allocation7 + $0x80] ss:$16 sps:$4 sm:$0xff]   ;;  %813 = vmatprep.mubr.bf16.mxu1 %v6153_v14  ;;  %v4967_v49 = vld [vmem:[#allocation7 + $0x2c] ss:$16 sps:$4 sm:$0xff]  }
 0x1a9   :  { %v4929_v10 = vld [vmem:[#allocation7 + $0xa4] ss:$16 sps:$4 sm:$0xff]   ;;  %v4931_v11 = vld [vmem:[#allocation7 + $0xa0] ss:$16 sps:$4 sm:$0xff]   ;;  %v4965_v52 = vld [vmem:[#allocation7 + $0x28] ss:$16 sps:$4 sm:$0xff]  }
 0x1aa   :  { %784 = vmatpush1.bf16.msra.mxu1 %v4919_v3  ;;  %v4932_v12 = vld [vmem:[#allocation7 + $0xc4] ss:$16 sps:$4 sm:$0xff]   ;;  %v4934_v15 = vld [vmem:[#allocation7 + $0xc0] ss:$16 sps:$4 sm:$0xff]   ;;  %v4970_v53 = vld [vmem:[#allocation7 + $0x4c] ss:$16 sps:$4 sm:$0xff]  }
 0x1ab   :  { %785 = vmatprep.subr.bf16.mxu1 %v4920_v4  ;;  %v4935_v16 = vld [vmem:[#allocation7 + $0xe4] ss:$16 sps:$4 sm:$0xff]   ;;  %v4937_v17 = vld [vmem:[#allocation7 + $0xe0] ss:$16 sps:$4 sm:$0xff]   ;;  %v4968_v56 = vld [vmem:[#allocation7 + $0x48] ss:$16 sps:$4 sm:$0xff]  }
 0x1ac   :  { %v4938_v18 = vld [vmem:[#allocation7 + $0x104] ss:$16 sps:$4 sm:$0xff]   ;;  %v4940_v19 = vld [vmem:[#allocation7 + $0x100] ss:$16 sps:$4 sm:$0xff]   ;;  %v4973_v57 = vld [vmem:[#allocation7 + $0x6c] ss:$16 sps:$4 sm:$0xff]  }
 0x1ad   :  { %v4941_v20 = vld [vmem:[#allocation7 + $0x124] ss:$16 sps:$4 sm:$0xff]   ;;  %v4943_v21 = vld [vmem:[#allocation7 + $0x120] ss:$16 sps:$4 sm:$0xff]   ;;  %v4971_v60 = vld [vmem:[#allocation7 + $0x68] ss:$16 sps:$4 sm:$0xff]  }
 0x1ae   :  { %786 = vmatpush1.bf16.msra.mxu1 %v4922_v5  ;;  %v4944_v22 = vld [vmem:[#allocation7 + $0x144] ss:$16 sps:$4 sm:$0xff]   ;;  %v4946_v23 = vld [vmem:[#allocation7 + $0x140] ss:$16 sps:$4 sm:$0xff]   ;;  %v4976_v61 = vld [vmem:[#allocation7 + $0x8c] ss:$16 sps:$4 sm:$0xff]  }
 0x1af   :  { %787 = vmatprep.subr.bf16.mxu1 %v4923_v6  ;;  %v4947_v24 = vld [vmem:[#allocation7 + $0x164] ss:$16 sps:$4 sm:$0xff]   ;;  %v4949_v25 = vld [vmem:[#allocation7 + $0x160] ss:$16 sps:$4 sm:$0xff]   ;;  %v4974_v0 = vld [vmem:[#allocation7 + $0x88] ss:$16 sps:$4 sm:$0xff]  }
 0x1b0   :  { %v4950_v26 = vld [vmem:[#allocation7 + $0x184] ss:$16 sps:$4 sm:$0xff]   ;;  %v5010_v27 = vld [vmem:[#allocation13 + $0x4] ss:$8 sps:$4 sm:$0xff]   ;;  %v5013_v29 = vld [vmem:[#allocation13 + $0x14] ss:$8 sps:$4 sm:$0xff]  }
 0x1b1   :  { %v5012_v28 = vld [vmem:[#allocation13] ss:$8 sps:$4 sm:$0xff]   ;;  %v4952_v30 = vld [vmem:[#allocation7 + $0x180] ss:$16 sps:$4 sm:$0xff]   ;;  %1319 = vmatprep.subr.bf16.mxu0 %v5010_v27  ;;  %v5015_v31 = vld [vmem:[#allocation13 + $0x10] ss:$8 sps:$4 sm:$0xff]  }
 0x1b2   :  { %788 = vmatpush1.bf16.msra.mxu1 %v4925_v7  ;;  %1320 = vmatpush1.bf16.msra.mxu0 %v5012_v28  ;;  %v4953_v32 = vld [vmem:[#allocation7 + $0x1a4] ss:$16 sps:$4 sm:$0xff]   ;;  %v5016_v33 = vld [vmem:[#allocation13 + $0x24] ss:$8 sps:$4 sm:$0xff]   ;;  %v5019_v37 = vld [vmem:[#allocation13 + $0x34] ss:$8 sps:$4 sm:$0xff]  }
 0x1b3   :  { %789 = vmatprep.subr.bf16.mxu1 %v4926_v8  ;;  %1321 = vmatprep.subr.bf16.mxu0 %v5013_v29  ;;  %v4955_v34 = vld [vmem:[#allocation7 + $0x1a0] ss:$16 sps:$4 sm:$0xff]   ;;  %v5018_v35 = vld [vmem:[#allocation13 + $0x20] ss:$8 sps:$4 sm:$0xff]   ;;  %v5021_v39 = vld [vmem:[#allocation13 + $0x30] ss:$8 sps:$4 sm:$0xff]  }
 0x1b4   :  { %v4956_v36 = vld [vmem:[#allocation7 + $0x1c4] ss:$16 sps:$4 sm:$0xff]   ;;  %v4958_v38 = vld [vmem:[#allocation7 + $0x1c0] ss:$16 sps:$4 sm:$0xff]   ;;  %v4979_v1 = vld [vmem:[#allocation7 + $0xac] ss:$16 sps:$4 sm:$0xff]  }
 0x1b5   :  { %v4959_v40 = vld [vmem:[#allocation7 + $0x1e4] ss:$16 sps:$4 sm:$0xff]   ;;  %v5022_v41 = vld [vmem:[#allocation13 + $0x44] ss:$8 sps:$4 sm:$0xff]   ;;  %v5025_v46 = vld [vmem:[#allocation13 + $0x54] ss:$8 sps:$4 sm:$0xff]  }
 0x1b6   :  { %790 = vmatpush1.bf16.msra.mxu1 %v4928_v9  ;;  %1322 = vmatpush1.bf16.msra.mxu0 %v5015_v31  ;;  %v4961_v42 = vld [vmem:[#allocation7 + $0x1e0] ss:$16 sps:$4 sm:$0xff]   ;;  %v5024_v44 = vld [vmem:[#allocation13 + $0x40] ss:$8 sps:$4 sm:$0xff]   ;;  %v5027_v50 = vld [vmem:[#allocation13 + $0x50] ss:$8 sps:$4 sm:$0xff]  }
 0x1b7   :  { %791 = vmatprep.subr.bf16.mxu1 %v4929_v10  ;;  %1323 = vmatprep.subr.bf16.mxu0 %v5016_v33  ;;  %v371_v43 = vld [vmem:[#allocation2] sm:$0xff]  ;;  %v5028_v51 = vld [vmem:[#allocation13 + $0x64] ss:$8 sps:$4 sm:$0xff]   ;;  %v5030_v54 = vld [vmem:[#allocation13 + $0x60] ss:$8 sps:$4 sm:$0xff]   ;;  %s6362_s15 = sld [smem:[#allocation50_spill]] }
 0x1b8   :  { %v6156_v48 = vpack.c.bf16 %v371_v43, %v371_v43  ;;  %v5031_v55 = vld [vmem:[#allocation13 + $0x74] ss:$8 sps:$4 sm:$0xff]   ;;  %v5033_v58 = vld [vmem:[#allocation13 + $0x70] ss:$8 sps:$4 sm:$0xff]   ;;  %v5034_v59 = vld [vmem:[#allocation13 + $0x84] ss:$8 sps:$4 sm:$0xff]  }
 0x1b9   :  { %v5036_v62 = vld [vmem:[#allocation13 + $0x80] ss:$8 sps:$4 sm:$0xff]   ;;  %v5037_v63 = vld [vmem:[#allocation13 + $0x94] ss:$8 sps:$4 sm:$0xff]   ;;  %v5039_v2 = vld [vmem:[#allocation13 + $0x90] ss:$8 sps:$4 sm:$0xff]  }
 0x1ba   :  { %792 = vmatpush1.bf16.msra.mxu1 %v4931_v11  ;;  %1324 = vmatpush1.bf16.msra.mxu0 %v5018_v35  ;;  %v5040_v3 = vld [vmem:[#allocation13 + $0xa4] ss:$8 sps:$4 sm:$0xff]   ;;  %v4982_v5 = vld [vmem:[#allocation7 + $0xcc] ss:$16 sps:$4 sm:$0xff]   ;;  %v5043_v7 = vld [vmem:[#allocation13 + $0xb4] ss:$8 sps:$4 sm:$0xff]  }
 0x1bb   :  { %793 = vmatprep.subr.bf16.mxu1 %v4932_v12  ;;  %1325 = vmatprep.subr.bf16.mxu0 %v5019_v37  ;;  %v4977_v4 = vld [vmem:[#allocation7 + $0xa8] ss:$16 sps:$4 sm:$0xff]   ;;  %v5042_v6 = vld [vmem:[#allocation13 + $0xa0] ss:$8 sps:$4 sm:$0xff]   ;;  %v5045_v10 = vld [vmem:[#allocation13 + $0xb0] ss:$8 sps:$4 sm:$0xff]  }
 0x1bc   :  { %v4980_v8 = vld [vmem:[#allocation7 + $0xc8] ss:$16 sps:$4 sm:$0xff]   ;;  %v4985_v9 = vld [vmem:[#allocation7 + $0xec] ss:$16 sps:$4 sm:$0xff]   ;;  %v5106_v37 = vld [vmem:[#allocation17 + $0x40] sm:$0xff]   ;;  %s6363_s8 = sld [smem:[#allocation51_spill]] }
 0x1bd   :  { %v5046_v11 = vld [vmem:[#allocation13 + $0xc4] ss:$8 sps:$4 sm:$0xff]   ;;  %v4988_v13 = vld [vmem:[#allocation7 + $0x10c] ss:$16 sps:$4 sm:$0xff]   ;;  %s6364_s3 = sld [smem:[#allocation55_spill]]  ;;  %vm5898_vm0 = vmmov 0  }
 0x1be   :  { %794 = vmatpush1.bf16.msra.mxu1 %v4934_v15  ;;  %1326 = vmatpush1.bf16.msra.mxu0 %v5021_v39  ;;  %v4983_v12 = vld [vmem:[#allocation7 + $0xe8] ss:$16 sps:$4 sm:$0xff]   ;;  %v5009_v28 = vld [vmem:[#allocation7 + $0x1ec] ss:$16 sps:$4 sm:$0xff]   ;;  %s6365_s26 = sld [smem:[#allocation48_spill]]  ;;  %s6366_s14 = sld [smem:[#allocation57_spill]] }
 0x1bf   :  { %795 = vmatprep.subr.bf16.mxu1 %v4935_v16  ;;  %1327 = vmatprep.subr.bf16.mxu0 %v5022_v41  ;;  %v4986_v15 = vld [vmem:[#allocation7 + $0x108] ss:$16 sps:$4 sm:$0xff]   ;;  %v4991_v16 = vld [vmem:[#allocation7 + $0x12c] ss:$16 sps:$4 sm:$0xff]   ;;  %v5110_v41 = vld [vmem:[#allocation17 + $0x50] sm:$0xff]   ;;  %s6367_s9 = sld [smem:[#allocation58_spill]] }
 0x1c0   :  { %v5004_v27 = vld [vmem:[#allocation7 + $0x1c8] ss:$16 sps:$4 sm:$0xff]   ;;  %v5051_v31 = vld [vmem:[#allocation13 + $0xd0] ss:$8 sps:$4 sm:$0xff]   ;;  %v5054_v33 = vld [vmem:[#allocation13 + $0xe0] ss:$8 sps:$4 sm:$0xff]  }
 0x1c1   :  { %v5007_v29 = vld [vmem:[#allocation7 + $0x1e8] ss:$16 sps:$4 sm:$0xff]   ;;  %v5057_v35 = vld [vmem:[#allocation13 + $0xf0] ss:$8 sps:$4 sm:$0xff]   ;;  %s5899_s19 = smov [#allocation34]  }
 0x1c2   :  { %796 = vmatpush1.bf16.msra.mxu1 %v4937_v17  ;;  %1328 = vmatpush1.bf16.msra.mxu0 %v5024_v44  ;;  %v4989_v17 = vld [vmem:[#allocation7 + $0x128] ss:$16 sps:$4 sm:$0xff]   ;;  %s4209_s5 = sshll.u32 %s5899_s19, 4  ;;  %s4210_s5 = int_to_ptr.vmem [resolvable:$true] %s4209_s5 }
 0x1c3   :  { %797 = vmatprep.subr.bf16.mxu1 %v4938_v18  ;;  %1329 = vmatprep.subr.bf16.mxu0 %v5025_v46  ;;  %v4994_v18 = vld [vmem:[#allocation7 + $0x14c] ss:$16 sps:$4 sm:$0xff]   ;;  %v5115_v46 = vld [vmem:[#allocation17 + $0x20] sm:$0xff]   ;;  %s5794_s28 = scalar_lea.vmem %s4210_s5, 128  ;;  %p5799_p7 = scmp.lt.s32.totalorder %s4210_s5, %s4210_s5 }
 0x1c4   :  { %v5108_v39 = vld [vmem:[#allocation17 + $0x48] sm:$0xff]   ;;  %v5112_v43 = vld [vmem:[#allocation17 + $0x58] sm:$0xff]   ;;  %p5795_p6 = scmp.ne.s32.totalorder %s4210_s5, %s5794_s28  ;;  %p5800_p8 = scmp.lt.s32.totalorder %s5794_s28, %s5794_s28 }
 0x1c5   :  { %v5113_v44 = vld [vmem:[#allocation17 + $0x18] sm:$0xff]  }
 0x1c6   :  { %798 = vmatpush1.bf16.msra.mxu1 %v4940_v19  ;;  %1330 = vmatpush1.bf16.msra.mxu0 %v5027_v50  ;;  %v4992_v19 = vld [vmem:[#allocation7 + $0x148] ss:$16 sps:$4 sm:$0xff]   ;;  %v6166_v50 = vld [vmem:[#allocation8] sm:$0xf]  ;;  %p5801_p9 = por %p5800_p8, %p5799_p7 }
 0x1c7   :  { %799 = vmatprep.subr.bf16.mxu1 %v4941_v20  ;;  %1331 = vmatprep.subr.bf16.mxu0 %v5028_v51  ;;  %v4997_v20 = vld [vmem:[#allocation7 + $0x16c] ss:$16 sps:$4 sm:$0xff]  }
 0x1c8   :  { %p5802_p10 = pnand %p5801_p9, %p5795_p6 }
 0x1ca   :  { %800 = vmatpush1.bf16.msra.mxu1 %v4943_v21  ;;  %1332 = vmatpush1.bf16.msra.mxu0 %v5030_v54  ;;  %v4995_v21 = vld [vmem:[#allocation7 + $0x168] ss:$16 sps:$4 sm:$0xff]  }
 0x1cb   :  { %801 = vmatprep.subr.bf16.mxu1 %v4944_v22  ;;  %1333 = vmatprep.subr.bf16.mxu0 %v5031_v55  ;;  %v5000_v22 = vld [vmem:[#allocation7 + $0x18c] ss:$16 sps:$4 sm:$0xff]  }
 0x1ce   :  { %802 = vmatpush1.bf16.msra.mxu1 %v4946_v23  ;;  %1334 = vmatpush1.bf16.msra.mxu0 %v5033_v58  ;;  %v4998_v23 = vld [vmem:[#allocation7 + $0x188] ss:$16 sps:$4 sm:$0xff]  }
 0x1cf   :  { %803 = vmatprep.subr.bf16.mxu1 %v4947_v24  ;;  %1335 = vmatprep.subr.bf16.mxu0 %v5034_v59  ;;  %v5003_v24 = vld [vmem:[#allocation7 + $0x1ac] ss:$16 sps:$4 sm:$0xff]  }
 0x1d2   :  { %804 = vmatpush1.bf16.msra.mxu1 %v4949_v25  ;;  %1336 = vmatpush1.bf16.msra.mxu0 %v5036_v62  ;;  %v5001_v25 = vld [vmem:[#allocation7 + $0x1a8] ss:$16 sps:$4 sm:$0xff]  }
 0x1d3   :  { %805 = vmatprep.subr.bf16.mxu1 %v4950_v26  ;;  %1337 = vmatprep.subr.bf16.mxu0 %v5037_v63  ;;  %v5006_v26 = vld [vmem:[#allocation7 + $0x1cc] ss:$16 sps:$4 sm:$0xff]  }
 0x1d6   :  { %806 = vmatpush1.bf16.msra.mxu1 %v4952_v30  ;;  %1338 = vmatpush1.bf16.msra.mxu0 %v5039_v2  ;;  %v5049_v30 = vld [vmem:[#allocation13 + $0xd4] ss:$8 sps:$4 sm:$0xff]  }
 0x1d7   :  { %807 = vmatprep.subr.bf16.mxu1 %v4953_v32  ;;  %1339 = vmatprep.subr.bf16.mxu0 %v5040_v3  ;;  %v5052_v32 = vld [vmem:[#allocation13 + $0xe4] ss:$8 sps:$4 sm:$0xff]  }
 0x1da   :  { %808 = vmatpush1.bf16.msra.mxu1 %v4955_v34  ;;  %1340 = vmatpush1.bf16.msra.mxu0 %v5042_v6  ;;  %v5055_v34 = vld [vmem:[#allocation13 + $0xf4] ss:$8 sps:$4 sm:$0xff]  }
 0x1db   :  { %809 = vmatprep.subr.bf16.mxu1 %v4956_v36  ;;  %1341 = vmatprep.subr.bf16.mxu0 %v5043_v7  ;;  %v5060_v36 = vld [vmem:[#allocation13 + $0x104] ss:$8 sps:$4 sm:$0xff]  }
 0x1de   :  { %810 = vmatpush1.bf16.msra.mxu1 %v4958_v38  ;;  %1342 = vmatpush1.bf16.msra.mxu0 %v5045_v10  ;;  %v5107_v38 = vld [vmem:[#allocation17] sm:$0xff]  }
 0x1df   :  { %811 = vmatprep.subr.bf16.mxu1 %v4959_v40  ;;  %1343 = vmatprep.subr.bf16.mxu0 %v5046_v11  ;;  %v5109_v40 = vld [vmem:[#allocation17 + $0x8] sm:$0xff]   ;;  %v5058_v10 = vld [vmem:[#allocation13 + $0x100] ss:$8 sps:$4 sm:$0xff]   ;;  %v5063_v11 = vld [vmem:[#allocation13 + $0x114] ss:$8 sps:$4 sm:$0xff]  }
 0x1e2   :  { %812 = vmatpush1.bf16.msra.mxu1 %v4961_v42  ;;  %v5111_v42 = vld [vmem:[#allocation17 + $0x10] sm:$0xff]  }
 0x1e3   :  { %822 = vmatprep.subr.bf16.mxu1 %v4964_v45  ;;  %v5114_v45 = vld [vmem:[#allocation17 + $0x60] sm:$0xff]  }
 0x1e5   :  { %814 = vmatmul.mubr.bf16.vlgmr.msra.gmra.mrb[0].mxu1 %v6156_v48 }
 0x1e6   :  { %823 = vmatpush1.bf16.msra.mxu1 %v4962_v47  ;;  %854 = vmatprep.mubr.bf16.mxu1 %v6153_v14  ;;  %v5048_v14 = vld [vmem:[#allocation13 + $0xc0] ss:$8 sps:$4 sm:$0xff]   ;;  %v441_v47 = vlaneseq }
 0x1e7   :  { %824 = vmatprep.subr.bf16.mxu1 %v4967_v49  ;;  %1344 = vmatpush1.bf16.msra.mxu0 %v5048_v14  ;;  %v5064_v14 = vld [vmem:[#allocation13 + $0x120] ss:$8 sps:$4 sm:$0xff]  }
 0x1e8   :  { %1345 = vmatprep.subr.bf16.mxu0 %v5049_v30  ;;  %v5088_v30 = vld [vmem:[#allocation13 + $0x1a0] ss:$8 sps:$4 sm:$0xff]  }
 0x1ea   :  { %825 = vmatpush1.bf16.msra.mxu1 %v4965_v52 }
 0x1eb   :  { %826 = vmatprep.subr.bf16.mxu1 %v4970_v53  ;;  %1346 = vmatpush1.bf16.msra.mxu0 %v5051_v31  ;;  %v6173_v53 = vld [vmem:[#allocation10] sm:$0xf]  ;;  %v5093_v31 = vld [vmem:[#allocation13 + $0x1b4] ss:$8 sps:$4 sm:$0xff]  }
 0x1ec   :  { %1347 = vmatprep.subr.bf16.mxu0 %v5052_v32  ;;  %v5091_v32 = vld [vmem:[#allocation13 + $0x1b0] ss:$8 sps:$4 sm:$0xff]  }
 0x1ee   :  { %827 = vmatpush1.bf16.msra.mxu1 %v4968_v56  ;;  %v6177_v56 = vld [vmem:[#allocation11] sm:$0xf] }
 0x1ef   :  { %828 = vmatprep.subr.bf16.mxu1 %v4973_v57  ;;  %1348 = vmatpush1.bf16.msra.mxu0 %v5054_v33  ;;  %v5096_v33 = vld [vmem:[#allocation13 + $0x1c4] ss:$8 sps:$4 sm:$0xff]  }
 0x1f0   :  { %1349 = vmatprep.subr.bf16.mxu0 %v5055_v34 }
 0x1f2   :  { %829 = vmatpush1.bf16.msra.mxu1 %v4971_v60 }
 0x1f3   :  { %830 = vmatprep.subr.bf16.mxu1 %v4976_v61  ;;  %1350 = vmatpush1.bf16.msra.mxu0 %v5057_v35  ;;  %v5094_v35 = vld [vmem:[#allocation13 + $0x1c0] ss:$8 sps:$4 sm:$0xff]  }
 0x1f4   :  { %1360 = vmatprep.subr.bf16.mxu0 %v5060_v36 }
 0x1f6   :  { %831 = vmatpush1.bf16.msra.mxu1 %v4974_v0 }
 0x1f7   :  { %832 = vmatprep.subr.bf16.mxu1 %v4979_v1 }
 0x1fa   :  { %833 = vmatpush1.bf16.msra.mxu1 %v4977_v4 }
 0x1fb   :  { %834 = vmatprep.subr.bf16.mxu1 %v4982_v5 }
 0x1fe   :  { %835 = vmatpush1.bf16.msra.mxu1 %v4980_v8 }
 0x1ff   :  { %836 = vmatprep.subr.bf16.mxu1 %v4985_v9 }
 0x202   :  { %837 = vmatpush1.bf16.msra.mxu1 %v4983_v12  ;;  %v5061_v12 = vld [vmem:[#allocation13 + $0x110] ss:$8 sps:$4 sm:$0xff]  }
 0x203   :  { %838 = vmatprep.subr.bf16.mxu1 %v4988_v13  ;;  %v5066_v13 = vld [vmem:[#allocation13 + $0x124] ss:$8 sps:$4 sm:$0xff]  }
 0x206   :  { %839 = vmatpush1.bf16.msra.mxu1 %v4986_v15  ;;  %v5069_v15 = vld [vmem:[#allocation13 + $0x134] ss:$8 sps:$4 sm:$0xff]  }
 0x207   :  { %840 = vmatprep.subr.bf16.mxu1 %v4991_v16  ;;  %v5067_v16 = vld [vmem:[#allocation13 + $0x130] ss:$8 sps:$4 sm:$0xff]  }
 0x20a   :  { %841 = vmatpush1.bf16.msra.mxu1 %v4989_v17  ;;  %v5072_v17 = vld [vmem:[#allocation13 + $0x144] ss:$8 sps:$4 sm:$0xff]  }
 0x20b   :  { %842 = vmatprep.subr.bf16.mxu1 %v4994_v18  ;;  %v5070_v18 = vld [vmem:[#allocation13 + $0x140] ss:$8 sps:$4 sm:$0xff]  }
 0x20e   :  { %843 = vmatpush1.bf16.msra.mxu1 %v4992_v19  ;;  %v5075_v19 = vld [vmem:[#allocation13 + $0x154] ss:$8 sps:$4 sm:$0xff]  }
 0x20f   :  { %844 = vmatprep.subr.bf16.mxu1 %v4997_v20  ;;  %v5073_v20 = vld [vmem:[#allocation13 + $0x150] ss:$8 sps:$4 sm:$0xff]  }
 0x212   :  { %845 = vmatpush1.bf16.msra.mxu1 %v4995_v21  ;;  %v5078_v21 = vld [vmem:[#allocation13 + $0x164] ss:$8 sps:$4 sm:$0xff]  }
 0x213   :  { %846 = vmatprep.subr.bf16.mxu1 %v5000_v22  ;;  %v5076_v22 = vld [vmem:[#allocation13 + $0x160] ss:$8 sps:$4 sm:$0xff]  }
 0x216   :  { %847 = vmatpush1.bf16.msra.mxu1 %v4998_v23  ;;  %v5081_v23 = vld [vmem:[#allocation13 + $0x174] ss:$8 sps:$4 sm:$0xff]  }
 0x217   :  { %848 = vmatprep.subr.bf16.mxu1 %v5003_v24  ;;  %v5079_v24 = vld [vmem:[#allocation13 + $0x170] ss:$8 sps:$4 sm:$0xff]  }
 0x21a   :  { %849 = vmatpush1.bf16.msra.mxu1 %v5001_v25  ;;  %v5084_v25 = vld [vmem:[#allocation13 + $0x184] ss:$8 sps:$4 sm:$0xff]  }
 0x21b   :  { %850 = vmatprep.subr.bf16.mxu1 %v5006_v26  ;;  %v5082_v26 = vld [vmem:[#allocation13 + $0x180] ss:$8 sps:$4 sm:$0xff]  }
 0x21e   :  { %851 = vmatpush1.bf16.msra.mxu1 %v5004_v27  ;;  %v5087_v27 = vld [vmem:[#allocation13 + $0x194] ss:$8 sps:$4 sm:$0xff]  }
 0x21f   :  { %852 = vmatprep.subr.bf16.mxu1 %v5009_v28  ;;  %v5085_v28 = vld [vmem:[#allocation13 + $0x190] ss:$8 sps:$4 sm:$0xff]  }
 0x222   :  { %853 = vmatpush1.bf16.msra.mxu1 %v5007_v29  ;;  %v5090_v29 = vld [vmem:[#allocation13 + $0x1a4] ss:$8 sps:$4 sm:$0xff]  }
 0x223   :  { %4703 = vmatprep.subr.bf16.mxu1 %v5106_v37  ;;  %v5099_v37 = vld [vmem:[#allocation13 + $0x1d4] ss:$8 sps:$4 sm:$0xff]  }
 0x225   :  { %855 = vmatmul.mubr.bf16.vlgmr.msra.gmra.mrb[4].mxu1 %v6156_v48  ;;  %v6161_v48 = vshrl.u32 %v441_v47, 7 }
 0x226   :  { %4704 = vmatpush3.bf16.msra.mxu1 %v5107_v38 }
 0x227   :  { %4705 = vmatprep.subr.bf16.mxu1 %v5108_v39  ;;  %v6164_v49 = vsub.s32 0, %v6161_v48  ;;  %v6169_v51 = vsub.s32 1, %v6161_v48  ;;  %v6188_v34 = vsub.s32 2, %v6161_v48  ;;  %v6191_v36 = vsub.s32 3, %v6161_v48 }
 0x229   :  { %v444_v52 = vrot.slane %v6166_v50, %v6164_v49  ;;  %v448_v54 = vrot.slane %v6166_v50, %v6169_v51  ;;  %v872_v58 = vrot.slane %v6173_v53, %v6164_v49  ;;  %v876_v62 = vrot.slane %v6173_v53, %v6169_v51 }
 0x22a   :  { %4706 = vmatpush3.bf16.msra.mxu1 %v5109_v40  ;;  %v898_v1 = vrot.slane %v6177_v56, %v6164_v49  ;;  %v902_v3 = vrot.slane %v6177_v56, %v6169_v51  ;;  %v452_v38 = vrot.slane %v6166_v50, %v6188_v34  ;;  %v456_v39 = vrot.slane %v6166_v50, %v6191_v36  ;;  %v5097_v40 = vld [vmem:[#allocation13 + $0x1d0] ss:$8 sps:$4 sm:$0xff]  }
 0x22b   :  { %4707 = vmatprep.subr.bf16.mxu1 %v5110_v41  ;;  %v5102_v41 = vld [vmem:[#allocation13 + $0x1e4] ss:$8 sps:$4 sm:$0xff]   ;;  %v884_v47 = vrot.slane %v6173_v53, %v6191_v36  ;;  %v906_v50 = vrot.slane %v6177_v56, %v6188_v34 }
 0x22e   :  { %4708 = vmatpush3.bf16.msra.mxu1 %v5111_v42 }
 0x22f   :  { %4709 = vmatprep.subr.bf16.mxu1 %v5112_v43 }
 0x232   :  { %4710 = vmatpush3.bf16.msra.mxu1 %v5113_v44  ;;  %v880_v44 = vrot.slane %v6173_v53, %v6188_v34 }
 0x233   :  { %4711 = vmatprep.subr.bf16.mxu1 %v5114_v45 }
 0x236   :  { %4712 = vmatpush3.bf16.msra.mxu1 %v5115_v46 }
 0x2b8   :  { %v815_v55 = vpop.f32.mrb[0].mxu1 }
 0x2b9   :  { %v816_v57 = vadd.f32 %v815_v55, %v444_v52  ;;  %v817_v59 = vpop.f32.mrb[1].mxu1 }
 0x2ba   :  { %v818_v60 = vadd.f32 %v817_v59, %v448_v54  ;;  %v819_v61 = vpop.f32.mrb[2].mxu1  ;;  %v5100_v54 = vld [vmem:[#allocation13 + $0x1e0] ss:$8 sps:$4 sm:$0xff]  }
 0x2bb   :  { %v863_v63 = vmax.f32 %v816_v57, 0.0  ;;  %v820_v0 = vpop.f32.mrb[3].mxu1 }
 0x2bc   :  { %v864_v2 = vmax.f32 %v818_v60, 0.0  ;;  %v910_v60 = vrot.slane %v6177_v56, %v6191_v36  ;;  %v5120_v56 = vld [vmem:[#allocation17 + $0x78] sm:$0xff]  }
 0x2bd   :  { %v889_v4 = vmul.f32 %v872_v58, %v863_v63  ;;  %v5105_v58 = vld [vmem:[#allocation13 + $0x1f4] ss:$8 sps:$4 sm:$0xff]   ;;  %v5103_v63 = vld [vmem:[#allocation13 + $0x1f0] ss:$8 sps:$4 sm:$0xff]  }
 0x2be   :  { %v890_v5 = vmul.f32 %v876_v62, %v864_v2 }
 0x2bf   :  { %v915_v6 = vadd.f32 %v898_v1, %v889_v4  ;;  %v5117_v4 = vld [vmem:[#allocation17 + $0x28] sm:$0xff]  }
 0x2c0   :  { %v916_v7 = vadd.f32 %v902_v3, %v890_v5  ;;  %v5116_v3 = vld [vmem:[#allocation17 + $0x68] sm:$0xff]   ;;  %v5118_v5 = vld [vmem:[#allocation17 + $0x70] sm:$0xff]  }
 0x2c1   :  { %v919_v8 = vpack.c.bf16 %v915_v6, %v915_v6  ;;  %4713 = vmatprep.subr.bf16.mxu1 %v5116_v3  ;;  %v5119_v6 = vld [vmem:[#allocation17 + $0x30] sm:$0xff]  }
 0x2c2   :  { %v920_v9 = vpack.c.bf16 %v916_v7, %v916_v7  ;;  %4714 = vmatpush3.bf16.msra.mxu1 %v5117_v4  ;;  %v5121_v7 = vld [vmem:[#allocation17 + $0x38] sm:$0xff]   ;;  %v1647_v4 = vld [vmem:[#allocation19 + $0x110] sm:$0xff] }
 0x2c3   :  { %4715 = vmatprep.subr.bf16.mxu1 %v5118_v5  ;;  %v1651_v5 = vld [vmem:[#allocation19 + $0x130] sm:$0xff] }
 0x2c4   :  { %1351 = vmatprep.mubr.bf16.mxu0 %v920_v9  ;;  %v1617_v9 = vld [vmem:[#allocation19 + $0x20] sm:$0xff] }
 0x2c5   :  { %1352 = vmatmul.mubr.bf16.vlgmr.msra.gmra.mrb[0].mxu0 %v919_v8  ;;  %v1613_v8 = vld [vmem:[#allocation19] sm:$0xff] }
 0x2c6   :  { %1361 = vmatpush1.bf16.msra.mxu0 %v5058_v10  ;;  %4716 = vmatpush3.bf16.msra.mxu1 %v5119_v6  ;;  %v4403_v10 = vcombine.high %v1613_v8, %v1617_v9 }
 0x2c7   :  { %1362 = vmatprep.subr.bf16.mxu0 %v5063_v11  ;;  %4717 = vmatprep.subr.bf16.mxu1 %v5120_v56  ;;  %v4402_v11 = vcombine.low %v1613_v8, %v1617_v9  ;;  %v1645_v56 = vld [vmem:[#allocation19 + $0x100] sm:$0xff]  ;;  %v4439_v9 = vcombine.high %v1647_v4, %v1651_v5 }
 0x2ca   :  { %1363 = vmatpush1.bf16.msra.mxu0 %v5061_v12  ;;  %4718 = vmatpush3.bf16.msra.mxu1 %v5121_v7  ;;  %v1610_v12 = vld [vmem:[#allocation5 + $0x8] sm:$0xff]  ;;  %v1649_v7 = vld [vmem:[#allocation19 + $0x120] sm:$0xff] }
 0x2cb   :  { %1364 = vmatprep.subr.bf16.mxu0 %v5066_v13  ;;  %2423 = vmatprep.subr.bf16.mxu1 %v4403_v10  ;;  %v6205_v13 = vpack.c.bf16 %v1610_v12, %v1610_v12  ;;  %v1659_v12 = vld [vmem:[#allocation19 + $0x170] sm:$0xff] }
 0x2ce   :  { %1365 = vmatpush1.bf16.msra.mxu0 %v5064_v14  ;;  %v987_v14 = vld [vmem:[%s6361_s27] sm:$0x3] }
 0x2cf   :  { %1366 = vmatprep.subr.bf16.mxu0 %v5069_v15  ;;  %v992_v15 = vrot.slane %v987_v14, %v6164_v49 }
 0x2d2   :  { %1367 = vmatpush1.bf16.msra.mxu0 %v5067_v16  ;;  %v1403_v16 = vld [vmem:[#allocation14] sm:$0x3] }
 0x2d3   :  { %1368 = vmatprep.subr.bf16.mxu0 %v5072_v17  ;;  %v996_v17 = vrot.slane %v987_v14, %v6169_v51  ;;  %v4435_v14 = vcombine.high %v1645_v56, %v1649_v7 }
 0x2d6   :  { %1369 = vmatpush1.bf16.msra.mxu0 %v5070_v18 }
 0x2d7   :  { %1370 = vmatprep.subr.bf16.mxu0 %v5075_v19  ;;  %v1417_v19 = vld [vmem:[#allocation16] sm:$0x3] }
 0x2da   :  { %1371 = vmatpush1.bf16.msra.mxu0 %v5073_v20 }
 0x2db   :  { %1372 = vmatprep.subr.bf16.mxu0 %v5078_v21  ;;  %v1408_v21 = vrot.slane %v1403_v16, %v6164_v49 }
 0x2de   :  { %1373 = vmatpush1.bf16.msra.mxu0 %v5076_v22 }
 0x2df   :  { %1374 = vmatprep.subr.bf16.mxu0 %v5081_v23 }
 0x2e2   :  { %1375 = vmatpush1.bf16.msra.mxu0 %v5079_v24  ;;  %v1412_v24 = vrot.slane %v1403_v16, %v6169_v51  ;;  %v1657_v16 = vld [vmem:[#allocation19 + $0x160] sm:$0xff] }
 0x2e3   :  { %1376 = vmatprep.subr.bf16.mxu0 %v5084_v25 }
 0x2e6   :  { %1377 = vmatpush1.bf16.msra.mxu0 %v5082_v26 }
 0x2e7   :  { %1378 = vmatprep.subr.bf16.mxu0 %v5087_v27  ;;  %v1422_v27 = vrot.slane %v1417_v19, %v6164_v49 }
 0x2ea   :  { %1379 = vmatpush1.bf16.msra.mxu0 %v5085_v28 }
 0x2eb   :  { %1380 = vmatprep.subr.bf16.mxu0 %v5090_v29 }
 0x2ee   :  { %1381 = vmatpush1.bf16.msra.mxu0 %v5088_v30  ;;  %v1426_v30 = vrot.slane %v1417_v19, %v6169_v51  ;;  %v4434_v19 = vcombine.low %v1645_v56, %v1649_v7 }
 0x2ef   :  { %1382 = vmatprep.subr.bf16.mxu0 %v5093_v31 }
 0x2f2   :  { %1383 = vmatpush1.bf16.msra.mxu0 %v5091_v32 }
 0x2f3   :  { %1384 = vmatprep.subr.bf16.mxu0 %v5096_v33 }
 0x2f6   :  { %1385 = vmatpush1.bf16.msra.mxu0 %v5094_v35  ;;  %v1615_v35 = vld [vmem:[#allocation19 + $0x10] sm:$0xff] }
 0x2f7   :  { %1386 = vmatprep.subr.bf16.mxu0 %v5099_v37  ;;  %v1619_v37 = vld [vmem:[#allocation19 + $0x30] sm:$0xff] }
 0x2f8   :  { %v856_v42 = vpop.f32.mrb[4].mxu1 }
 0x2f9   :  { %v857_v43 = vadd.f32 %v856_v42, %v452_v38  ;;  %v858_v45 = vpop.f32.mrb[5].mxu1  ;;  %v4406_v42 = vcombine.low %v1615_v35, %v1619_v37 }
 0x2fa   :  { %v859_v46 = vadd.f32 %v858_v45, %v456_v39  ;;  %v860_v52 = vpop.f32.mrb[6].mxu1  ;;  %1387 = vmatpush1.bf16.msra.mxu0 %v5097_v40  ;;  %v1621_v39 = vld [vmem:[#allocation19 + $0x40] sm:$0xff] }
 0x2fb   :  { %v865_v55 = vmax.f32 %v857_v43, 0.0  ;;  %v861_v57 = vpop.f32.mrb[7].mxu1  ;;  %1388 = vmatprep.subr.bf16.mxu0 %v5102_v41  ;;  %v1625_v40 = vld [vmem:[#allocation19 + $0x60] sm:$0xff]  ;;  %v4407_v41 = vcombine.high %v1615_v35, %v1619_v37 }
 0x2fc   :  { %v866_v59 = vmax.f32 %v859_v46, 0.0  ;;  %v4411_v45 = vcombine.high %v1621_v39, %v1625_v40  ;;  %v1623_v46 = vld [vmem:[#allocation19 + $0x50] sm:$0xff]  ;;  %v1629_v52 = vld [vmem:[#allocation19 + $0x80] sm:$0xff] }
 0x2fd   :  { %v891_v61 = vmul.f32 %v880_v44, %v865_v55  ;;  %v1631_v57 = vld [vmem:[#allocation19 + $0x90] sm:$0xff] }
 0x2fe   :  { %v892_v62 = vmul.f32 %v884_v47, %v866_v59  ;;  %1389 = vmatpush1.bf16.msra.mxu0 %v5100_v54  ;;  %v1627_v47 = vld [vmem:[#allocation19 + $0x70] sm:$0xff]  ;;  %v1633_v54 = vld [vmem:[#allocation19 + $0xa0] sm:$0xff]  ;;  %v4410_v59 = vcombine.low %v1621_v39, %v1625_v40 }
 0x2ff   :  { %v917_v0 = vadd.f32 %v906_v50, %v891_v61  ;;  %1390 = vmatprep.subr.bf16.mxu0 %v5105_v58  ;;  %v4415_v55 = vcombine.high %v1623_v46, %v1627_v47  ;;  %v4414_v50 = vcombine.low %v1623_v46, %v1627_v47  ;;  %v1635_v58 = vld [vmem:[#allocation19 + $0xb0] sm:$0xff]  ;;  %v4418_v3 = vcombine.low %v1629_v52, %v1633_v54 }
 0x300   :  { %v918_v53 = vadd.f32 %v910_v60, %v892_v62  ;;  %v4423_v60 = vcombine.high %v1631_v57, %v1635_v58  ;;  %v1639_v61 = vld [vmem:[#allocation19 + $0xd0] sm:$0xff] }
 0x301   :  { %v921_v2 = vpack.c.bf16 %v917_v0, %v917_v0  ;;  %v1643_v62 = vld [vmem:[#allocation19 + $0xf0] sm:$0xff]  ;;  %v1637_v0 = vld [vmem:[#allocation19 + $0xc0] sm:$0xff] }
 0x302   :  { %1391 = vmatpush1.bf16.msra.mxu0 %v5103_v63  ;;  %v922_v1 = vpack.c.bf16 %v918_v53, %v918_v53  ;;  %v4419_v63 = vcombine.high %v1629_v52, %v1633_v54  ;;  %v1641_v53 = vld [vmem:[#allocation19 + $0xe0] sm:$0xff]  ;;  %v4430_v8 = vcombine.low %v1639_v61, %v1643_v62  ;;  %v1683_v39 = vld [vmem:[#allocation19 + $0x230] sm:$0xff] }
 0x303   :  { %2505 = vmatprep.subr.bf16.mxu0 %v4407_v41  ;;  %v4427_v6 = vcombine.high %v1637_v0, %v1641_v53  ;;  %v4426_v10 = vcombine.low %v1637_v0, %v1641_v53  ;;  %v1677_v41 = vld [vmem:[#allocation19 + $0x200] sm:$0xff]  ;;  %v1687_v46 = vld [vmem:[#allocation19 + $0x250] sm:$0xff] }
 0x304   :  { %1392 = vmatprep.mubr.bf16.mxu0 %v922_v1  ;;  %v4422_v1 = vcombine.low %v1631_v57, %v1635_v58  ;;  %v1691_v47 = vld [vmem:[#allocation19 + $0x270] sm:$0xff]  ;;  %v1685_v54 = vld [vmem:[#allocation19 + $0x240] sm:$0xff] }
 0x305   :  { %1393 = vmatmul.mubr.bf16.vlgmr.msra.gmra.mrb[0].mxu0 %v921_v2  ;;  %v4431_v2 = vcombine.high %v1639_v61, %v1643_v62  ;;  %v4479_v57 = vcombine.high %v1687_v46, %v1691_v47  ;;  %v1693_v62 = vld [vmem:[#allocation19 + $0x280] sm:$0xff]  ;;  %v4478_v0 = vcombine.low %v1687_v46, %v1691_v47  ;;  %v1618_v46 = vld [vmem:[#allocation19 + $0x28] sm:$0xff] }
 0x306   :  { %2537 = vmatprep.mubr.bf16.mxu0 %v6205_v13  ;;  %2506 = vmatpush1.bf16.msra.mxu0 %v4406_v42  ;;  %v1681_v42 = vld [vmem:[#allocation19 + $0x220] sm:$0xff] }
 0x307   :  { %2507 = vmatprep.subr.bf16.mxu0 %v4415_v55  ;;  %v4467_v52 = vcombine.high %v1677_v41, %v1681_v42  ;;  %v1689_v55 = vld [vmem:[#allocation19 + $0x260] sm:$0xff]  ;;  %v4466_v58 = vcombine.low %v1677_v41, %v1681_v42 }
 0x308   :  { %v4475_v61 = vcombine.high %v1685_v54, %v1689_v55 }
 0x30a   :  { %2508 = vmatpush1.bf16.msra.mxu0 %v4414_v50 }
 0x30b   :  { %2509 = vmatprep.subr.bf16.mxu0 %v4423_v60  ;;  %v1699_v60 = vld [vmem:[#allocation19 + $0x2b0] sm:$0xff] }
 0x30e   :  { %2510 = vmatpush1.bf16.msra.mxu0 %v4422_v1  ;;  %v4474_v1 = vcombine.low %v1685_v54, %v1689_v55  ;;  %v1609_v54 = vld [vmem:[#allocation5] sm:$0xff] }
 0x30f   :  { %2511 = vmatprep.subr.bf16.mxu0 %v4431_v2  ;;  %v1703_v2 = vld [vmem:[#allocation19 + $0x2d0] sm:$0xff] }
 0x312   :  { %2512 = vmatpush1.bf16.msra.mxu0 %v4430_v8 }
 0x313   :  { %2513 = vmatprep.subr.bf16.mxu0 %v4439_v9  ;;  %v1711_v9 = vld [vmem:[#allocation19 + $0x310] sm:$0xff] }
 0x3d8   :  { %v1394_v18 = vpop.f32.mrb[0].mxu0 }
 0x3d9   :  { %v4834_v20 = vadd.f32 %v1394_v18, %v992_v15  ;;  %v1396_v22 = vpop.f32.mrb[1].mxu0  ;;  %v1653_v15 = vld [vmem:[#allocation19 + $0x140] sm:$0xff] }
 0x3da   :  { %v4835_v23 = vadd.f32 %v1396_v22, %v996_v17  ;;  %v1398_v25 = vpop.f32.mrb[2].mxu0  ;;  %v4438_v17 = vcombine.low %v1647_v4, %v1651_v5  ;;  %v4443_v22 = vcombine.high %v1653_v15, %v1657_v16  ;;  %v1701_v5 = vld [vmem:[#allocation19 + $0x2c0] sm:$0xff] }
 0x3db   :  { %v1401_v26 = vmax.f32 %v4834_v20, 0.0  ;;  %v1399_v28 = vpop.f32.mrb[3].mxu0  ;;  %v1663_v20 = vld [vmem:[#allocation19 + $0x190] sm:$0xff] }
 0x3dc   :  { %v1402_v29 = vmax.f32 %v4835_v23, 0.0  ;;  %v1661_v23 = vld [vmem:[#allocation19 + $0x180] sm:$0xff]  ;;  %2514 = vmatpush1.bf16.msra.mxu0 %v4438_v17  ;;  %v1671_v28 = vld [vmem:[#allocation19 + $0x1d0] sm:$0xff] }
 0x3dd   :  { %v1415_v31 = vmul.f32 %v1408_v21, %v1401_v26  ;;  %v1667_v21 = vld [vmem:[#allocation19 + $0x1b0] sm:$0xff] }
 0x3de   :  { %v1416_v32 = vmul.f32 %v1412_v24, %v1402_v29  ;;  %v1665_v24 = vld [vmem:[#allocation19 + $0x1a0] sm:$0xff]  ;;  %v4455_v26 = vcombine.high %v1663_v20, %v1667_v21  ;;  %v1675_v29 = vld [vmem:[#allocation19 + $0x1f0] sm:$0xff] }
 0x3df   :  { %v1429_v33 = vadd.f32 %v1422_v27, %v1415_v31  ;;  %v4442_v27 = vcombine.low %v1653_v15, %v1657_v16  ;;  %v1669_v31 = vld [vmem:[#allocation19 + $0x1c0] sm:$0xff]  ;;  %v4463_v35 = vcombine.high %v1671_v28, %v1675_v29  ;;  %v4450_v37 = vcombine.low %v1661_v23, %v1665_v24 }
 0x3e0   :  { %v1430_v38 = vadd.f32 %v1426_v30, %v1416_v32  ;;  %v4451_v30 = vcombine.high %v1661_v23, %v1665_v24  ;;  %v1673_v32 = vld [vmem:[#allocation19 + $0x1e0] sm:$0xff] }
 0x3e1   :  { %v1431_v44 = vpack.c.bf16 %v1429_v33, %v1429_v33  ;;  %v4454_v33 = vcombine.low %v1663_v20, %v1667_v21  ;;  %v4459_v40 = vcombine.high %v1669_v31, %v1673_v32  ;;  %v1717_v21 = vld [vmem:[#allocation19 + $0x340] sm:$0xff] }
 0x3e2   :  { %v1432_v43 = vpack.c.bf16 %v1430_v38, %v1430_v38  ;;  %v1679_v38 = vld [vmem:[#allocation19 + $0x210] sm:$0xff] }
 0x3e3   :  { %v4470_v50 = vcombine.low %v1679_v38, %v1683_v39 }
 0x3e4   :  { %1600 = vmatprep.mubr.bf16.mxu1 %v1432_v43  ;;  %v4462_v43 = vcombine.low %v1671_v28, %v1675_v29  ;;  %v1725_v29 = vld [vmem:[#allocation19 + $0x380] sm:$0xff] }
 0x3e5   :  { %1601 = vmatmul.mubr.bf16.vlgmr.msra.gmra.mrb[8].mxu1 %v1431_v44  ;;  %v4471_v44 = vcombine.high %v1679_v38, %v1683_v39  ;;  %v1733_v39 = vld [vmem:[#allocation19 + $0x3c0] sm:$0xff] }
 0x3e6   :  { %2424 = vmatpush1.bf16.msra.mxu1 %v4402_v11  ;;  %2455 = vmatprep.mubr.bf16.mxu1 %v6205_v13  ;;  %v1655_v11 = vld [vmem:[#allocation19 + $0x150] sm:$0xff] }
 0x3e7   :  { %2425 = vmatprep.subr.bf16.mxu1 %v4411_v45  ;;  %v4447_v18 = vcombine.high %v1655_v11, %v1659_v12  ;;  %v4446_v25 = vcombine.low %v1655_v11, %v1659_v12  ;;  %v4458_v45 = vcombine.low %v1669_v31, %v1673_v32  ;;  %v1709_v12 = vld [vmem:[#allocation19 + $0x300] sm:$0xff] }
 0x3e9   :  { %2515 = vmatprep.subr.bf16.mxu0 %v4447_v18  ;;  %v1719_v18 = vld [vmem:[#allocation19 + $0x350] sm:$0xff] }
 0x3ea   :  { %2426 = vmatpush1.bf16.msra.mxu1 %v4410_v59  ;;  %2516 = vmatpush1.bf16.msra.mxu0 %v4446_v25  ;;  %v1695_v59 = vld [vmem:[#allocation19 + $0x290] sm:$0xff] }
 0x3eb   :  { %2427 = vmatprep.subr.bf16.mxu1 %v4419_v63  ;;  %2517 = vmatprep.subr.bf16.mxu0 %v4455_v26  ;;  %v1697_v63 = vld [vmem:[#allocation19 + $0x2a0] sm:$0xff]  ;;  %v4487_v53 = vcombine.high %v1695_v59, %v1699_v60  ;;  %v4486_v56 = vcombine.low %v1695_v59, %v1699_v60  ;;  %v1727_v26 = vld [vmem:[#allocation19 + $0x390] sm:$0xff] }
 0x3ec   :  { %v4483_v4 = vcombine.high %v1693_v62, %v1697_v63  ;;  %v4482_v8 = vcombine.low %v1693_v62, %v1697_v63  ;;  %v1634_v62 = vld [vmem:[#allocation19 + $0xa8] sm:$0xff] }
 0x3ee   :  { %2428 = vmatpush1.bf16.msra.mxu1 %v4418_v3  ;;  %2518 = vmatpush1.bf16.msra.mxu0 %v4454_v33  ;;  %v1707_v3 = vld [vmem:[#allocation19 + $0x2f0] sm:$0xff] }
 0x3ef   :  { %2429 = vmatprep.subr.bf16.mxu1 %v4427_v6  ;;  %2519 = vmatprep.subr.bf16.mxu0 %v4463_v35  ;;  %v1705_v6 = vld [vmem:[#allocation19 + $0x2e0] sm:$0xff]  ;;  %v4495_v7 = vcombine.high %v1703_v2, %v1707_v3  ;;  %v4494_v15 = vcombine.low %v1703_v2, %v1707_v3  ;;  %v1735_v35 = vld [vmem:[#allocation19 + $0x3d0] sm:$0xff] }
 0x3f0   :  { %v4491_v11 = vcombine.high %v1701_v5, %v1705_v6  ;;  %v4490_v17 = vcombine.low %v1701_v5, %v1705_v6  ;;  %v1650_v5 = vld [vmem:[#allocation19 + $0x128] sm:$0xff] }
 0x3f2   :  { %2430 = vmatpush1.bf16.msra.mxu1 %v4426_v10  ;;  %2520 = vmatpush1.bf16.msra.mxu0 %v4462_v43  ;;  %v1715_v10 = vld [vmem:[#allocation19 + $0x330] sm:$0xff] }
 0x3f3   :  { %2431 = vmatprep.subr.bf16.mxu1 %v4435_v14  ;;  %2521 = vmatprep.subr.bf16.mxu0 %v4471_v44  ;;  %v1713_v14 = vld [vmem:[#allocation19 + $0x320] sm:$0xff]  ;;  %v4503_v16 = vcombine.high %v1711_v9, %v1715_v10  ;;  %v4502_v23 = vcombine.low %v1711_v9, %v1715_v10 }
 0x3f4   :  { %v4499_v20 = vcombine.high %v1709_v12, %v1713_v14  ;;  %v4498_v25 = vcombine.low %v1709_v12, %v1713_v14  ;;  %v1666_v12 = vld [vmem:[#allocation19 + $0x1a8] sm:$0xff] }
 0x3f6   :  { %2432 = vmatpush1.bf16.msra.mxu1 %v4434_v19  ;;  %2522 = vmatpush1.bf16.msra.mxu0 %v4470_v50  ;;  %v1723_v19 = vld [vmem:[#allocation19 + $0x370] sm:$0xff]  ;;  %v1622_v50 = vld [vmem:[#allocation19 + $0x48] sm:$0xff] }
 0x3f7   :  { %2433 = vmatprep.subr.bf16.mxu1 %v4443_v22  ;;  %2523 = vmatprep.subr.bf16.mxu0 %v4479_v57  ;;  %v1721_v22 = vld [vmem:[#allocation19 + $0x360] sm:$0xff]  ;;  %v4511_v24 = vcombine.high %v1719_v18, %v1723_v19  ;;  %v4510_v31 = vcombine.low %v1719_v18, %v1723_v19  ;;  %v1626_v57 = vld [vmem:[#allocation19 + $0x68] sm:$0xff] }
 0x3f8   :  { %v4507_v28 = vcombine.high %v1717_v21, %v1721_v22  ;;  %v4506_v33 = vcombine.low %v1717_v21, %v1721_v22  ;;  %v4413_v60 = vcombine.high %v1622_v50, %v1626_v57  ;;  %v4412_v63 = vcombine.low %v1622_v50, %v1626_v57  ;;  %v1682_v21 = vld [vmem:[#allocation19 + $0x228] sm:$0xff] }
 0x3f9   :  { %v5134_v50 = vld [vmem:[#allocation22 + $0x40] ss:$8 sps:$4 sm:$0xff]  }
 0x3fa   :  { %2434 = vmatpush1.bf16.msra.mxu1 %v4442_v27  ;;  %2524 = vmatpush1.bf16.msra.mxu0 %v4478_v0  ;;  %v1731_v27 = vld [vmem:[#allocation19 + $0x3b0] sm:$0xff]  ;;  %v1718_v57 = vld [vmem:[#allocation19 + $0x348] sm:$0xff] }
 0x3fb   :  { %2435 = vmatprep.subr.bf16.mxu1 %v4451_v30  ;;  %2525 = vmatprep.subr.bf16.mxu0 %v4487_v53  ;;  %v1729_v30 = vld [vmem:[#allocation19 + $0x3a0] sm:$0xff]  ;;  %v4519_v32 = vcombine.high %v1727_v26, %v1731_v27  ;;  %v4518_v41 = vcombine.low %v1727_v26, %v1731_v27  ;;  %v1638_v53 = vld [vmem:[#allocation19 + $0xc8] sm:$0xff] }
 0x3fc   :  { %v4515_v38 = vcombine.high %v1725_v29, %v1729_v30  ;;  %v4514_v43 = vcombine.low %v1725_v29, %v1729_v30  ;;  %v5122_v26 = vld [vmem:[#allocation22] ss:$8 sps:$4 sm:$0xff]   ;;  %v5124_v27 = vld [vmem:[#allocation22 + $0x4] ss:$8 sps:$4 sm:$0xff]  }
 0x3fe   :  { %2436 = vmatpush1.bf16.msra.mxu1 %v4450_v37  ;;  %2526 = vmatpush1.bf16.msra.mxu0 %v4486_v56  ;;  %v1739_v37 = vld [vmem:[#allocation19 + $0x3f0] sm:$0xff] }
 0x3ff   :  { %2437 = vmatprep.subr.bf16.mxu1 %v4459_v40  ;;  %2527 = vmatprep.subr.bf16.mxu0 %v4495_v7  ;;  %v1737_v40 = vld [vmem:[#allocation19 + $0x3e0] sm:$0xff]  ;;  %v4527_v42 = vcombine.high %v1735_v35, %v1739_v37  ;;  %v4526_v47 = vcombine.low %v1735_v35, %v1739_v37  ;;  %v1654_v7 = vld [vmem:[#allocation19 + $0x148] sm:$0xff] }
 0x400   :  { %v4523_v44 = vcombine.high %v1733_v39, %v1737_v40  ;;  %v5130_v35 = vld [vmem:[#allocation22 + $0x24] ss:$8 sps:$4 sm:$0xff]  }
 0x402   :  { %2438 = vmatpush1.bf16.msra.mxu1 %v4458_v45  ;;  %2528 = vmatpush1.bf16.msra.mxu0 %v4494_v15  ;;  %v1614_v45 = vld [vmem:[#allocation19 + $0x8] sm:$0xff] }
 0x403   :  { %2439 = vmatprep.subr.bf16.mxu1 %v4467_v52  ;;  %2529 = vmatprep.subr.bf16.mxu0 %v4503_v16  ;;  %v4522_v52 = vcombine.low %v1733_v39, %v1737_v40  ;;  %v4405_v55 = vcombine.high %v1614_v45, %v1618_v46  ;;  %v4404_v59 = vcombine.low %v1614_v45, %v1618_v46  ;;  %v1670_v16 = vld [vmem:[#allocation19 + $0x1c8] sm:$0xff]  ;;  %v5131_v45 = vld [vmem:[#allocation22 + $0x30] ss:$8 sps:$4 sm:$0xff]  }
 0x404   :  { %v5128_v39 = vld [vmem:[#allocation22 + $0x20] ss:$8 sps:$4 sm:$0xff]  }
 0x405   :  { %v1702_v40 = vld [vmem:[#allocation19 + $0x2c8] sm:$0xff] }
 0x406   :  { %2440 = vmatpush1.bf16.msra.mxu1 %v4466_v58  ;;  %2530 = vmatpush1.bf16.msra.mxu0 %v4502_v23  ;;  %v6216_v58 = vpack.c.bf16 %v1609_v54, %v1609_v54  ;;  %v1710_v46 = vld [vmem:[#allocation19 + $0x308] sm:$0xff] }
 0x407   :  { %2441 = vmatprep.subr.bf16.mxu1 %v4475_v61  ;;  %2531 = vmatprep.subr.bf16.mxu0 %v4511_v24  ;;  %v1630_v61 = vld [vmem:[#allocation19 + $0x88] sm:$0xff] }
 0x408   :  { %v4421_v0 = vcombine.high %v1630_v61, %v1634_v62  ;;  %v4420_v2 = vcombine.low %v1630_v61, %v1634_v62  ;;  %v1686_v24 = vld [vmem:[#allocation19 + $0x248] sm:$0xff] }
 0x40a   :  { %2442 = vmatpush1.bf16.msra.mxu1 %v4474_v1  ;;  %2532 = vmatpush1.bf16.msra.mxu0 %v4510_v31  ;;  %v1642_v1 = vld [vmem:[#allocation19 + $0xe8] sm:$0xff]  ;;  %v5125_v31 = vld [vmem:[#allocation22 + $0x10] ss:$8 sps:$4 sm:$0xff]  }
 0x40b   :  { %2443 = vmatprep.subr.bf16.mxu1 %v4483_v4  ;;  %2533 = vmatprep.subr.bf16.mxu0 %v4519_v32  ;;  %v4429_v3 = vcombine.high %v1638_v53, %v1642_v1  ;;  %v1646_v4 = vld [vmem:[#allocation19 + $0x108] sm:$0xff]  ;;  %v4428_v6 = vcombine.low %v1638_v53, %v1642_v1 }
 0x40c   :  { %v4437_v56 = vcombine.high %v1646_v4, %v1650_v5  ;;  %v4436_v9 = vcombine.low %v1646_v4, %v1650_v5  ;;  %v1694_v32 = vld [vmem:[#allocation19 + $0x288] sm:$0xff] }
 0x40d   :  { %v1730_v53 = vld [vmem:[#allocation19 + $0x3a8] sm:$0xff] }
 0x40e   :  { %2444 = vmatpush1.bf16.msra.mxu1 %v4482_v8  ;;  %2534 = vmatpush1.bf16.msra.mxu0 %v4518_v41  ;;  %v1658_v8 = vld [vmem:[#allocation19 + $0x168] sm:$0xff] }
 0x40f   :  { %2445 = vmatprep.subr.bf16.mxu1 %v4491_v11  ;;  %2535 = vmatprep.subr.bf16.mxu0 %v4527_v42  ;;  %v4445_v10 = vcombine.high %v1654_v7, %v1658_v8  ;;  %v1662_v11 = vld [vmem:[#allocation19 + $0x188] sm:$0xff]  ;;  %v4444_v14 = vcombine.low %v1654_v7, %v1658_v8  ;;  %v5133_v42 = vld [vmem:[#allocation22 + $0x34] ss:$8 sps:$4 sm:$0xff]  }
 0x410   :  { %v4453_v15 = vcombine.high %v1662_v11, %v1666_v12  ;;  %v4452_v18 = vcombine.low %v1662_v11, %v1666_v12  ;;  %v1706_v41 = vld [vmem:[#allocation19 + $0x2e8] sm:$0xff]  ;;  %v1620_v11 = vld [vmem:[#allocation19 + $0x38] sm:$0xff] }
 0x411   :  { %v4492_v54 = vcombine.low %v1702_v40, %v1706_v41  ;;  %v5142_v1 = vld [vmem:[#allocation22 + $0x64] ss:$8 sps:$4 sm:$0xff]   ;;  %v5140_v4 = vld [vmem:[#allocation22 + $0x60] ss:$8 sps:$4 sm:$0xff]  }
 0x412   :  { %2446 = vmatpush1.bf16.msra.mxu1 %v4490_v17  ;;  %2536 = vmatpush1.bf16.msra.mxu0 %v4526_v47  ;;  %v1674_v17 = vld [vmem:[#allocation19 + $0x1e8] sm:$0xff] }
 0x413   :  { %2447 = vmatprep.subr.bf16.mxu1 %v4499_v20  ;;  %v4461_v19 = vcombine.high %v1670_v16, %v1674_v17  ;;  %v1678_v20 = vld [vmem:[#allocation19 + $0x208] sm:$0xff]  ;;  %v4460_v22 = vcombine.low %v1670_v16, %v1674_v17  ;;  %3483 = vmatprep.subr.bf16.mxu0 %v5124_v27  ;;  %v1624_v17 = vld [vmem:[#allocation19 + $0x58] sm:$0xff] }
 0x414   :  { %v4469_v23 = vcombine.high %v1678_v20, %v1682_v21  ;;  %v4468_v29 = vcombine.low %v1678_v20, %v1682_v21  ;;  %v1714_v47 = vld [vmem:[#allocation19 + $0x328] sm:$0xff] }
 0x415   :  { %2538 = vmatmul.mubr.bf16.vlgmr.msra.gmra.mrb[4].mxu0 %v6216_v58  ;;  %v4500_v61 = vcombine.low %v1710_v46, %v1714_v47  ;;  %v1734_v5 = vld [vmem:[#allocation19 + $0x3c8] sm:$0xff] }
 0x416   :  { %2448 = vmatpush1.bf16.msra.mxu1 %v4498_v25  ;;  %v1690_v25 = vld [vmem:[#allocation19 + $0x268] sm:$0xff]  ;;  %3484 = vmatpush1.bf16.msra.mxu0 %v5122_v26 }
 0x417   :  { %2449 = vmatprep.subr.bf16.mxu1 %v4507_v28  ;;  %v5127_v28 = vld [vmem:[#allocation22 + $0x14] ss:$8 sps:$4 sm:$0xff]   ;;  %v4477_v30 = vcombine.high %v1686_v24, %v1690_v25  ;;  %v4476_v37 = vcombine.low %v1686_v24, %v1690_v25  ;;  %v5148_v12 = vld [vmem:[#allocation22 + $0x84] ss:$8 sps:$4 sm:$0xff]   ;;  %v5146_v16 = vld [vmem:[#allocation22 + $0x80] ss:$8 sps:$4 sm:$0xff]  }
 0x418   :  { %3485 = vmatprep.subr.bf16.mxu0 %v5127_v28  ;;  %v1636_v24 = vld [vmem:[#allocation19 + $0xb8] sm:$0xff]  ;;  %v5154_v25 = vld [vmem:[#allocation22 + $0xa4] ss:$8 sps:$4 sm:$0xff]   ;;  %v5152_v28 = vld [vmem:[#allocation22 + $0xa0] ss:$8 sps:$4 sm:$0xff]  }
 0x41a   :  { %2450 = vmatpush1.bf16.msra.mxu1 %v4506_v33  ;;  %v1698_v33 = vld [vmem:[#allocation19 + $0x2a8] sm:$0xff]  ;;  %3486 = vmatpush1.bf16.msra.mxu0 %v5125_v31  ;;  %v5157_v31 = vld [vmem:[#allocation22 + $0xb4] ss:$8 sps:$4 sm:$0xff]  }
 0x41b   :  { %2451 = vmatprep.subr.bf16.mxu1 %v4515_v38  ;;  %v4485_v38 = vcombine.high %v1694_v32, %v1698_v33  ;;  %3487 = vmatprep.subr.bf16.mxu0 %v5130_v35  ;;  %v5155_v35 = vld [vmem:[#allocation22 + $0xb0] ss:$8 sps:$4 sm:$0xff]  }
 0x41e   :  { %2452 = vmatpush1.bf16.msra.mxu1 %v4514_v43  ;;  %v4484_v43 = vcombine.low %v1694_v32, %v1698_v33  ;;  %3488 = vmatpush1.bf16.msra.mxu0 %v5128_v39  ;;  %v5160_v39 = vld [vmem:[#allocation22 + $0xc4] ss:$8 sps:$4 sm:$0xff]  }
 0x41f   :  { %2453 = vmatprep.subr.bf16.mxu1 %v4523_v44  ;;  %v4493_v44 = vcombine.high %v1702_v40, %v1706_v41  ;;  %3489 = vmatprep.subr.bf16.mxu0 %v5133_v42  ;;  %v5158_v41 = vld [vmem:[#allocation22 + $0xc0] ss:$8 sps:$4 sm:$0xff]   ;;  %v1656_v42 = vld [vmem:[#allocation19 + $0x158] sm:$0xff] }
 0x422   :  { %2454 = vmatpush1.bf16.msra.mxu1 %v4522_v52  ;;  %v5136_v52 = vld [vmem:[#allocation22 + $0x44] ss:$8 sps:$4 sm:$0xff]   ;;  %3490 = vmatpush1.bf16.msra.mxu0 %v5131_v45 }
 0x423   :  { %2464 = vmatprep.subr.bf16.mxu1 %v4405_v55  ;;  %v4501_v55 = vcombine.high %v1710_v46, %v1714_v47  ;;  %3491 = vmatprep.subr.bf16.mxu0 %v5136_v52  ;;  %v1664_v46 = vld [vmem:[#allocation19 + $0x198] sm:$0xff] }
 0x424   :  { %v1668_v47 = vld [vmem:[#allocation19 + $0x1b8] sm:$0xff] }
 0x425   :  { %2456 = vmatmul.mubr.bf16.vlgmr.msra.gmra.mrb[12].mxu1 %v6216_v58 }
 0x426   :  { %2465 = vmatpush1.bf16.msra.mxu1 %v4404_v59  ;;  %2496 = vmatprep.mubr.bf16.mxu1 %v6205_v13  ;;  %v1722_v59 = vld [vmem:[#allocation19 + $0x368] sm:$0xff] }
 0x427   :  { %2466 = vmatprep.subr.bf16.mxu1 %v4413_v60  ;;  %v5139_v60 = vld [vmem:[#allocation22 + $0x54] ss:$8 sps:$4 sm:$0xff]   ;;  %v4509_v62 = vcombine.high %v1718_v57, %v1722_v59  ;;  %3492 = vmatpush1.bf16.msra.mxu0 %v5134_v50  ;;  %v5161_v50 = vld [vmem:[#allocation22 + $0xd0] ss:$8 sps:$4 sm:$0xff]  }
 0x428   :  { %3493 = vmatprep.subr.bf16.mxu0 %v5139_v60  ;;  %v4456_v60 = vcombine.low %v1664_v46, %v1668_v47 }
 0x42a   :  { %2467 = vmatpush1.bf16.msra.mxu1 %v4412_v63  ;;  %v5137_v63 = vld [vmem:[#allocation22 + $0x50] ss:$8 sps:$4 sm:$0xff]  }
 0x42b   :  { %2468 = vmatprep.subr.bf16.mxu1 %v4421_v0  ;;  %v1726_v0 = vld [vmem:[#allocation19 + $0x388] sm:$0xff]  ;;  %3494 = vmatpush1.bf16.msra.mxu0 %v5137_v63 }
 0x42c   :  { %3495 = vmatprep.subr.bf16.mxu0 %v5142_v1  ;;  %v4516_v7 = vcombine.low %v1726_v0, %v1730_v53  ;;  %v5164_v63 = vld [vmem:[#allocation22 + $0xe0] ss:$8 sps:$4 sm:$0xff]  }
 0x42e   :  { %2469 = vmatpush1.bf16.msra.mxu1 %v4420_v2  ;;  %v4508_v2 = vcombine.low %v1718_v57, %v1722_v59  ;;  %v1672_v57 = vld [vmem:[#allocation19 + $0x1d8] sm:$0xff] }
 0x42f   :  { %2470 = vmatprep.subr.bf16.mxu1 %v4429_v3  ;;  %v4517_v3 = vcombine.high %v1726_v0, %v1730_v53  ;;  %3496 = vmatpush1.bf16.msra.mxu0 %v5140_v4  ;;  %v1676_v59 = vld [vmem:[#allocation19 + $0x1f8] sm:$0xff] }
 0x430   :  { %v1680_v0 = vld [vmem:[#allocation19 + $0x218] sm:$0xff]  ;;  %v4464_v1 = vcombine.low %v1672_v57, %v1676_v59 }
 0x431   :  { %v1684_v53 = vld [vmem:[#allocation19 + $0x238] sm:$0xff] }
 0x432   :  { %2471 = vmatpush1.bf16.msra.mxu1 %v4428_v6  ;;  %v1738_v6 = vld [vmem:[#allocation19 + $0x3e8] sm:$0xff]  ;;  %v5167_v4 = vld [vmem:[#allocation22 + $0xf0] ss:$8 sps:$4 sm:$0xff]  }
 0x433   :  { %2472 = vmatprep.subr.bf16.mxu1 %v4437_v56  ;;  %v5145_v56 = vld [vmem:[#allocation22 + $0x74] ss:$8 sps:$4 sm:$0xff]   ;;  %v4525_v8 = vcombine.high %v1734_v5, %v1738_v6 }
 0x434   :  { %3497 = vmatprep.subr.bf16.mxu0 %v5145_v56  ;;  %v4472_v56 = vcombine.low %v1680_v0, %v1684_v53 }
 0x436   :  { %2473 = vmatpush1.bf16.msra.mxu1 %v4436_v9  ;;  %v5143_v9 = vld [vmem:[#allocation22 + $0x70] ss:$8 sps:$4 sm:$0xff]  }
 0x437   :  { %2474 = vmatprep.subr.bf16.mxu1 %v4445_v10  ;;  %v1616_v10 = vld [vmem:[#allocation19 + $0x18] sm:$0xff]  ;;  %3498 = vmatpush1.bf16.msra.mxu0 %v5143_v9 }
 0x438   :  { %3499 = vmatprep.subr.bf16.mxu0 %v5148_v12  ;;  %v4408_v20 = vcombine.low %v1616_v10, %v1620_v11  ;;  %v1696_v9 = vld [vmem:[#allocation19 + $0x298] sm:$0xff] }
 0x43a   :  { %2475 = vmatpush1.bf16.msra.mxu1 %v4444_v14  ;;  %v4524_v14 = vcombine.low %v1734_v5, %v1738_v6  ;;  %v1688_v5 = vld [vmem:[#allocation19 + $0x258] sm:$0xff] }
 0x43b   :  { %2476 = vmatprep.subr.bf16.mxu1 %v4453_v15  ;;  %v4409_v15 = vcombine.high %v1616_v10, %v1620_v11  ;;  %3500 = vmatpush1.bf16.msra.mxu0 %v5146_v16  ;;  %v1692_v6 = vld [vmem:[#allocation19 + $0x278] sm:$0xff] }
 0x43c   :  { %v1700_v10 = vld [vmem:[#allocation19 + $0x2b8] sm:$0xff]  ;;  %v4480_v11 = vcombine.low %v1688_v5, %v1692_v6 }
 0x43d   :  { %v4489_v12 = vcombine.high %v1696_v9, %v1700_v10  ;;  %v4488_v16 = vcombine.low %v1696_v9, %v1700_v10  ;;  %v5173_v9 = vld [vmem:[#allocation22 + $0x110] ss:$8 sps:$4 sm:$0xff]   ;;  %v5178_v10 = vld [vmem:[#allocation22 + $0x124] ss:$8 sps:$4 sm:$0xff]  }
 0x43e   :  { %2477 = vmatpush1.bf16.msra.mxu1 %v4452_v18  ;;  %v1628_v18 = vld [vmem:[#allocation19 + $0x78] sm:$0xff] }
 0x43f   :  { %2478 = vmatprep.subr.bf16.mxu1 %v4461_v19  ;;  %v5151_v19 = vld [vmem:[#allocation22 + $0x94] ss:$8 sps:$4 sm:$0xff]   ;;  %v4417_v21 = vcombine.high %v1624_v17, %v1628_v18  ;;  %v4416_v26 = vcombine.low %v1624_v17, %v1628_v18 }
 0x440   :  { %3501 = vmatprep.subr.bf16.mxu0 %v5151_v19  ;;  %v1712_v18 = vld [vmem:[#allocation19 + $0x318] sm:$0xff] }
 0x441   :  { %v1716_v19 = vld [vmem:[#allocation19 + $0x338] sm:$0xff] }
 0x442   :  { %2479 = vmatpush1.bf16.msra.mxu1 %v4460_v22  ;;  %v5149_v22 = vld [vmem:[#allocation22 + $0x90] ss:$8 sps:$4 sm:$0xff]  }
 0x443   :  { %2480 = vmatprep.subr.bf16.mxu1 %v4469_v23  ;;  %v1632_v23 = vld [vmem:[#allocation19 + $0x98] sm:$0xff]  ;;  %3502 = vmatpush1.bf16.msra.mxu0 %v5149_v22 }
 0x444   :  { %v4425_v27 = vcombine.high %v1632_v23, %v1636_v24  ;;  %3503 = vmatprep.subr.bf16.mxu0 %v5154_v25  ;;  %v4424_v32 = vcombine.low %v1632_v23, %v1636_v24  ;;  %v1720_v22 = vld [vmem:[#allocation19 + $0x358] sm:$0xff]  ;;  %v4504_v24 = vcombine.low %v1712_v18, %v1716_v19 }
 0x445   :  { %v1724_v23 = vld [vmem:[#allocation19 + $0x378] sm:$0xff] }
 0x446   :  { %2481 = vmatpush1.bf16.msra.mxu1 %v4468_v29  ;;  %v1640_v29 = vld [vmem:[#allocation19 + $0xd8] sm:$0xff]  ;;  %v4513_v25 = vcombine.high %v1720_v22, %v1724_v23 }
 0x447   :  { %2482 = vmatprep.subr.bf16.mxu1 %v4477_v30  ;;  %v1644_v30 = vld [vmem:[#allocation19 + $0xf8] sm:$0xff]  ;;  %3504 = vmatpush1.bf16.msra.mxu0 %v5152_v28  ;;  %v4512_v28 = vcombine.low %v1720_v22, %v1724_v23  ;;  %v5196_v23 = vld [vmem:[#allocation22 + $0x184] ss:$8 sps:$4 sm:$0xff]  }
 0x448   :  { %v4433_v33 = vcombine.high %v1640_v29, %v1644_v30  ;;  %3505 = vmatprep.subr.bf16.mxu0 %v5157_v31  ;;  %v1740_v31 = vld [vmem:[#allocation19 + $0x3f8] sm:$0xff] }
 0x449   :  { %v5191_v22 = vld [vmem:[#allocation22 + $0x170] ss:$8 sps:$4 sm:$0xff]  }
 0x44a   :  { %2483 = vmatpush1.bf16.msra.mxu1 %v4476_v37  ;;  %v1648_v37 = vld [vmem:[#allocation19 + $0x118] sm:$0xff] }
 0x44b   :  { %2484 = vmatprep.subr.bf16.mxu1 %v4485_v38  ;;  %v1652_v38 = vld [vmem:[#allocation19 + $0x138] sm:$0xff]  ;;  %3506 = vmatpush1.bf16.msra.mxu0 %v5155_v35 }
 0x44c   :  { %v4441_v40 = vcombine.high %v1648_v37, %v1652_v38  ;;  %3507 = vmatprep.subr.bf16.mxu0 %v5160_v39 }
 0x44e   :  { %2485 = vmatpush1.bf16.msra.mxu1 %v4484_v43  ;;  %v1660_v43 = vld [vmem:[#allocation19 + $0x178] sm:$0xff] }
 0x44f   :  { %2486 = vmatprep.subr.bf16.mxu1 %v4493_v44  ;;  %v4440_v44 = vcombine.low %v1648_v37, %v1652_v38  ;;  %v4449_v45 = vcombine.high %v1656_v42, %v1660_v43  ;;  %3508 = vmatpush1.bf16.msra.mxu0 %v5158_v41  ;;  %v4448_v52 = vcombine.low %v1656_v42, %v1660_v43  ;;  %v6227_v41 = vld [vmem:[%s6362_s15] sm:$0xff] }
 0x450   :  { %v1746_v42 = vrot.slane %v6227_v41, %v6164_v49  ;;  %v6232_v43 = vld [vmem:[%s6363_s8] sm:$0xff] }
 0x452   :  { %2487 = vmatpush1.bf16.msra.mxu1 %v4492_v54  ;;  %v5163_v54 = vld [vmem:[#allocation22 + $0xd4] ss:$8 sps:$4 sm:$0xff]  }
 0x453   :  { %2488 = vmatprep.subr.bf16.mxu1 %v4501_v55  ;;  %v4457_v55 = vcombine.high %v1664_v46, %v1668_v47  ;;  %3509 = vmatprep.subr.bf16.mxu0 %v5163_v54  ;;  %v6240_v47 = vld [vmem:[#allocation20] sm:$0xff] }
 0x454   :  { %3510 = vmatpush1.bf16.msra.mxu0 %v5161_v50 }
 0x456   :  { %2489 = vmatpush1.bf16.msra.mxu1 %v4500_v61  ;;  %v5166_v61 = vld [vmem:[#allocation22 + $0xe4] ss:$8 sps:$4 sm:$0xff]  }
 0x457   :  { %2490 = vmatprep.subr.bf16.mxu1 %v4509_v62  ;;  %v4465_v62 = vcombine.high %v1672_v57, %v1676_v59  ;;  %3511 = vmatprep.subr.bf16.mxu0 %v5166_v61 }
 0x458   :  { %3512 = vmatpush1.bf16.msra.mxu0 %v5164_v63  ;;  %v2650_v63 = vrot.slane %v6240_v47, %v6164_v49 }
 0x45a   :  { %2491 = vmatpush1.bf16.msra.mxu1 %v4508_v2  ;;  %v5169_v2 = vld [vmem:[#allocation22 + $0xf4] ss:$8 sps:$4 sm:$0xff]  }
 0x45b   :  { %2492 = vmatprep.subr.bf16.mxu1 %v4517_v3  ;;  %v4473_v3 = vcombine.high %v1680_v0, %v1684_v53  ;;  %3513 = vmatprep.subr.bf16.mxu0 %v5169_v2 }
 0x45c   :  { %3514 = vmatpush1.bf16.msra.mxu0 %v5167_v4 }
 0x45e   :  { %2493 = vmatpush1.bf16.msra.mxu1 %v4516_v7  ;;  %v5172_v7 = vld [vmem:[#allocation22 + $0x104] ss:$8 sps:$4 sm:$0xff]  }
 0x45f   :  { %2494 = vmatprep.subr.bf16.mxu1 %v4525_v8  ;;  %v4481_v8 = vcombine.high %v1688_v5, %v1692_v6  ;;  %3524 = vmatprep.subr.bf16.mxu0 %v5172_v7 }
 0x462   :  { %2495 = vmatpush1.bf16.msra.mxu1 %v4524_v14  ;;  %v1704_v14 = vld [vmem:[#allocation19 + $0x2d8] sm:$0xff] }
 0x463   :  { %2546 = vmatprep.subr.bf16.mxu1 %v4409_v15  ;;  %v1708_v15 = vld [vmem:[#allocation19 + $0x2f8] sm:$0xff] }
 0x464   :  { %v4497_v17 = vcombine.high %v1704_v14, %v1708_v15 }
 0x465   :  { %2497 = vmatmul.mubr.bf16.vlgmr.msra.gmra.mrb[16].mxu1 %v6216_v58 }
 0x466   :  { %2547 = vmatpush1.bf16.msra.mxu1 %v4408_v20  ;;  %2578 = vmatprep.mubr.bf16.mxu1 %v6205_v13  ;;  %v4432_v13 = vcombine.low %v1640_v29, %v1644_v30  ;;  %v4496_v20 = vcombine.low %v1704_v14, %v1708_v15  ;;  %v1736_v30 = vld [vmem:[#allocation19 + $0x3d8] sm:$0xff]  ;;  %v5184_v15 = vld [vmem:[#allocation22 + $0x144] ss:$8 sps:$4 sm:$0xff]  }
 0x467   :  { %2548 = vmatprep.subr.bf16.mxu1 %v4417_v21  ;;  %v4505_v21 = vcombine.high %v1712_v18, %v1716_v19  ;;  %v4528_v35 = vcombine.low %v1736_v30, %v1740_v31  ;;  %v5179_v14 = vld [vmem:[#allocation22 + $0x130] ss:$8 sps:$4 sm:$0xff]   ;;  %v5190_v19 = vld [vmem:[#allocation22 + $0x164] ss:$8 sps:$4 sm:$0xff]  }
 0x468   :  { %v5185_v18 = vld [vmem:[#allocation22 + $0x150] ss:$8 sps:$4 sm:$0xff]  }
 0x46a   :  { %2549 = vmatpush1.bf16.msra.mxu1 %v4416_v26  ;;  %v1728_v26 = vld [vmem:[#allocation19 + $0x398] sm:$0xff] }
 0x46b   :  { %2550 = vmatprep.subr.bf16.mxu1 %v4425_v27  ;;  %v1732_v27 = vld [vmem:[#allocation19 + $0x3b8] sm:$0xff] }
 0x46c   :  { %v4521_v29 = vcombine.high %v1728_v26, %v1732_v27 }
 0x46e   :  { %2551 = vmatpush1.bf16.msra.mxu1 %v4424_v32  ;;  %v4520_v32 = vcombine.low %v1728_v26, %v1732_v27  ;;  %v5197_v26 = vld [vmem:[#allocation22 + $0x190] ss:$8 sps:$4 sm:$0xff]   ;;  %v5202_v27 = vld [vmem:[#allocation22 + $0x1a4] ss:$8 sps:$4 sm:$0xff]  }
 0x46f   :  { %2552 = vmatprep.subr.bf16.mxu1 %v4433_v33  ;;  %v4529_v33 = vcombine.high %v1736_v30, %v1740_v31  ;;  %v5205_v30 = vld [vmem:[#allocation22 + $0x1b4] ss:$8 sps:$4 sm:$0xff]   ;;  %v5203_v31 = vld [vmem:[#allocation22 + $0x1b0] ss:$8 sps:$4 sm:$0xff]  }
 0x472   :  { %2553 = vmatpush1.bf16.msra.mxu1 %v4432_v13 }
 0x473   :  { %2554 = vmatprep.subr.bf16.mxu1 %v4441_v40 }
 0x476   :  { %2555 = vmatpush1.bf16.msra.mxu1 %v4440_v44  ;;  %v1750_v44 = vrot.slane %v6227_v41, %v6169_v51 }
 0x477   :  { %2556 = vmatprep.subr.bf16.mxu1 %v4449_v45 }
 0x47a   :  { %2557 = vmatpush1.bf16.msra.mxu1 %v4448_v52 }
 0x47b   :  { %2558 = vmatprep.subr.bf16.mxu1 %v4457_v55  ;;  %v2600_v55 = vrot.slane %v6232_v43, %v6164_v49 }
 0x47e   :  { %2559 = vmatpush1.bf16.msra.mxu1 %v4456_v60  ;;  %v2604_v60 = vrot.slane %v6232_v43, %v6169_v51 }
 0x47f   :  { %2560 = vmatprep.subr.bf16.mxu1 %v4465_v62 }
 0x482   :  { %2561 = vmatpush1.bf16.msra.mxu1 %v4464_v1  ;;  %v2654_v1 = vrot.slane %v6240_v47, %v6169_v51 }
 0x483   :  { %2562 = vmatprep.subr.bf16.mxu1 %v4473_v3 }
 0x486   :  { %2563 = vmatpush1.bf16.msra.mxu1 %v4472_v56  ;;  %v5170_v56 = vld [vmem:[#allocation22 + $0x100] ss:$8 sps:$4 sm:$0xff]  }
 0x487   :  { %2564 = vmatprep.subr.bf16.mxu1 %v4481_v8  ;;  %v5175_v8 = vld [vmem:[#allocation22 + $0x114] ss:$8 sps:$4 sm:$0xff]  }
 0x48a   :  { %2565 = vmatpush1.bf16.msra.mxu1 %v4480_v11  ;;  %v5176_v11 = vld [vmem:[#allocation22 + $0x120] ss:$8 sps:$4 sm:$0xff]  }
 0x48b   :  { %2566 = vmatprep.subr.bf16.mxu1 %v4489_v12  ;;  %v5181_v12 = vld [vmem:[#allocation22 + $0x134] ss:$8 sps:$4 sm:$0xff]  }
 0x48e   :  { %2567 = vmatpush1.bf16.msra.mxu1 %v4488_v16  ;;  %v5182_v16 = vld [vmem:[#allocation22 + $0x140] ss:$8 sps:$4 sm:$0xff]  }
 0x48f   :  { %2568 = vmatprep.subr.bf16.mxu1 %v4497_v17  ;;  %v5187_v17 = vld [vmem:[#allocation22 + $0x154] ss:$8 sps:$4 sm:$0xff]  }
 0x492   :  { %2569 = vmatpush1.bf16.msra.mxu1 %v4496_v20  ;;  %v5188_v20 = vld [vmem:[#allocation22 + $0x160] ss:$8 sps:$4 sm:$0xff]  }
 0x493   :  { %2570 = vmatprep.subr.bf16.mxu1 %v4505_v21  ;;  %v5193_v21 = vld [vmem:[#allocation22 + $0x174] ss:$8 sps:$4 sm:$0xff]  }
 0x496   :  { %2571 = vmatpush1.bf16.msra.mxu1 %v4504_v24  ;;  %v5194_v24 = vld [vmem:[#allocation22 + $0x180] ss:$8 sps:$4 sm:$0xff]  }
 0x497   :  { %2572 = vmatprep.subr.bf16.mxu1 %v4513_v25  ;;  %v5199_v25 = vld [vmem:[#allocation22 + $0x194] ss:$8 sps:$4 sm:$0xff]  }
 0x49a   :  { %2573 = vmatpush1.bf16.msra.mxu1 %v4512_v28  ;;  %v5200_v28 = vld [vmem:[#allocation22 + $0x1a0] ss:$8 sps:$4 sm:$0xff]  }
 0x49b   :  { %2574 = vmatprep.subr.bf16.mxu1 %v4521_v29  ;;  %v1765_v29 = vsub.s32 5, %v6161_v48 }
 0x49e   :  { %2575 = vmatpush1.bf16.msra.mxu1 %v4520_v32  ;;  %v1766_v32 = vrot.slane %v6227_v41, %v1765_v29 }
 0x49f   :  { %2576 = vmatprep.subr.bf16.mxu1 %v4529_v33  ;;  %v5208_v33 = vld [vmem:[#allocation22 + $0x1c4] ss:$8 sps:$4 sm:$0xff]  }
 0x4a2   :  { %2577 = vmatpush1.bf16.msra.mxu1 %v4528_v35  ;;  %v5206_v35 = vld [vmem:[#allocation22 + $0x1c0] ss:$8 sps:$4 sm:$0xff]  }
 0x4a5   :  { %2579 = vmatmul.mubr.bf16.vlgmr.msra.gmra.mrb[20].mxu1 %v6216_v58 }
 0x4b8   :  { %v4719_v37 = vpop.f32.mrb[8].mxu1 }
 0x4b9   :  { %v4720_v38 = vpop.f32.mrb[9].mxu1 }
 0x4ba   :  { %v6224_v39 = vadd.f32 %v4720_v38, %v4719_v37  ;;  %v4722_v13 = vpop.f32.mrb[10].mxu1  ;;  %v5211_v38 = vld [vmem:[#allocation22 + $0x1d4] ss:$8 sps:$4 sm:$0xff]  }
 0x4bb   :  { %v4723_v40 = vpop.f32.mrb[11].mxu1  ;;  %v1754_v13 = vrot.slane %v6227_v41, %v6188_v34 }
 0x4bc   :  { %v5209_v40 = vld [vmem:[#allocation22 + $0x1d0] ss:$8 sps:$4 sm:$0xff]  }
 0x4e8   :  { %v6236_v45 = vpop.f32.mrb[4].mxu0 }
 0x4e9   :  { %v6238_v46 = vpop.f32.mrb[5].mxu0 }
 0x4ea   :  { %v2543_v52 = vpop.f32.mrb[6].mxu0  ;;  %v2542_v37 = vadd.f32 %v6238_v46, %v1766_v32  ;;  %v2608_v46 = vrot.slane %v6232_v43, %v6188_v34  ;;  %v5323_v32 = vld [vmem:[#allocation28 + $0x20] sm:$0xff]  }
 0x4eb   :  { %v2544_v57 = vpop.f32.mrb[7].mxu0  ;;  %v5214_v52 = vld [vmem:[#allocation22 + $0x1e4] ss:$8 sps:$4 sm:$0xff]  }
 0x4f8   :  { %v2457_v58 = vpop.f32.mrb[12].mxu1 }
 0x4f9   :  { %v2458_v54 = vadd.f32 %v2457_v58, %v1746_v42  ;;  %v2459_v50 = vpop.f32.mrb[13].mxu1  ;;  %v1758_v42 = vrot.slane %v6227_v41, %v6191_v36  ;;  %v2620_v58 = vrot.slane %v6232_v43, %v1765_v29 }
 0x4fa   :  { %v2460_v59 = vadd.f32 %v2459_v50, %v1750_v44  ;;  %v2461_v61 = vpop.f32.mrb[14].mxu1  ;;  %v2592_v44 = vmax.f32 %v2542_v37, 0.0  ;;  %v5236_v37 = vld [vmem:[#allocation22 + $0x260] ss:$8 sps:$4 sm:$0xff]  }
 0x4fb   :  { %v2587_v62 = vmax.f32 %v2458_v54, 0.0  ;;  %v2462_v0 = vpop.f32.mrb[15].mxu1  ;;  %v5212_v61 = vld [vmem:[#allocation22 + $0x1e0] ss:$8 sps:$4 sm:$0xff]  }
 0x4fc   :  { %v2588_v53 = vmax.f32 %v2460_v59, 0.0  ;;  %v2612_v59 = vrot.slane %v6232_v43, %v6191_v36 }
 0x4fd   :  { %v2637_v2 = vmul.f32 %v2600_v55, %v2587_v62  ;;  %v2642_v62 = vmul.f32 %v2620_v58, %v2592_v44  ;;  %v5247_v44 = vld [vmem:[#allocation22 + $0x294] ss:$8 sps:$4 sm:$0xff]   ;;  %v5245_v58 = vld [vmem:[#allocation22 + $0x290] ss:$8 sps:$4 sm:$0xff]  }
 0x4fe   :  { %v2638_v3 = vmul.f32 %v2604_v60, %v2588_v53  ;;  %v2658_v53 = vrot.slane %v6240_v47, %v6188_v34 }
 0x4ff   :  { %v2687_v4 = vadd.f32 %v2650_v63, %v2637_v2  ;;  %v2670_v63 = vrot.slane %v6240_v47, %v1765_v29  ;;  %v5217_v2 = vld [vmem:[#allocation22 + $0x1f4] ss:$8 sps:$4 sm:$0xff]   ;;  %v5322_v29 = vld [vmem:[#allocation28 + $0x60] sm:$0xff]  }
 0x500   :  { %v2688_v5 = vadd.f32 %v2654_v1, %v2638_v3 }
 0x501   :  { %v2695_v7 = vpack.c.bf16 %v2687_v4, %v2687_v4  ;;  %v2662_v4 = vrot.slane %v6240_v47, %v6191_v36  ;;  %v5315_v36 = vld [vmem:[#allocation28] sm:$0xff]  }
 0x502   :  { %v2696_v6 = vpack.c.bf16 %v2688_v5, %v2688_v5 }
 0x504   :  { %3515 = vmatprep.mubr.bf16.mxu0 %v2696_v6 }
 0x505   :  { %3516 = vmatmul.mubr.bf16.vlgmr.msra.gmra.mrb[8].mxu0 %v2695_v7  ;;  %v2692_v7 = vadd.f32 %v2670_v63, %v2642_v62  ;;  %v1773_v62 = vsub.s32 7, %v6161_v48  ;;  %v5259_v63 = vld [vmem:[#allocation22 + $0x2d4] ss:$8 sps:$4 sm:$0xff]  }
 0x506   :  { %3525 = vmatpush1.bf16.msra.mxu0 %v5170_v56  ;;  %v5215_v56 = vld [vmem:[#allocation22 + $0x1f0] ss:$8 sps:$4 sm:$0xff]  }
 0x507   :  { %3526 = vmatprep.subr.bf16.mxu0 %v5175_v8  ;;  %v2700_v34 = vpack.c.bf16 %v2692_v7, %v2692_v7 }
 0x50a   :  { %3527 = vmatpush1.bf16.msra.mxu0 %v5173_v9  ;;  %v5220_v9 = vld [vmem:[#allocation22 + $0x204] ss:$8 sps:$4 sm:$0xff]  }
 0x50b   :  { %3528 = vmatprep.subr.bf16.mxu0 %v5178_v10 }
 0x50e   :  { %3529 = vmatpush1.bf16.msra.mxu0 %v5176_v11 }
 0x50f   :  { %3530 = vmatprep.subr.bf16.mxu0 %v5181_v12  ;;  %v5218_v12 = vld [vmem:[#allocation22 + $0x200] ss:$8 sps:$4 sm:$0xff]  }
 0x512   :  { %3531 = vmatpush1.bf16.msra.mxu0 %v5179_v14 }
 0x513   :  { %3532 = vmatprep.subr.bf16.mxu0 %v5184_v15  ;;  %v5223_v15 = vld [vmem:[#allocation22 + $0x214] ss:$8 sps:$4 sm:$0xff]  }
 0x516   :  { %3533 = vmatpush1.bf16.msra.mxu0 %v5182_v16  ;;  %v5314_v16 = vld [vmem:[#allocation28 + $0x40] sm:$0xff]  }
 0x517   :  { %3534 = vmatprep.subr.bf16.mxu0 %v5187_v17  ;;  %v5316_v17 = vld [vmem:[#allocation28 + $0x48] sm:$0xff]   ;;  %4725 = vmatprep.subr.bf16.mxu1 %v5314_v16 }
 0x518   :  { %4726 = vmatpush3.bf16.msra.mxu1 %v5315_v36  ;;  %v5268_v36 = vld [vmem:[#allocation22 + $0x304] ss:$8 sps:$4 sm:$0xff]  }
 0x519   :  { %4727 = vmatprep.subr.bf16.mxu1 %v5316_v17 }
 0x51a   :  { %3535 = vmatpush1.bf16.msra.mxu0 %v5185_v18  ;;  %v5221_v18 = vld [vmem:[#allocation22 + $0x210] ss:$8 sps:$4 sm:$0xff]  }
 0x51b   :  { %3536 = vmatprep.subr.bf16.mxu0 %v5190_v19  ;;  %v5226_v19 = vld [vmem:[#allocation22 + $0x224] ss:$8 sps:$4 sm:$0xff]  }
 0x51e   :  { %3537 = vmatpush1.bf16.msra.mxu0 %v5188_v20  ;;  %v5317_v20 = vld [vmem:[#allocation28 + $0x8] sm:$0xff]  }
 0x51f   :  { %3538 = vmatprep.subr.bf16.mxu0 %v5193_v21  ;;  %v5318_v21 = vld [vmem:[#allocation28 + $0x50] sm:$0xff]   ;;  %4728 = vmatpush3.bf16.msra.mxu1 %v5317_v20 }
 0x520   :  { %4729 = vmatprep.subr.bf16.mxu1 %v5318_v21  ;;  %v5271_v21 = vld [vmem:[#allocation22 + $0x314] ss:$8 sps:$4 sm:$0xff]  }
 0x522   :  { %3539 = vmatpush1.bf16.msra.mxu0 %v5191_v22  ;;  %v5224_v22 = vld [vmem:[#allocation22 + $0x220] ss:$8 sps:$4 sm:$0xff]  }
 0x523   :  { %3540 = vmatprep.subr.bf16.mxu0 %v5196_v23  ;;  %v5229_v23 = vld [vmem:[#allocation22 + $0x234] ss:$8 sps:$4 sm:$0xff]  }
 0x526   :  { %3541 = vmatpush1.bf16.msra.mxu0 %v5194_v24  ;;  %v5319_v24 = vld [vmem:[#allocation28 + $0x10] sm:$0xff]  }
 0x527   :  { %3542 = vmatprep.subr.bf16.mxu0 %v5199_v25  ;;  %v5320_v25 = vld [vmem:[#allocation28 + $0x58] sm:$0xff]   ;;  %4730 = vmatpush3.bf16.msra.mxu1 %v5319_v24 }
 0x528   :  { %4731 = vmatprep.subr.bf16.mxu1 %v5320_v25  ;;  %v5272_v24 = vld [vmem:[#allocation22 + $0x320] ss:$8 sps:$4 sm:$0xff]   ;;  %v5277_v25 = vld [vmem:[#allocation22 + $0x334] ss:$8 sps:$4 sm:$0xff]  }
 0x52a   :  { %3543 = vmatpush1.bf16.msra.mxu0 %v5197_v26  ;;  %v5227_v26 = vld [vmem:[#allocation22 + $0x230] ss:$8 sps:$4 sm:$0xff]  }
 0x52b   :  { %3544 = vmatprep.subr.bf16.mxu0 %v5202_v27  ;;  %v5232_v27 = vld [vmem:[#allocation22 + $0x244] ss:$8 sps:$4 sm:$0xff]  }
 0x52e   :  { %3545 = vmatpush1.bf16.msra.mxu0 %v5200_v28  ;;  %v5321_v28 = vld [vmem:[#allocation28 + $0x18] sm:$0xff]  }
 0x52f   :  { %3546 = vmatprep.subr.bf16.mxu0 %v5205_v30  ;;  %v5230_v30 = vld [vmem:[#allocation22 + $0x240] ss:$8 sps:$4 sm:$0xff]   ;;  %4732 = vmatpush3.bf16.msra.mxu1 %v5321_v28 }
 0x530   :  { %4733 = vmatprep.subr.bf16.mxu1 %v5322_v29  ;;  %v5278_v28 = vld [vmem:[#allocation22 + $0x340] ss:$8 sps:$4 sm:$0xff]   ;;  %v5283_v29 = vld [vmem:[#allocation22 + $0x354] ss:$8 sps:$4 sm:$0xff]  }
 0x532   :  { %3547 = vmatpush1.bf16.msra.mxu0 %v5203_v31  ;;  %v5235_v31 = vld [vmem:[#allocation22 + $0x254] ss:$8 sps:$4 sm:$0xff]  }
 0x533   :  { %3548 = vmatprep.subr.bf16.mxu0 %v5208_v33  ;;  %v5233_v33 = vld [vmem:[#allocation22 + $0x250] ss:$8 sps:$4 sm:$0xff]   ;;  %4734 = vmatpush3.bf16.msra.mxu1 %v5323_v32  ;;  %v5284_v32 = vld [vmem:[#allocation22 + $0x360] ss:$8 sps:$4 sm:$0xff]  }
 0x536   :  { %3549 = vmatpush1.bf16.msra.mxu0 %v5206_v35  ;;  %v5238_v35 = vld [vmem:[#allocation22 + $0x264] ss:$8 sps:$4 sm:$0xff]  }
 0x537   :  { %3550 = vmatprep.subr.bf16.mxu0 %v5211_v38  ;;  %v5241_v38 = vld [vmem:[#allocation22 + $0x274] ss:$8 sps:$4 sm:$0xff]  }
 0x538   :  { %v2498_v54 = vpop.f32.mrb[16].mxu1 }
 0x539   :  { %v2499_v55 = vadd.f32 %v2498_v54, %v1754_v13  ;;  %v2500_v50 = vpop.f32.mrb[17].mxu1  ;;  %v5239_v13 = vld [vmem:[#allocation22 + $0x270] ss:$8 sps:$4 sm:$0xff]   ;;  %v1761_v54 = vsub.s32 4, %v6161_v48 }
 0x53a   :  { %v2501_v57 = vadd.f32 %v2500_v50, %v1758_v42  ;;  %3551 = vmatpush1.bf16.msra.mxu0 %v5209_v40  ;;  %v2502_v60 = vpop.f32.mrb[18].mxu1  ;;  %v5244_v40 = vld [vmem:[#allocation22 + $0x284] ss:$8 sps:$4 sm:$0xff]   ;;  %v5242_v42 = vld [vmem:[#allocation22 + $0x280] ss:$8 sps:$4 sm:$0xff]  }
 0x53b   :  { %v2589_v0 = vmax.f32 %v2499_v55, 0.0  ;;  %v2503_v1 = vpop.f32.mrb[19].mxu1  ;;  %3552 = vmatprep.subr.bf16.mxu0 %v5214_v52  ;;  %v5250_v52 = vld [vmem:[#allocation22 + $0x2a4] ss:$8 sps:$4 sm:$0xff]   ;;  %v5248_v55 = vld [vmem:[#allocation22 + $0x2a0] ss:$8 sps:$4 sm:$0xff]   ;;  %v1762_v50 = vrot.slane %v6227_v41, %v1761_v54 }
 0x53c   :  { %v2590_v3 = vmax.f32 %v2501_v57, 0.0  ;;  %v5251_v57 = vld [vmem:[#allocation22 + $0x2b0] ss:$8 sps:$4 sm:$0xff]  }
 0x53d   :  { %v2639_v5 = vmul.f32 %v2608_v46, %v2589_v0  ;;  %v5253_v46 = vld [vmem:[#allocation22 + $0x2b4] ss:$8 sps:$4 sm:$0xff]   ;;  %v2540_v60 = vadd.f32 %v6236_v45, %v1762_v50  ;;  %v5257_v1 = vld [vmem:[#allocation22 + $0x2d0] ss:$8 sps:$4 sm:$0xff]   ;;  %v2666_v45 = vrot.slane %v6240_v47, %v1761_v54  ;;  %v5302_v50 = vld [vmem:[#allocation22 + $0x3c0] ss:$8 sps:$4 sm:$0xff]  }
 0x53e   :  { %v2640_v6 = vmul.f32 %v2612_v59, %v2590_v3  ;;  %3553 = vmatpush1.bf16.msra.mxu0 %v5212_v61  ;;  %v5256_v59 = vld [vmem:[#allocation22 + $0x2c4] ss:$8 sps:$4 sm:$0xff]   ;;  %v5254_v61 = vld [vmem:[#allocation22 + $0x2c0] ss:$8 sps:$4 sm:$0xff]  }
 0x53f   :  { %v2689_v8 = vadd.f32 %v2658_v53, %v2639_v5  ;;  %3554 = vmatprep.subr.bf16.mxu0 %v5217_v2  ;;  %v2591_v0 = vmax.f32 %v2540_v60, 0.0  ;;  %v2616_v53 = vrot.slane %v6232_v43, %v1761_v54  ;;  %v1774_v2 = vrot.slane %v6227_v41, %v1773_v62  ;;  %v5262_v3 = vld [vmem:[#allocation22 + $0x2e4] ss:$8 sps:$4 sm:$0xff]   ;;  %v5299_v54 = vld [vmem:[#allocation22 + $0x3b0] ss:$8 sps:$4 sm:$0xff]  }
 0x540   :  { %v2690_v10 = vadd.f32 %v2662_v4, %v2640_v6  ;;  %v5305_v60 = vld [vmem:[#allocation22 + $0x3d0] ss:$8 sps:$4 sm:$0xff]  }
 0x541   :  { %v2697_v14 = vpack.c.bf16 %v2689_v8, %v2689_v8  ;;  %v2641_v5 = vmul.f32 %v2616_v53, %v2591_v0  ;;  %v2628_v8 = vrot.slane %v6232_v43, %v1773_v62 }
 0x542   :  { %3555 = vmatpush1.bf16.msra.mxu0 %v5215_v56  ;;  %v2698_v11 = vpack.c.bf16 %v2690_v10, %v2690_v10  ;;  %v5260_v56 = vld [vmem:[#allocation22 + $0x2e0] ss:$8 sps:$4 sm:$0xff]   ;;  %v5265_v10 = vld [vmem:[#allocation22 + $0x2f4] ss:$8 sps:$4 sm:$0xff]  }
 0x543   :  { %3565 = vmatprep.subr.bf16.mxu0 %v5220_v9 }
 0x544   :  { %3556 = vmatprep.mubr.bf16.mxu0 %v2698_v11 }
 0x545   :  { %3557 = vmatmul.mubr.bf16.vlgmr.msra.gmra.mrb[8].mxu0 %v2697_v14  ;;  %v2691_v14 = vadd.f32 %v2666_v45, %v2641_v5  ;;  %v5325_v5 = vld [vmem:[#allocation28 + $0x28] sm:$0xff]   ;;  %v5327_v45 = vld [vmem:[#allocation28 + $0x30] sm:$0xff]  }
 0x546   :  { %3566 = vmatpush1.bf16.msra.mxu0 %v5218_v12  ;;  %3597 = vmatprep.mubr.bf16.mxu0 %v2700_v34  ;;  %v2678_v34 = vrot.slane %v6240_v47, %v1773_v62 }
 0x547   :  { %3567 = vmatprep.subr.bf16.mxu0 %v5223_v15  ;;  %v5263_v15 = vld [vmem:[#allocation22 + $0x2f0] ss:$8 sps:$4 sm:$0xff]  }
 0x54a   :  { %3568 = vmatpush1.bf16.msra.mxu0 %v5221_v18  ;;  %v2699_v18 = vpack.c.bf16 %v2691_v14, %v2691_v14 }
 0x54b   :  { %3569 = vmatprep.subr.bf16.mxu0 %v5226_v19  ;;  %v5266_v19 = vld [vmem:[#allocation22 + $0x300] ss:$8 sps:$4 sm:$0xff]  }
 0x54e   :  { %3570 = vmatpush1.bf16.msra.mxu0 %v5224_v22  ;;  %v5269_v22 = vld [vmem:[#allocation22 + $0x310] ss:$8 sps:$4 sm:$0xff]  }
 0x54f   :  { %3571 = vmatprep.subr.bf16.mxu0 %v5229_v23  ;;  %v5274_v23 = vld [vmem:[#allocation22 + $0x324] ss:$8 sps:$4 sm:$0xff]  }
 0x552   :  { %3572 = vmatpush1.bf16.msra.mxu0 %v5227_v26  ;;  %v5275_v26 = vld [vmem:[#allocation22 + $0x330] ss:$8 sps:$4 sm:$0xff]  }
 0x553   :  { %3573 = vmatprep.subr.bf16.mxu0 %v5232_v27  ;;  %v5280_v27 = vld [vmem:[#allocation22 + $0x344] ss:$8 sps:$4 sm:$0xff]  }
 0x556   :  { %3574 = vmatpush1.bf16.msra.mxu0 %v5230_v30  ;;  %v5281_v30 = vld [vmem:[#allocation22 + $0x350] ss:$8 sps:$4 sm:$0xff]  }
 0x557   :  { %3575 = vmatprep.subr.bf16.mxu0 %v5235_v31  ;;  %v5286_v31 = vld [vmem:[#allocation22 + $0x364] ss:$8 sps:$4 sm:$0xff]  }
 0x55a   :  { %3576 = vmatpush1.bf16.msra.mxu0 %v5233_v33  ;;  %v5289_v33 = vld [vmem:[#allocation22 + $0x374] ss:$8 sps:$4 sm:$0xff]  }
 0x55b   :  { %3577 = vmatprep.subr.bf16.mxu0 %v5238_v35  ;;  %v5287_v35 = vld [vmem:[#allocation22 + $0x370] ss:$8 sps:$4 sm:$0xff]  }
 0x55e   :  { %3578 = vmatpush1.bf16.msra.mxu0 %v5236_v37  ;;  %v5292_v37 = vld [vmem:[#allocation22 + $0x384] ss:$8 sps:$4 sm:$0xff]  }
 0x55f   :  { %3579 = vmatprep.subr.bf16.mxu0 %v5241_v38  ;;  %v5290_v38 = vld [vmem:[#allocation22 + $0x380] ss:$8 sps:$4 sm:$0xff]  }
 0x562   :  { %3580 = vmatpush1.bf16.msra.mxu0 %v5239_v13  ;;  %v5295_v13 = vld [vmem:[#allocation22 + $0x394] ss:$8 sps:$4 sm:$0xff]  }
 0x563   :  { %3581 = vmatprep.subr.bf16.mxu0 %v5244_v40  ;;  %v5293_v40 = vld [vmem:[#allocation22 + $0x390] ss:$8 sps:$4 sm:$0xff]  }
 0x566   :  { %3582 = vmatpush1.bf16.msra.mxu0 %v5242_v42  ;;  %v5298_v42 = vld [vmem:[#allocation22 + $0x3a4] ss:$8 sps:$4 sm:$0xff]  }
 0x567   :  { %3583 = vmatprep.subr.bf16.mxu0 %v5247_v44  ;;  %v5296_v44 = vld [vmem:[#allocation22 + $0x3a0] ss:$8 sps:$4 sm:$0xff]  }
 0x56a   :  { %3584 = vmatpush1.bf16.msra.mxu0 %v5245_v58  ;;  %v5301_v58 = vld [vmem:[#allocation22 + $0x3b4] ss:$8 sps:$4 sm:$0xff]  }
 0x56b   :  { %3585 = vmatprep.subr.bf16.mxu0 %v5250_v52  ;;  %v1769_v52 = vsub.s32 6, %v6161_v48  ;;  %v5308_v48 = vld [vmem:[#allocation22 + $0x3e0] ss:$8 sps:$4 sm:$0xff]  }
 0x56d   :  { %v2624_v62 = vrot.slane %v6232_v43, %v1769_v52  ;;  %v2674_v53 = vrot.slane %v6240_v47, %v1769_v52  ;;  %v5326_v43 = vld [vmem:[#allocation28 + $0x70] sm:$0xff]   ;;  %v5897_v47 = vmov 0.0  }
 0x56e   :  { %3586 = vmatpush1.bf16.msra.mxu0 %v5248_v55  ;;  %v1770_v55 = vrot.slane %v6227_v41, %v1769_v52  ;;  %v5313_v41 = vld [vmem:[#allocation22 + $0x3f4] ss:$8 sps:$4 sm:$0xff]  }
 0x56f   :  { %3587 = vmatprep.subr.bf16.mxu0 %v5253_v46  ;;  %v5304_v46 = vld [vmem:[#allocation22 + $0x3c4] ss:$8 sps:$4 sm:$0xff]  }
 0x572   :  { %3588 = vmatpush1.bf16.msra.mxu0 %v5251_v57 }
 0x573   :  { %3589 = vmatprep.subr.bf16.mxu0 %v5256_v59  ;;  %v5307_v59 = vld [vmem:[#allocation22 + $0x3d4] ss:$8 sps:$4 sm:$0xff]  }
 0x576   :  { %3590 = vmatpush1.bf16.msra.mxu0 %v5254_v61 }
 0x577   :  { %3591 = vmatprep.subr.bf16.mxu0 %v5259_v63  ;;  %v5310_v63 = vld [vmem:[#allocation22 + $0x3e4] ss:$8 sps:$4 sm:$0xff]  }
 0x578   :  { %v6273_v4 = vpop.f32.mrb[20].mxu1 }
 0x579   :  { %v2582_v6 = vpop.f32.mrb[21].mxu1  ;;  %v2581_v57 = vadd.f32 %v6273_v4, %v1770_v55  ;;  %v5324_v4 = vld [vmem:[#allocation28 + $0x68] sm:$0xff]  }
 0x57a   :  { %3592 = vmatpush1.bf16.msra.mxu0 %v5257_v1  ;;  %v2583_v7 = vadd.f32 %v2582_v6, %v1774_v2  ;;  %v2584_v9 = vpop.f32.mrb[22].mxu1  ;;  %v5311_v1 = vld [vmem:[#allocation22 + $0x3f0] ss:$8 sps:$4 sm:$0xff]   ;;  %4735 = vmatprep.subr.bf16.mxu1 %v5324_v4  ;;  %v5328_v6 = vld [vmem:[#allocation28 + $0x78] sm:$0xff]  }
 0x57b   :  { %3593 = vmatprep.subr.bf16.mxu0 %v5262_v3  ;;  %v2585_v11 = vpop.f32.mrb[23].mxu1  ;;  %v2593_v61 = vmax.f32 %v2581_v57, 0.0  ;;  %4736 = vmatpush3.bf16.msra.mxu1 %v5325_v5  ;;  %v3649_v9 = vld [vmem:[#allocation25] sm:$0x3]  ;;  %v5351_v4 = vld [vmem:[#allocation32 + $0x28] sm:$0xff]   ;;  %v5352_v5 = vld [vmem:[#allocation32 + $0x30] sm:$0xff]  }
 0x57c   :  { %v2594_v12 = vmax.f32 %v2583_v7, 0.0  ;;  %4737 = vmatprep.subr.bf16.mxu1 %v5326_v43  ;;  %v2831_v7 = vld [vmem:[#allocation23] sm:$0x3]  ;;  %v3654_v14 = vrot.slane %v3649_v9, %v6164_v49 }
 0x57d   :  { %v2643_v0 = vmul.f32 %v2624_v62, %v2593_v61  ;;  %v5341_v57 = vld [vmem:[%s6364_s3 + $0x18] sm:$0xff]   ;;  %v4385_v61 = vld [vmem:[%s6365_s26] ss:$0 sm:$0xff]  ;;  %v5344_v62 = vld [vmem:[%s6364_s3 + $0x30] sm:$0xff]  }
 0x57e   :  { %3594 = vmatpush1.bf16.msra.mxu0 %v5260_v56  ;;  %v2644_v16 = vmul.f32 %v2628_v8, %v2594_v12  ;;  %v5329_v56 = vld [vmem:[#allocation28 + $0x38] sm:$0xff]   ;;  %v2836_v8 = vrot.slane %v2831_v7, %v6164_v49 }
 0x57f   :  { %3595 = vmatprep.subr.bf16.mxu0 %v5265_v10  ;;  %v2693_v2 = vadd.f32 %v2674_v53, %v2643_v0  ;;  %4738 = vmatpush3.bf16.msra.mxu1 %v5327_v45  ;;  %v2840_v10 = vrot.slane %v2831_v7, %v6169_v51  ;;  %v3663_v12 = vld [vmem:[#allocation26] sm:$0x3] }
 0x580   :  { %v2694_v17 = vadd.f32 %v2678_v34, %v2644_v16  ;;  %4739 = vmatprep.subr.bf16.mxu1 %v5328_v6  ;;  %v5353_v43 = vld [vmem:[#allocation32 + $0x38] sm:$0xff]  }
 0x581   :  { %v2701_v3 = vpack.c.bf16 %v2693_v2, %v2693_v2  ;;  %v5349_v2 = vld [vmem:[#allocation32 + $0x18] sm:$0xff]  }
 0x582   :  { %3596 = vmatpush1.bf16.msra.mxu0 %v5263_v15  ;;  %v2702_v20 = vpack.c.bf16 %v2694_v17, %v2694_v17 }
 0x583   :  { %3606 = vmatprep.subr.bf16.mxu0 %v5268_v36  ;;  %4740 = vmatpush3.bf16.msra.mxu1 %v5329_v56  ;;  %v3658_v36 = vrot.slane %v3649_v9, %v6169_v51  ;;  %v4691_v9 = vld [vmem:[%s6366_s14] ss:$0 sm:$0xff] }
 0x584   :  { %4774 = vmatprep.subr.bf16.mxu1 %v5897_v47 }
 0x585   :  { %3598 = vmatmul.mubr.bf16.vlgmr.msra.gmra.mrb[8].mxu0 %v2699_v18 }
 0x586   :  { %3607 = vmatpush1.bf16.msra.mxu0 %v5266_v19  ;;  %3638 = vmatprep.mubr.bf16.mxu0 %v2702_v20  ;;  %v3668_v19 = vrot.slane %v3663_v12, %v6164_v49  ;;  %v5333_v49 = vld [vmem:[#allocation31 + $0x18] sm:$0xff]  }
 0x587   :  { %3608 = vmatprep.subr.bf16.mxu0 %v5271_v21 }
 0x58a   :  { %3609 = vmatpush1.bf16.msra.mxu0 %v5269_v22  ;;  %v3672_v22 = vrot.slane %v3663_v12, %v6169_v51  ;;  %v5334_v51 = vld [vmem:[#allocation31 + $0x20] sm:$0xff]  }
 0x58b   :  { %3610 = vmatprep.subr.bf16.mxu0 %v5274_v23 }
 0x58e   :  { %3611 = vmatpush1.bf16.msra.mxu0 %v5272_v24 }
 0x58f   :  { %3612 = vmatprep.subr.bf16.mxu0 %v5277_v25 }
 0x592   :  { %3613 = vmatpush1.bf16.msra.mxu0 %v5275_v26 }
 0x593   :  { %3614 = vmatprep.subr.bf16.mxu0 %v5280_v27 }
 0x596   :  { %3615 = vmatpush1.bf16.msra.mxu0 %v5278_v28  ;;  %v5330_v28 = vld [vmem:[#allocation31] sm:$0xff]  }
 0x597   :  { %3616 = vmatprep.subr.bf16.mxu0 %v5283_v29 }
 0x59a   :  { %3617 = vmatpush1.bf16.msra.mxu0 %v5281_v30  ;;  %v5331_v30 = vld [vmem:[#allocation31 + $0x8] sm:$0xff]  }
 0x59b   :  { %3618 = vmatprep.subr.bf16.mxu0 %v5286_v31  ;;  %v5332_v31 = vld [vmem:[#allocation31 + $0x10] sm:$0xff]  }
 0x59e   :  { %3619 = vmatpush1.bf16.msra.mxu0 %v5284_v32  ;;  %v5335_v32 = vld [vmem:[#allocation31 + $0x28] sm:$0xff]  }
 0x59f   :  { %3620 = vmatprep.subr.bf16.mxu0 %v5289_v33  ;;  %v5336_v33 = vld [vmem:[#allocation31 + $0x30] sm:$0xff]  }
 0x5a2   :  { %3621 = vmatpush1.bf16.msra.mxu0 %v5287_v35  ;;  %v5337_v35 = vld [vmem:[#allocation31 + $0x38] sm:$0xff]  }
 0x5a3   :  { %3622 = vmatprep.subr.bf16.mxu0 %v5292_v37 }
 0x5a6   :  { %3623 = vmatpush1.bf16.msra.mxu0 %v5290_v38  ;;  %v4658_v38 = vld [vmem:[#allocation29] ss:$0 sm:$0xff] }
 0x5a7   :  { %3624 = vmatprep.subr.bf16.mxu0 %v5295_v13 }
 0x5aa   :  { %3625 = vmatpush1.bf16.msra.mxu0 %v5293_v40 }
 0x5ab   :  { %3626 = vmatprep.subr.bf16.mxu0 %v5298_v42 }
 0x5ae   :  { %3627 = vmatpush1.bf16.msra.mxu0 %v5296_v44 }
 0x5af   :  { %3628 = vmatprep.subr.bf16.mxu0 %v5301_v58 }
 0x5b2   :  { %3629 = vmatpush1.bf16.msra.mxu0 %v5299_v54  ;;  %v5338_v54 = vld [vmem:[%s6364_s3] sm:$0xff]  }
 0x5b3   :  { %3630 = vmatprep.subr.bf16.mxu0 %v5304_v46  ;;  %v5339_v46 = vld [vmem:[%s6364_s3 + $0x8] sm:$0xff]  }
 0x5b6   :  { %3631 = vmatpush1.bf16.msra.mxu0 %v5302_v50  ;;  %v5340_v50 = vld [vmem:[%s6364_s3 + $0x10] sm:$0xff]  }
 0x5b7   :  { %3632 = vmatprep.subr.bf16.mxu0 %v5307_v59  ;;  %v5342_v59 = vld [vmem:[%s6364_s3 + $0x20] sm:$0xff]  }
 0x5ba   :  { %3633 = vmatpush1.bf16.msra.mxu0 %v5305_v60  ;;  %v5343_v60 = vld [vmem:[%s6364_s3 + $0x28] sm:$0xff]  }
 0x5bb   :  { %3634 = vmatprep.subr.bf16.mxu0 %v5310_v63  ;;  %v1603_v63 = vadd.f32 %v6224_v39, %v4385_v61  ;;  %v5348_v39 = vld [vmem:[#allocation32 + $0x10] sm:$0xff]  }
 0x5bd   :  { %v1608_v0 = vmax.f32 %v1603_v63, 0.0 }
 0x5be   :  { %3635 = vmatpush1.bf16.msra.mxu0 %v5308_v48  ;;  %v5345_v48 = vld [vmem:[%s6364_s3 + $0x38] sm:$0xff]  }
 0x5bf   :  { %3636 = vmatprep.subr.bf16.mxu0 %v5313_v41  ;;  %v3855_v53 = vpack.c.bf16 %v1608_v0, %v1608_v0  ;;  %v5346_v41 = vld [vmem:[#allocation32] sm:$0xff]  }
 0x5c2   :  { %3637 = vmatpush1.bf16.msra.mxu0 %v5311_v1  ;;  %v5347_v1 = vld [vmem:[#allocation32 + $0x8] sm:$0xff]  }
 0x5c5   :  { %3639 = vmatmul.mubr.bf16.vlgmr.msra.gmra.mrb[8].mxu0 %v2701_v3  ;;  %v5350_v3 = vld [vmem:[#allocation32 + $0x20] sm:$0xff]  }
 0x698   :  { %v3640_v11 = vpop.f32.mrb[8].mxu0 }
 0x699   :  { %v4836_v34 = vadd.f32 %v3640_v11, %v2836_v8  ;;  %v3642_v15 = vpop.f32.mrb[9].mxu0 }
 0x69a   :  { %v4837_v16 = vadd.f32 %v3642_v15, %v2840_v10  ;;  %v3644_v17 = vpop.f32.mrb[10].mxu0  ;;  %v4692_v15 = vld [vmem:[%s6367_s9] ss:$0 sm:$0xff] }
 0x69b   :  { %v3647_v18 = vmax.f32 %v4836_v34, 0.0  ;;  %v3645_v20 = vpop.f32.mrb[11].mxu0 }
 0x69c   :  { %v3648_v21 = vmax.f32 %v4837_v16, 0.0 }
 0x69d   :  { %v3661_v23 = vmul.f32 %v3654_v14, %v3647_v18 }
 0x69e   :  { %v3662_v24 = vmul.f32 %v3658_v36, %v3648_v21  ;;  %v4693_v36 = vld [vmem:[%s6038_s24] ss:$0 sm:$0xff] }
 0x69f   :  { %v3675_v25 = vadd.f32 %v3668_v19, %v3661_v23  ;;  %v4694_v19 = vld [vmem:[%s6048_s6] ss:$0 sm:$0xff] }
 0x6a0   :  { %v3676_v26 = vadd.f32 %v3672_v22, %v3662_v24 }
 0x6a1   :  { %v3677_v29 = vpack.c.bf16 %v3675_v25, %v3675_v25 }
 0x6a2   :  { %v3678_v27 = vpack.c.bf16 %v3676_v26, %v3676_v26 }
 0x6a4   :  { %3846 = vmatprep.mubr.bf16.mxu1 %v3678_v27 }
 0x6a5   :  { %3847 = vmatmul.mubr.bf16.vlgmr.msra.gmra.mrb[24].mxu1 %v3677_v29 }
 0x6a6   :  { %4775 = vmatpush3.bf16.msra.mxu1 %v5330_v28  ;;  %4790 = vmatprep.mubr.msk.bf16.mxu1 %vm5898_vm0, %v5897_v47 }
 0x6a7   :  { %4776 = vmatprep.subr.bf16.mxu1 %v5897_v47 }
 0x6aa   :  { %4777 = vmatpush3.bf16.msra.mxu1 %v5331_v30 }
 0x6ab   :  { %4778 = vmatprep.subr.bf16.mxu1 %v5897_v47 }
 0x6ae   :  { %4779 = vmatpush3.bf16.msra.mxu1 %v5332_v31 }
 0x6af   :  { %4780 = vmatprep.subr.bf16.mxu1 %v5897_v47 }
 0x6b2   :  { %4781 = vmatpush3.bf16.msra.mxu1 %v5333_v49 }
 0x6b3   :  { %4782 = vmatprep.subr.bf16.mxu1 %v5897_v47 }
 0x6b6   :  { %4783 = vmatpush3.bf16.msra.mxu1 %v5334_v51 }
 0x6b7   :  { %4784 = vmatprep.subr.bf16.mxu1 %v5897_v47 }
 0x6ba   :  { %4785 = vmatpush3.bf16.msra.mxu1 %v5335_v32 }
 0x6bb   :  { %4786 = vmatprep.subr.bf16.mxu1 %v5897_v47 }
 0x6be   :  { %4787 = vmatpush3.bf16.msra.mxu1 %v5336_v33 }
 0x6bf   :  { %4788 = vmatprep.subr.bf16.mxu1 %v5897_v47 }
 0x6c2   :  { %4789 = vmatpush3.bf16.msra.mxu1 %v5337_v35 }
 0x6c3   :  { %4794 = vmatprep.subr.bf16.mxu1 %v5897_v47 }
 0x778   :  { %v4741_v37 = vpop.f32.mrb[24].mxu1 }
 0x779   :  { %v4742_v13 = vpop.f32.mrb[25].mxu1 }
 0x77a   :  { %v4743_v40 = vadd.f32 %v4742_v13, %v4741_v37  ;;  %v4744_v42 = vpop.f32.mrb[26].mxu1 }
 0x77b   :  { %v4745_v44 = vpop.f32.mrb[27].mxu1 }
 0x77c   :  { %v3849_v58 = vadd.f32 %v4743_v40, %v4658_v38 }
 0x77e   :  { %v3854_v52 = vmax.f32 %v3849_v58, 0.0 }
 0x780   :  { %v3872_v55 = vpack.c.bf16 %v3854_v52, %v3854_v52 }
 0x782   :  { %4791 = vmatmul.mubr.bf16.vlgmr.msra.gmra.mrb[28].mxu1 %v3872_v55 }
 0x783   :  { %4795 = vmatpush3.bf16.msra.mxu1 %v5338_v54  ;;  %4810 = vmatprep.mubr.msk.bf16.mxu1 %vm5898_vm0, %v5897_v47 }
 0x784   :  { %4796 = vmatprep.subr.bf16.mxu1 %v5897_v47 }
 0x787   :  { %4797 = vmatpush3.bf16.msra.mxu1 %v5339_v46 }
 0x788   :  { %4798 = vmatprep.subr.bf16.mxu1 %v5897_v47 }
 0x78b   :  { %4799 = vmatpush3.bf16.msra.mxu1 %v5340_v50 }
 0x78c   :  { %4800 = vmatprep.subr.bf16.mxu1 %v5897_v47 }
 0x78f   :  { %4801 = vmatpush3.bf16.msra.mxu1 %v5341_v57 }
 0x790   :  { %4802 = vmatprep.subr.bf16.mxu1 %v5897_v47 }
 0x793   :  { %4803 = vmatpush3.bf16.msra.mxu1 %v5342_v59 }
 0x794   :  { %4804 = vmatprep.subr.bf16.mxu1 %v5897_v47 }
 0x797   :  { %4805 = vmatpush3.bf16.msra.mxu1 %v5343_v60 }
 0x798   :  { %4806 = vmatprep.subr.bf16.mxu1 %v5897_v47 }
 0x79b   :  { %4807 = vmatpush3.bf16.msra.mxu1 %v5344_v62 }
 0x79c   :  { %4808 = vmatprep.subr.bf16.mxu1 %v5897_v47 }
 0x79f   :  { %4809 = vmatpush3.bf16.msra.mxu1 %v5345_v48 }
 0x7a0   :  { %4814 = vmatprep.subr.bf16.mxu1 %v5897_v47 }
 0x7a2   :  { %4811 = vmatmul.mubr.bf16.vlgmr.msra.gmra.mrb[32].mxu1 %v3855_v53 }
 0x7a3   :  { %4830 = vmatprep.mubr.msk.bf16.mxu1 %vm5898_vm0, %v5897_v47  ;;  %4815 = vmatpush3.bf16.msra.mxu1 %v5346_v41 }
 0x7a4   :  { %4816 = vmatprep.subr.bf16.mxu1 %v5897_v47 }
 0x7a7   :  { %4817 = vmatpush3.bf16.msra.mxu1 %v5347_v1 }
 0x7a8   :  { %4818 = vmatprep.subr.bf16.mxu1 %v5897_v47 }
 0x7ab   :  { %4819 = vmatpush3.bf16.msra.mxu1 %v5348_v39 }
 0x7ac   :  { %4820 = vmatprep.subr.bf16.mxu1 %v5897_v47 }
 0x7af   :  { %4821 = vmatpush3.bf16.msra.mxu1 %v5349_v2 }
 0x7b0   :  { %4822 = vmatprep.subr.bf16.mxu1 %v5897_v47 }
 0x7b3   :  { %4823 = vmatpush3.bf16.msra.mxu1 %v5350_v3 }
 0x7b4   :  { %4824 = vmatprep.subr.bf16.mxu1 %v5897_v47 }
 0x7b7   :  { %4825 = vmatpush3.bf16.msra.mxu1 %v5351_v4 }
 0x7b8   :  { %4826 = vmatprep.subr.bf16.mxu1 %v5897_v47 }
 0x7bb   :  { %4827 = vmatpush3.bf16.msra.mxu1 %v5352_v5 }
 0x7bc   :  { %4828 = vmatprep.subr.bf16.mxu1 %v5897_v47 }
 0x7bf   :  { %4829 = vmatpush3.bf16.msra.mxu1 %v5353_v43 }
 0x855   :  { %v3971_v45 = vpop.f32.mrb[28].mxu1 }
 0x856   :  { %v4792_v6 = vpop.f32.mrb[29].mxu1 }
 0x857   :  { %v3974_v56 = vpop.f32.mrb[30].mxu1 }
 0x858   :  { %v4793_v7 = vpop.f32.mrb[31].mxu1 }
 0x875   :  { %v4059_v8 = vpop.f32.mrb[32].mxu1 }
 0x876   :  { %v4060_v10 = vadd.f32 %v4059_v8, %v3971_v45  ;;  %v4812_v11 = vpop.f32.mrb[33].mxu1 }
 0x877   :  { %v4062_v12 = vpop.f32.mrb[34].mxu1 }
 0x878   :  { %v4072_v34 = vadd.f32 %v4691_v9, %v4060_v10  ;;  %v4813_v14 = vpop.f32.mrb[35].mxu1 }
 0x87a   :  { %v4073_v16 = vmax.f32 %v4072_v34, 0.0 }
 0x87c   :  { %v4081_v17 = vmul.f32 %v4692_v15, %v4073_v16 }
 0x87e   :  { %v4089_v47 = vadd.f32 %v4693_v36, %v4081_v17 }
 0x880   :  { %v4090_v18 = vpack.c.bf16 %v4089_v47, %v4089_v47 }
 0x882   :  { %4831 = vmatmul.mubr.bf16.vlgmr.msra.gmra.mrb[36].mxu1 %v4090_v18 }
 0x955   :  { %v4196_v20 = vpop.f32.mrb[36].mxu1 }
 0x956   :  { %v4197_v21 = vadd.f32 %v4694_v19, %v4196_v20  ;;  %v4832_v22 = vpop.f32.mrb[37].mxu1 }
 0x957   :  { %v4199_v23 = vpop.f32.mrb[38].mxu1 }
 0x958   :  { %4202 = vst [vmem:[#allocation34] sm:$0xff] %v4197_v21  ;;  %v4833_v24 = vpop.f32.mrb[39].mxu1 }
 0x959   :  { %5805 = shalt.err (!%p5802_p10)
}
 0x95a   :  { %s5806_s24 = scalar_lea.hbm %s6053_s30, 128 }
 0x95b   :  { %p5807_p11 = scmp.ne.s32.totalorder %s6053_s30, %s5806_s24  ;;  %p5810_p12 = scmp.lt.u32.totalorder %s5806_s24, %s6053_s30 }
 0x95d   :  { %p5812_p13 = pnand %p5810_p12, %p5807_p11 }
 0x95f   :  { %5815 = shalt.err (!%p5812_p13)
}
 0x960   :  { %4212 = dma.vmem_to_hbm [thread:$0]  %s4210_s5, 128, %s6053_s30, [#allocation4]  }
 0x961   :  { %5838 = dma.done.wait [#allocation4], 128  }
 0x962   :  { %5839 = vsyncadd [#allocation4], 4294967168 }
 0x963   :  { %4216 = vsyncpa [#allocation3], 1 }
 0x964   :  { %4217 = vsyncpa [#allocation6], 1 }
 0x965   :  { %4218 = vsyncpa [#allocation9], 1 }
 0x966   :  { %4219 = vsyncpa [#allocation12], 1 }
 0x967   :  { %4220 = vsyncpa [#allocation15], 1 }
 0x968   :  { %4221 = vsyncpa [#allocation18], 1 }
 0x969   :  { %4222 = vsyncpa [#allocation21], 1 }
 0x96a   :  { %4223 = vsyncpa [#allocation24], 1 }
 0x96b   :  { %4224 = vsyncpa [#allocation27], 1 }
 0x96c   :  { %4225 = vsyncpa [#allocation30], 1 }
 0x96d   :  { %4226 = vsyncpa [#allocation33], 1 }
 0x96e   :  { %4227 = vsyncpa [#allocation4], 1 }

</bundles_post_ra>
